<compile_context>
chip_gen: v7x
topology: tpu7x:2x2x1
jax: 0.10.0
libtpu: 0.0.40
codegen_flags: <defaults>
</compile_context>

<pallas_src>
import functools
import math

import jax
import jax.numpy as jnp
from jax import lax
from jax.experimental import pallas as pl
from jax.experimental.pallas import tpu as pltpu


# ----------------------------- in-kernel helpers -----------------------------

def _layernorm(y, g, b, eps):
    # y: (R, D) f32, g/b: (1, D) f32
    mu = jnp.mean(y, axis=-1, keepdims=True)
    var = jnp.mean(jnp.square(y - mu), axis=-1, keepdims=True)
    return (y - mu) * lax.rsqrt(var + eps) * g + b


def _bf16_mm(a_f32, w_bf16, b_f32):
    # bf16 MXU matmul with f32 accumulation, f32 bias add
    y = jnp.dot(a_f32.astype(jnp.bfloat16), w_bf16,
                preferred_element_type=jnp.float32)
    return y + b_f32


# ------------------------------ Pallas kernels -------------------------------

def _embed_kernel(feats_ref, fpw_ref, fpb_ref, fpg_ref, fpbe_ref,
                  clssep_ref, pt_ref, eg_ref, eb_ref, o_ref,
                  *, eps_fp, eps_emb):
    # One example per grid step: frame_proj = Linear(F, D) -> LayerNorm(1e-5),
    # then BERT embeddings: [CLS] + frames + [SEP] + (pos + type0) -> LN(1e-12)
    feats = feats_ref[0]                                             # (T, F) f32
    vis = _bf16_mm(feats, fpw_ref[...], fpb_ref[...])                # (T, D) f32
    vis = _layernorm(vis, fpg_ref[...], fpbe_ref[...], eps_fp)

    slab = jnp.concatenate(
        [clssep_ref[0:1, :], vis, clssep_ref[1:2, :]], axis=0)       # (S, D)
    slab = slab + pt_ref[...]                                        # + pos/type
    o_ref[0] = _layernorm(slab, eg_ref[...], eb_ref[...], eps_emb)


def _bert_stack_kernel(x_ref, mask_ref,
                       qkvw_ref, qkvb_ref, wo_ref, bo_ref, g1_ref, b1_ref,
                       wi_ref, bi_ref, wo2_ref, bo2_ref, g2_ref, b2_ref,
                       o_ref, x_sc, ctx_sc, *, H, scale, eps):
    # grid = (B, L):  one example per b, one encoder layer per l.
    # x lives in the VMEM scratch x_sc across the whole layer sweep.
    l = pl.program_id(1)

    @pl.when(l == 0)
    def _():
        x_sc[...] = x_ref[0]                                         # load example

    x = x_sc[...]                                                    # (S, D) f32
    D = x.shape[-1]
    Dh = D // H

    # additive key-padding bias built in-kernel from the small (1, S) mask
    bias = jnp.where(mask_ref[0] > 0.0, 0.0, -1e9)                   # (1, S) f32

    # ---- fused QKV projection: one bf16 MXU matmul with N = 3D ----
    qkv = _bf16_mm(x, qkvw_ref[0], qkvb_ref[0])                      # (S, 3D) f32
    q_bf = (qkv[:, 0:D] * scale).astype(jnp.bfloat16)                # scale on (S,D)
    k_bf = qkv[:, D:2 * D].astype(jnp.bfloat16)
    v_bf = qkv[:, 2 * D:3 * D].astype(jnp.bfloat16)

    # ---- per-example multi-head attention (S x S scores, f32 softmax) ----
    # TODO(synk): batch heads into one dot_general (head batch dim) to better
    # fill the 256-wide MXU on v6e/v7x when Dh < 128.
    for h in range(H):                                               # static unroll
        sl = slice(h * Dh, (h + 1) * Dh)
        s = lax.dot_general(q_bf[:, sl], k_bf[:, sl],
                            (((1,), (1,)), ((), ())),
                            preferred_element_type=jnp.float32)      # (S, S)
        s = s + bias
        m = jnp.max(s, axis=-1, keepdims=True)
        e = jnp.exp(s - m)
        p = e / jnp.sum(e, axis=-1, keepdims=True)                   # exact div
        ctx_sc[:, sl] = jnp.dot(p.astype(jnp.bfloat16), v_bf[:, sl],
                                preferred_element_type=jnp.float32)

    attn_out = _bf16_mm(ctx_sc[...], wo_ref[0], bo_ref[0])
    x1 = _layernorm(attn_out + x, g1_ref[0], b1_ref[0], eps)

    # ---- FFN + residual + LN2 ----
    h1 = _bf16_mm(x1, wi_ref[0], bi_ref[0])
    # TODO(synk): HuggingFace BERT default is exact (erf) GELU; tanh approx used.
    h1 = jax.nn.gelu(h1, approximate=True).astype(jnp.bfloat16)      # early bf16
    ffn_out = jnp.dot(h1, wo2_ref[0],
                      preferred_element_type=jnp.float32) + bo2_ref[0]
    new_x = _layernorm(ffn_out + x1, g2_ref[0], b2_ref[0], eps)

    x_sc[...] = new_x                                                # carry to l+1

    @pl.when(l == pl.num_programs(1) - 1)
    def _():
        o_ref[0] = new_x                                             # final write


def _pool_proj_kernel(states_ref, mask_ref, w_ref, b_ref, o_ref):
    # _nonzero_avg_pool + [CLS] pooling + output_proj(Linear(2D, 1)) as a
    # VPU multiply + lane reduce.  Output is a sublane-dense (B, 1) column.
    states = states_ref[...]                                         # (B, S, D)
    mask = mask_ref[...]                                             # (B, S)
    masked = states * mask[:, :, None]
    length = jnp.sum(mask, axis=1, keepdims=True)                    # (B, 1)
    avg = jnp.sum(masked, axis=1) / (length + 1e-5)                  # (B, D)
    cls = states[:, 0, :]                                            # (B, D)
    red = jnp.sum(cls * w_ref[0:1, :] + avg * w_ref[1:2, :],
                  axis=1, keepdims=True) + b_ref[...]                # (B, 1)
    o_ref[...] = red


# ------------------------------ kernel wrappers -------------------------------

def _full_spec(a, grid_ndim):
    zeros = (0,) * a.ndim
    idx = {1: (lambda i, _z=zeros: _z),
           2: (lambda i, j, _z=zeros: _z)}[grid_ndim]
    return pl.BlockSpec(a.shape, idx)


_VMEM_LIMIT = 64 * 1024 * 1024


def embed_stage(feats, fp_w, fp_b, fp_g, fp_be, clssep, pos_type, emb_g, emb_be):
    B, T, Fdim = feats.shape
    D = fp_w.shape[1]
    S = T + 2
    params = (fp_w, fp_b, fp_g, fp_be, clssep, pos_type, emb_g, emb_be)
    return pl.pallas_call(
        functools.partial(_embed_kernel, eps_fp=1e-5, eps_emb=1e-12),
        grid=(B,),
        in_specs=[pl.BlockSpec((1, T, Fdim), lambda b: (b, 0, 0))] +
                 [_full_spec(a, 1) for a in params],
        out_specs=pl.BlockSpec((1, S, D), lambda b: (b, 0, 0)),
        out_shape=jax.ShapeDtypeStruct((B, S, D), jnp.float32),
        compiler_params=pltpu.CompilerParams(
            dimension_semantics=("parallel",),
            vmem_limit_bytes=_VMEM_LIMIT),
    )(feats, *params)


def bert_stack(x, mask3, p, H):
    B, S, D = x.shape
    L = p["qkv_w"].shape[0]
    scale = 1.0 / math.sqrt(D // H)

    def wspec(a):
        nrest = a.ndim - 1
        return pl.BlockSpec((1,) + a.shape[1:],
                            lambda b, l, _n=nrest: (l,) + (0,) * _n)

    weights = (p["qkv_w"], p["qkv_b"], p["wo"], p["bo"],
               p["ln1_g"], p["ln1_b"], p["wi"], p["bi"],
               p["wo2"], p["bo2"], p["ln2_g"], p["ln2_b"])

    in_specs = ([pl.BlockSpec((1, S, D), lambda b, l: (b, 0, 0)),
                 pl.BlockSpec((1, 1, S), lambda b, l: (b, 0, 0))] +
                [wspec(a) for a in weights])

    return pl.pallas_call(
        functools.partial(_bert_stack_kernel, H=H, scale=scale, eps=1e-12),
        grid=(B, L),
        in_specs=in_specs,
        out_specs=pl.BlockSpec((1, S, D), lambda b, l: (b, 0, 0)),
        out_shape=jax.ShapeDtypeStruct((B, S, D), jnp.float32),
        scratch_shapes=[pltpu.VMEM((S, D), jnp.float32),   # resident activation
                        pltpu.VMEM((S, D), jnp.float32)],  # attention context
        input_output_aliases={0: 0},                        # reuse x's HBM buffer
        compiler_params=pltpu.CompilerParams(
            dimension_semantics=("parallel", "arbitrary"),
            vmem_limit_bytes=_VMEM_LIMIT),
    )(x, mask3, *weights)


def pool_proj(states, mask, w2, b):
    B, S, D = states.shape
    args = (states, mask, w2, b)
    out = pl.pallas_call(
        _pool_proj_kernel,
        grid=(1,),
        in_specs=[_full_spec(a, 1) for a in args],
        out_specs=pl.BlockSpec((B, 1), lambda i: (0, 0)),
        out_shape=jax.ShapeDtypeStruct((B, 1), jnp.float32),
        compiler_params=pltpu.CompilerParams(
            dimension_semantics=("arbitrary",),
            vmem_limit_bytes=_VMEM_LIMIT),
    )(*args)
    return out[:, 0]                                                 # (B,)


# ------------------------------- model (glue) --------------------------------

def init_params(key, F, D, H, L, I, vocab=128, max_pos=64):
    ks = iter(jax.random.split(key, 16))

    def nrm(shape, dtype=jnp.float32):
        return (0.02 * jax.random.normal(next(ks), shape, jnp.float32)).astype(dtype)

    return {
        "fp_w": nrm((F, D), jnp.bfloat16),
        "fp_b": jnp.zeros((1, D), jnp.float32),
        "fp_g": jnp.ones((1, D), jnp.float32),
        "fp_be": jnp.zeros((1, D), jnp.float32),
        "word_emb": nrm((vocab, D)),
        "pos_emb": nrm((max_pos, D)),
        "type_emb": nrm((2, D)),
        "emb_g": jnp.ones((1, D), jnp.float32),
        "emb_be": jnp.zeros((1, D), jnp.float32),
        # output_proj weight stored as (2, D): row 0 -> cls pool, row 1 -> avg pool
        "out_w": nrm((2, D)),
        "out_b": jnp.zeros((1, 1), jnp.float32),
        # per-layer weights stacked on a leading L axis (single-call pipelining)
        "qkv_w": nrm((L, D, 3 * D), jnp.bfloat16),
        "qkv_b": jnp.zeros((L, 1, 3 * D), jnp.float32),
        "wo": nrm((L, D, D), jnp.bfloat16),
        "bo": jnp.zeros((L, 1, D), jnp.float32),
        "ln1_g": jnp.ones((L, 1, D), jnp.float32),
        "ln1_b": jnp.zeros((L, 1, D), jnp.float32),
        "wi": nrm((L, D, I), jnp.bfloat16),
        "bi": jnp.zeros((L, 1, I), jnp.float32),
        "wo2": nrm((L, I, D), jnp.bfloat16),
        "bo2": jnp.zeros((L, 1, D), jnp.float32),
        "ln2_g": jnp.ones((L, 1, D), jnp.float32),
        "ln2_b": jnp.zeros((L, 1, D), jnp.float32),
    }


def ms_forward(feats, p, H=4):
    B, T, _ = feats.shape
    D = p["fp_w"].shape[1]
    S = T + 2

    # frame padding mask (trivial reduction -> plain jnp in the wrapper)
    frame_mask = (jnp.sum(jnp.abs(feats), axis=2) > 0.0).astype(jnp.float32)
    full_mask = jnp.concatenate(
        [jnp.ones((B, 2), jnp.float32), frame_mask], axis=1)         # (B, S)

    # [CLS]/[SEP] word embeddings and (position + token-type-0) embeddings
    clssep = p["word_emb"][101:103]                                  # (2, D)
    pos_type = p["pos_emb"][:S] + p["type_emb"][0][None, :]          # (S, D)

    # fused frame_proj + embedding-LN -> (B, S, D) token slab
    x = embed_stage(feats, p["fp_w"], p["fp_b"], p["fp_g"], p["fp_be"],
                    clssep, pos_type, p["emb_g"], p["emb_be"])

    # whole BERT stack in one pallas_call; key-padding mask applied in-kernel
    x = bert_stack(x, full_mask.reshape(B, 1, S), p, H)

    # cls pool + nonzero-avg pool + output_proj -> logits
    return pool_proj(x, full_mask, p["out_w"], p["out_b"])


# ----------------------------------- main -------------------------------------

if __name__ == "__main__":
    # small, lane-friendly demo config: D multiple of 128, Dh = 32
    B, T, F, D, H, L, I = 2, 8, 32, 128, 4, 2, 256

    key = jax.random.PRNGKey(0)
    k_feat, k_param = jax.random.split(key)

    feats = jax.random.normal(k_feat, (B, T, F), jnp.float32)
    feats = feats.at[1, 6:].set(0.0)   # padded (all-zero) frames -> masked out

    params = init_params(k_param, F, D, H, L, I)

    fwd = jax.jit(functools.partial(ms_forward, H=H))
    logits = fwd(feats, params)
    jax.block_until_ready(logits)
    assert logits.shape == (B,)
    print("KERNEL_OK")
</pallas_src>

<mosaic_0001>
module attributes {stable_mosaic.version = 11 : i64} {
  func.func @_pool_proj_kernel(%arg0: i32, %arg1: memref<2x10x128xf32, #tpu.memory_space<vmem>>, %arg2: memref<2x10xf32, #tpu.memory_space<vmem>>, %arg3: memref<2x128xf32, #tpu.memory_space<vmem>>, %arg4: memref<1x1xf32, #tpu.memory_space<vmem>>, %arg5: memref<2x1xf32, #tpu.memory_space<vmem>>) attributes {dimension_semantics = [#tpu.dimension_semantics<arbitrary>], iteration_bounds = array<i64: 1>, scalar_prefetch = 0 : i64, scratch_operands = 0 : i64, tpu.core_type = #tpu.core_type<tc>, window_params = [{pipeline_mode = #tpu.pipeline_mode<synchronous>, transform_indices = @transform_0, window_bounds = array<i64: 2, 10, 128>}, {pipeline_mode = #tpu.pipeline_mode<synchronous>, transform_indices = @transform_1, window_bounds = array<i64: 2, 10>}, {pipeline_mode = #tpu.pipeline_mode<synchronous>, transform_indices = @transform_2, window_bounds = array<i64: 2, 128>}, {pipeline_mode = #tpu.pipeline_mode<synchronous>, transform_indices = @transform_3, window_bounds = array<i64: 1, 1>}, {pipeline_mode = #tpu.pipeline_mode<synchronous>, transform_indices = @transform_4, window_bounds = array<i64: 2, 1>}]} {
    %c0 = arith.constant 0 : index
    %c0_0 = arith.constant 0 : index
    %c0_1 = arith.constant 0 : index
    %0 = vector.load %arg1[%c0, %c0_0, %c0_1] : memref<2x10x128xf32, #tpu.memory_space<vmem>>, vector<2x10x128xf32>
    %c0_2 = arith.constant 0 : index
    %c0_3 = arith.constant 0 : index
    %1 = vector.load %arg2[%c0_2, %c0_3] : memref<2x10xf32, #tpu.memory_space<vmem>>, vector<2x10xf32>
    %2 = vector.shape_cast %1 : vector<2x10xf32> to vector<2x10x1xf32>
    %3 = vector.broadcast %2 : vector<2x10x1xf32> to vector<2x10x128xf32>
    %4 = arith.mulf %0, %3 : vector<2x10x128xf32>
    %cst = arith.constant dense<0.000000e+00> : vector<2xf32>
    %5 = vector.multi_reduction <add>, %1, %cst [1] : vector<2x10xf32> to vector<2xf32>
    %6 = vector.shape_cast %5 : vector<2xf32> to vector<2x1xf32>
    %cst_4 = arith.constant dense<0.000000e+00> : vector<2x128xf32>
    %7 = vector.multi_reduction <add>, %4, %cst_4 [1] : vector<2x10x128xf32> to vector<2x128xf32>
    %cst_5 = arith.constant 9.99999974E-6 : f32
    %8 = vector.broadcast %cst_5 : f32 to vector<2x1xf32>
    %9 = arith.addf %6, %8 : vector<2x1xf32>
    %10 = vector.broadcast %9 : vector<2x1xf32> to vector<2x128xf32>
    %11 = arith.divf %7, %10 : vector<2x128xf32>
    %12 = vector.extract_strided_slice %0 {offsets = [0, 0, 0], sizes = [2, 1, 128], strides = [1, 1, 1]} : vector<2x10x128xf32> to vector<2x1x128xf32>
    %13 = vector.shape_cast %12 : vector<2x1x128xf32> to vector<2x128xf32>
    %c0_6 = arith.constant 0 : index
    %c0_7 = arith.constant 0 : index
    %14 = vector.load %arg3[%c0_6, %c0_7] : memref<2x128xf32, #tpu.memory_space<vmem>>, vector<1x128xf32>
    %15 = vector.broadcast %14 : vector<1x128xf32> to vector<2x128xf32>
    %16 = arith.mulf %13, %15 : vector<2x128xf32>
    %c1 = arith.constant 1 : index
    %c0_8 = arith.constant 0 : index
    %17 = vector.load %arg3[%c1, %c0_8] : memref<2x128xf32, #tpu.memory_space<vmem>>, vector<1x128xf32>
    %18 = vector.broadcast %17 : vector<1x128xf32> to vector<2x128xf32>
    %19 = arith.mulf %11, %18 : vector<2x128xf32>
    %20 = arith.addf %16, %19 : vector<2x128xf32>
    %cst_9 = arith.constant dense<0.000000e+00> : vector<2xf32>
    %21 = vector.multi_reduction <add>, %20, %cst_9 [1] : vector<2x128xf32> to vector<2xf32>
    %22 = vector.shape_cast %21 : vector<2xf32> to vector<2x1xf32>
    %c0_10 = arith.constant 0 : index
    %c0_11 = arith.constant 0 : index
    %23 = vector.load %arg4[%c0_10, %c0_11] : memref<1x1xf32, #tpu.memory_space<vmem>>, vector<1x1xf32>
    %24 = vector.broadcast %23 : vector<1x1xf32> to vector<2x1xf32>
    %25 = arith.addf %22, %24 : vector<2x1xf32>
    %c0_12 = arith.constant 0 : index
    %c0_13 = arith.constant 0 : index
    %26 = vector.load %arg5[%c0_12, %c0_13] : memref<2x1xf32, #tpu.memory_space<vmem>>, vector<2x1xf32>
    tpu.vector_store %arg5[%c0_12, %c0_13], %25 {strides = array<i32>} : memref<2x1xf32, #tpu.memory_space<vmem>>, vector<2x1xf32>,
    return
  }
  func.func @transform_0(%arg0: i32) -> (i32, i32, i32) {
    %c0_i32 = arith.constant 0 : i32
    %c0_i32_0 = arith.constant 0 : i32
    %c0_i32_1 = arith.constant 0 : i32
    %c0_i32_2 = arith.constant 0 : i32
    return %c0_i32, %c0_i32_0, %c0_i32_1 : i32, i32, i32
  }
  func.func @transform_1(%arg0: i32) -> (i32, i32) {
    %c0_i32 = arith.constant 0 : i32
    %c0_i32_0 = arith.constant 0 : i32
    %c0_i32_1 = arith.constant 0 : i32
    return %c0_i32, %c0_i32_0 : i32, i32
  }
  func.func @transform_2(%arg0: i32) -> (i32, i32) {
    %c0_i32 = arith.constant 0 : i32
    %c0_i32_0 = arith.constant 0 : i32
    %c0_i32_1 = arith.constant 0 : i32
    return %c0_i32, %c0_i32_0 : i32, i32
  }
  func.func @transform_3(%arg0: i32) -> (i32, i32) {
    %c0_i32 = arith.constant 0 : i32
    %c0_i32_0 = arith.constant 0 : i32
    %c0_i32_1 = arith.constant 0 : i32
    return %c0_i32, %c0_i32_0 : i32, i32
  }
  func.func @transform_4(%arg0: i32) -> (i32, i32) {
    %c0_i32 = arith.constant 0 : i32
    %c0_i32_0 = arith.constant 0 : i32
    %c0_i32_1 = arith.constant 0 : i32
    return %c0_i32, %c0_i32_0 : i32, i32
  }
}

module attributes {stable_mosaic.version = 11 : i64} {
  func.func @_embed_kernel(%arg0: i32, %arg1: memref<1x8x32xf32, #tpu.memory_space<vmem>>, %arg2: memref<32x128xbf16, #tpu.memory_space<vmem>>, %arg3: memref<1x128xf32, #tpu.memory_space<vmem>>, %arg4: memref<1x128xf32, #tpu.memory_space<vmem>>, %arg5: memref<1x128xf32, #tpu.memory_space<vmem>>, %arg6: memref<2x128xf32, #tpu.memory_space<vmem>>, %arg7: memref<10x128xf32, #tpu.memory_space<vmem>>, %arg8: memref<1x128xf32, #tpu.memory_space<vmem>>, %arg9: memref<1x128xf32, #tpu.memory_space<vmem>>, %arg10: memref<1x10x128xf32, #tpu.memory_space<vmem>>) attributes {dimension_semantics = [#tpu.dimension_semantics<parallel>], iteration_bounds = array<i64: 2>, scalar_prefetch = 0 : i64, scratch_operands = 0 : i64, tpu.core_type = #tpu.core_type<tc>, window_params = [{transform_indices = @transform_0, window_bounds = array<i64: 1, 8, 32>}, {pipeline_mode = #tpu.pipeline_mode<synchronous>, transform_indices = @transform_1, window_bounds = array<i64: 32, 128>}, {pipeline_mode = #tpu.pipeline_mode<synchronous>, transform_indices = @transform_2, window_bounds = array<i64: 1, 128>}, {pipeline_mode = #tpu.pipeline_mode<synchronous>, transform_indices = @transform_3, window_bounds = array<i64: 1, 128>}, {pipeline_mode = #tpu.pipeline_mode<synchronous>, transform_indices = @transform_4, window_bounds = array<i64: 1, 128>}, {pipeline_mode = #tpu.pipeline_mode<synchronous>, transform_indices = @transform_5, window_bounds = array<i64: 2, 128>}, {pipeline_mode = #tpu.pipeline_mode<synchronous>, transform_indices = @transform_6, window_bounds = array<i64: 10, 128>}, {pipeline_mode = #tpu.pipeline_mode<synchronous>, transform_indices = @transform_7, window_bounds = array<i64: 1, 128>}, {pipeline_mode = #tpu.pipeline_mode<synchronous>, transform_indices = @transform_8, window_bounds = array<i64: 1, 128>}, {transform_indices = @transform_9, window_bounds = array<i64: 1, 10, 128>}]} {
    %c0 = arith.constant 0 : index
    %c0_0 = arith.constant 0 : index
    %c0_1 = arith.constant 0 : index
    %0 = vector.load %arg1[%c0, %c0_0, %c0_1] : memref<1x8x32xf32, #tpu.memory_space<vmem>>, vector<1x8x32xf32>
    %1 = vector.shape_cast %0 : vector<1x8x32xf32> to vector<8x32xf32>
    %c0_2 = arith.constant 0 : index
    %c0_3 = arith.constant 0 : index
    %2 = vector.load %arg2[%c0_2, %c0_3] : memref<32x128xbf16, #tpu.memory_space<vmem>>, vector<32x128xbf16>
    %c0_4 = arith.constant 0 : index
    %c0_5 = arith.constant 0 : index
    %3 = vector.load %arg3[%c0_4, %c0_5] : memref<1x128xf32, #tpu.memory_space<vmem>>, vector<1x128xf32>
    %4 = arith.truncf %1 : vector<8x32xf32> to vector<8x32xbf16>
    %cst = arith.constant dense<0.000000e+00> : vector<8x128xf32>
    %5 = tpu.matmul %4, %2, %cst {dimension_numbers = #tpu.dot_dimension_numbers<[1], [0], [0], [1], [0, 0, 1, 1], [], []>} : vector<8x32xbf16>, vector<32x128xbf16>, vector<8x128xf32> -> vector<8x128xf32>
    %6 = vector.broadcast %3 : vector<1x128xf32> to vector<8x128xf32>
    %7 = arith.addf %5, %6 : vector<8x128xf32>
    %c0_6 = arith.constant 0 : index
    %c0_7 = arith.constant 0 : index
    %8 = vector.load %arg4[%c0_6, %c0_7] : memref<1x128xf32, #tpu.memory_space<vmem>>, vector<1x128xf32>
    %c0_8 = arith.constant 0 : index
    %c0_9 = arith.constant 0 : index
    %9 = vector.load %arg5[%c0_8, %c0_9] : memref<1x128xf32, #tpu.memory_space<vmem>>, vector<1x128xf32>
    %cst_10 = arith.constant dense<0.000000e+00> : vector<8xf32>
    %10 = vector.multi_reduction <add>, %7, %cst_10 [1] : vector<8x128xf32> to vector<8xf32>
    %11 = vector.shape_cast %10 : vector<8xf32> to vector<8x1xf32>
    %cst_11 = arith.constant 1.280000e+02 : f32
    %12 = vector.broadcast %cst_11 : f32 to vector<8x1xf32>
    %13 = arith.divf %11, %12 : vector<8x1xf32>
    %14 = vector.broadcast %13 : vector<8x1xf32> to vector<8x128xf32>
    %15 = arith.subf %7, %14 : vector<8x128xf32>
    %16 = arith.mulf %15, %15 : vector<8x128xf32>
    %cst_12 = arith.constant dense<0.000000e+00> : vector<8xf32>
    %17 = vector.multi_reduction <add>, %16, %cst_12 [1] : vector<8x128xf32> to vector<8xf32>
    %18 = vector.shape_cast %17 : vector<8xf32> to vector<8x1xf32>
    %cst_13 = arith.constant 1.280000e+02 : f32
    %19 = vector.broadcast %cst_13 : f32 to vector<8x1xf32>
    %20 = arith.divf %18, %19 : vector<8x1xf32>
    %21 = vector.broadcast %13 : vector<8x1xf32> to vector<8x128xf32>
    %22 = arith.subf %7, %21 : vector<8x128xf32>
    %cst_14 = arith.constant 9.99999974E-6 : f32
    %23 = vector.broadcast %cst_14 : f32 to vector<8x1xf32>
    %24 = arith.addf %20, %23 : vector<8x1xf32>
    %25 = math.rsqrt %24 : vector<8x1xf32>
    %26 = vector.broadcast %25 : vector<8x1xf32> to vector<8x128xf32>
    %27 = arith.mulf %22, %26 : vector<8x128xf32>
    %28 = vector.broadcast %8 : vector<1x128xf32> to vector<8x128xf32>
    %29 = arith.mulf %27, %28 : vector<8x128xf32>
    %30 = vector.broadcast %9 : vector<1x128xf32> to vector<8x128xf32>
    %31 = arith.addf %29, %30 : vector<8x128xf32>
    %c0_15 = arith.constant 0 : index
    %c0_16 = arith.constant 0 : index
    %32 = vector.load %arg6[%c0_15, %c0_16] : memref<2x128xf32, #tpu.memory_space<vmem>>, vector<1x128xf32>
    %c1 = arith.constant 1 : index
    %c0_17 = arith.constant 0 : index
    %33 = vector.load %arg6[%c1, %c0_17] : memref<2x128xf32, #tpu.memory_space<vmem>>, vector<1x128xf32>
    %34 = tpu.concatenate %32, %31, %33 in 0 : vector<1x128xf32>, vector<8x128xf32>, vector<1x128xf32> -> vector<10x128xf32>
    %c0_18 = arith.constant 0 : index
    %c0_19 = arith.constant 0 : index
    %35 = vector.load %arg7[%c0_18, %c0_19] : memref<10x128xf32, #tpu.memory_space<vmem>>, vector<10x128xf32>
    %36 = arith.addf %34, %35 : vector<10x128xf32>
    %c0_20 = arith.constant 0 : index
    %c0_21 = arith.constant 0 : index
    %37 = vector.load %arg8[%c0_20, %c0_21] : memref<1x128xf32, #tpu.memory_space<vmem>>, vector<1x128xf32>
    %c0_22 = arith.constant 0 : index
    %c0_23 = arith.constant 0 : index
    %38 = vector.load %arg9[%c0_22, %c0_23] : memref<1x128xf32, #tpu.memory_space<vmem>>, vector<1x128xf32>
    %cst_24 = arith.constant dense<0.000000e+00> : vector<10xf32>
    %39 = vector.multi_reduction <add>, %36, %cst_24 [1] : vector<10x128xf32> to vector<10xf32>
    %40 = vector.shape_cast %39 : vector<10xf32> to vector<10x1xf32>
    %cst_25 = arith.constant 1.280000e+02 : f32
    %41 = vector.broadcast %cst_25 : f32 to vector<10x1xf32>
    %42 = arith.divf %40, %41 : vector<10x1xf32>
    %43 = vector.broadcast %42 : vector<10x1xf32> to vector<10x128xf32>
    %44 = arith.subf %36, %43 : vector<10x128xf32>
    %45 = arith.mulf %44, %44 : vector<10x128xf32>
    %cst_26 = arith.constant dense<0.000000e+00> : vector<10xf32>
    %46 = vector.multi_reduction <add>, %45, %cst_26 [1] : vector<10x128xf32> to vector<10xf32>
    %47 = vector.shape_cast %46 : vector<10xf32> to vector<10x1xf32>
    %cst_27 = arith.constant 1.280000e+02 : f32
    %48 = vector.broadcast %cst_27 : f32 to vector<10x1xf32>
    %49 = arith.divf %47, %48 : vector<10x1xf32>
    %50 = vector.broadcast %42 : vector<10x1xf32> to vector<10x128xf32>
    %51 = arith.subf %36, %50 : vector<10x128xf32>
    %cst_28 = arith.constant 9.99999996E-13 : f32
    %52 = vector.broadcast %cst_28 : f32 to vector<10x1xf32>
    %53 = arith.addf %49, %52 : vector<10x1xf32>
    %54 = math.rsqrt %53 : vector<10x1xf32>
    %55 = vector.broadcast %54 : vector<10x1xf32> to vector<10x128xf32>
    %56 = arith.mulf %51, %55 : vector<10x128xf32>
    %57 = vector.broadcast %37 : vector<1x128xf32> to vector<10x128xf32>
    %58 = arith.mulf %56, %57 : vector<10x128xf32>
    %59 = vector.broadcast %38 : vector<1x128xf32> to vector<10x128xf32>
    %60 = arith.addf %58, %59 : vector<10x128xf32>
    %c0_29 = arith.constant 0 : index
    %c0_30 = arith.constant 0 : index
    %c0_31 = arith.constant 0 : index
    %61 = vector.load %arg10[%c0_29, %c0_30, %c0_31] : memref<1x10x128xf32, #tpu.memory_space<vmem>>, vector<1x10x128xf32>
    %62 = vector.shape_cast %61 : vector<1x10x128xf32> to vector<10x128xf32>
    %63 = vector.shape_cast %60 : vector<10x128xf32> to vector<1x10x128xf32>
    tpu.vector_store %arg10[%c0_29, %c0_30, %c0_31], %63 {strides = array<i32>} : memref<1x10x128xf32, #tpu.memory_space<vmem>>, vector<1x10x128xf32>,
    return
  }
  func.func @transform_0(%arg0: i32) -> (i32, i32, i32) {
    %c0_i32 = arith.constant 0 : i32
    %c0_i32_0 = arith.constant 0 : i32
    %c0_i32_1 = arith.constant 0 : i32
    return %arg0, %c0_i32, %c0_i32_0 : i32, i32, i32
  }
  func.func @transform_1(%arg0: i32) -> (i32, i32) {
    %c0_i32 = arith.constant 0 : i32
    %c0_i32_0 = arith.constant 0 : i32
    %c0_i32_1 = arith.constant 0 : i32
    return %c0_i32, %c0_i32_0 : i32, i32
  }
  func.func @transform_2(%arg0: i32) -> (i32, i32) {
    %c0_i32 = arith.constant 0 : i32
    %c0_i32_0 = arith.constant 0 : i32
    %c0_i32_1 = arith.constant 0 : i32
    return %c0_i32, %c0_i32_0 : i32, i32
  }
  func.func @transform_3(%arg0: i32) -> (i32, i32) {
    %c0_i32 = arith.constant 0 : i32
    %c0_i32_0 = arith.constant 0 : i32
    %c0_i32_1 = arith.constant 0 : i32
    return %c0_i32, %c0_i32_0 : i32, i32
  }
  func.func @transform_4(%arg0: i32) -> (i32, i32) {
    %c0_i32 = arith.constant 0 : i32
    %c0_i32_0 = arith.constant 0 : i32
    %c0_i32_1 = arith.constant 0 : i32
    return %c0_i32, %c0_i32_0 : i32, i32
  }
  func.func @transform_5(%arg0: i32) -> (i32, i32) {
    %c0_i32 = arith.constant 0 : i32
    %c0_i32_0 = arith.constant 0 : i32
    %c0_i32_1 = arith.constant 0 : i32
    return %c0_i32, %c0_i32_0 : i32, i32
  }
  func.func @transform_6(%arg0: i32) -> (i32, i32) {
    %c0_i32 = arith.constant 0 : i32
    %c0_i32_0 = arith.constant 0 : i32
    %c0_i32_1 = arith.constant 0 : i32
    return %c0_i32, %c0_i32_0 : i32, i32
  }
  func.func @transform_7(%arg0: i32) -> (i32, i32) {
    %c0_i32 = arith.constant 0 : i32
    %c0_i32_0 = arith.constant 0 : i32
    %c0_i32_1 = arith.constant 0 : i32
    return %c0_i32, %c0_i32_0 : i32, i32
  }
  func.func @transform_8(%arg0: i32) -> (i32, i32) {
    %c0_i32 = arith.constant 0 : i32
    %c0_i32_0 = arith.constant 0 : i32
    %c0_i32_1 = arith.constant 0 : i32
    return %c0_i32, %c0_i32_0 : i32, i32
  }
  func.func @transform_9(%arg0: i32) -> (i32, i32, i32) {
    %c0_i32 = arith.constant 0 : i32
    %c0_i32_0 = arith.constant 0 : i32
    %c0_i32_1 = arith.constant 0 : i32
    return %arg0, %c0_i32, %c0_i32_0 : i32, i32, i32
  }
}

module attributes {stable_mosaic.version = 11 : i64} {
  func.func @_bert_stack_kernel(%arg0: i32, %arg1: i32, %arg2: memref<1x10x128xf32, #tpu.memory_space<vmem>>, %arg3: memref<1x1x10xf32, #tpu.memory_space<vmem>>, %arg4: memref<1x128x384xbf16, #tpu.memory_space<vmem>>, %arg5: memref<1x1x384xf32, #tpu.memory_space<vmem>>, %arg6: memref<1x128x128xbf16, #tpu.memory_space<vmem>>, %arg7: memref<1x1x128xf32, #tpu.memory_space<vmem>>, %arg8: memref<1x1x128xf32, #tpu.memory_space<vmem>>, %arg9: memref<1x1x128xf32, #tpu.memory_space<vmem>>, %arg10: memref<1x128x256xbf16, #tpu.memory_space<vmem>>, %arg11: memref<1x1x256xf32, #tpu.memory_space<vmem>>, %arg12: memref<1x256x128xbf16, #tpu.memory_space<vmem>>, %arg13: memref<1x1x128xf32, #tpu.memory_space<vmem>>, %arg14: memref<1x1x128xf32, #tpu.memory_space<vmem>>, %arg15: memref<1x1x128xf32, #tpu.memory_space<vmem>>, %arg16: memref<1x10x128xf32, #tpu.memory_space<vmem>>, %arg17: memref<10x128xf32, #tpu.memory_space<vmem>>, %arg18: memref<10x128xf32, #tpu.memory_space<vmem>>) attributes {dimension_semantics = [#tpu.dimension_semantics<parallel>, #tpu.dimension_semantics<arbitrary>], iteration_bounds = array<i64: 2, 2>, scalar_prefetch = 0 : i64, scratch_operands = 2 : i64, tpu.core_type = #tpu.core_type<tc>, window_params = [{transform_indices = @transform_0, window_bounds = array<i64: 1, 10, 128>}, {transform_indices = @transform_1, window_bounds = array<i64: 1, 1, 10>}, {transform_indices = @transform_2, window_bounds = array<i64: 1, 128, 384>}, {transform_indices = @transform_3, window_bounds = array<i64: 1, 1, 384>}, {transform_indices = @transform_4, window_bounds = array<i64: 1, 128, 128>}, {transform_indices = @transform_5, window_bounds = array<i64: 1, 1, 128>}, {transform_indices = @transform_6, window_bounds = array<i64: 1, 1, 128>}, {transform_indices = @transform_7, window_bounds = array<i64: 1, 1, 128>}, {transform_indices = @transform_8, window_bounds = array<i64: 1, 128, 256>}, {transform_indices = @transform_9, window_bounds = array<i64: 1, 1, 256>}, {transform_indices = @transform_10, window_bounds = array<i64: 1, 256, 128>}, {transform_indices = @transform_11, window_bounds = array<i64: 1, 1, 128>}, {transform_indices = @transform_12, window_bounds = array<i64: 1, 1, 128>}, {transform_indices = @transform_13, window_bounds = array<i64: 1, 1, 128>}, {transform_indices = @transform_14, window_bounds = array<i64: 1, 10, 128>}]} {
    %c0_i32 = arith.constant 0 : i32
    %0 = arith.cmpi eq, %arg1, %c0_i32 : i32
    %1 = arith.extui %0 : i1 to i32
    %c0_i32_0 = arith.constant 0 : i32
    %2 = arith.cmpi ne, %1, %c0_i32_0 : i32
    scf.if %2 {
      %c0_88 = arith.constant 0 : index
      %c0_89 = arith.constant 0 : index
      %c0_90 = arith.constant 0 : index
      %195 = vector.load %arg2[%c0_88, %c0_89, %c0_90] : memref<1x10x128xf32, #tpu.memory_space<vmem>>, vector<1x10x128xf32>
      %196 = vector.shape_cast %195 : vector<1x10x128xf32> to vector<10x128xf32>
      %c0_91 = arith.constant 0 : index
      %c0_92 = arith.constant 0 : index
      %197 = vector.load %arg17[%c0_91, %c0_92] : memref<10x128xf32, #tpu.memory_space<vmem>>, vector<10x128xf32>
      tpu.vector_store %arg17[%c0_91, %c0_92], %196 {strides = array<i32>} : memref<10x128xf32, #tpu.memory_space<vmem>>, vector<10x128xf32>,
    } else {
    }
    %c0 = arith.constant 0 : index
    %c0_1 = arith.constant 0 : index
    %3 = vector.load %arg17[%c0, %c0_1] : memref<10x128xf32, #tpu.memory_space<vmem>>, vector<10x128xf32>
    %c0_2 = arith.constant 0 : index
    %c0_3 = arith.constant 0 : index
    %c0_4 = arith.constant 0 : index
    %4 = vector.load %arg3[%c0_2, %c0_3, %c0_4] : memref<1x1x10xf32, #tpu.memory_space<vmem>>, vector<1x1x10xf32>
    %5 = vector.shape_cast %4 : vector<1x1x10xf32> to vector<1x10xf32>
    %cst = arith.constant 0.000000e+00 : f32
    %6 = vector.broadcast %cst : f32 to vector<1x10xf32>
    %7 = arith.cmpf ogt, %5, %6 : vector<1x10xf32>
    %cst_5 = arith.constant 0.000000e+00 : f32
    %cst_6 = arith.constant -1.000000e+09 : f32
    %8 = vector.broadcast %cst_5 : f32 to vector<1x10xf32>
    %9 = vector.broadcast %cst_6 : f32 to vector<1x10xf32>
    %10 = arith.select %7, %8, %9 : vector<1x10xi1>, vector<1x10xf32>
    %c0_7 = arith.constant 0 : index
    %c0_8 = arith.constant 0 : index
    %c0_9 = arith.constant 0 : index
    %11 = vector.load %arg4[%c0_7, %c0_8, %c0_9] : memref<1x128x384xbf16, #tpu.memory_space<vmem>>, vector<1x128x384xbf16>
    %12 = vector.shape_cast %11 : vector<1x128x384xbf16> to vector<128x384xbf16>
    %c0_10 = arith.constant 0 : index
    %c0_11 = arith.constant 0 : index
    %c0_12 = arith.constant 0 : index
    %13 = vector.load %arg5[%c0_10, %c0_11, %c0_12] : memref<1x1x384xf32, #tpu.memory_space<vmem>>, vector<1x1x384xf32>
    %14 = vector.shape_cast %13 : vector<1x1x384xf32> to vector<1x384xf32>
    %15 = arith.truncf %3 : vector<10x128xf32> to vector<10x128xbf16>
    %cst_13 = arith.constant dense<0.000000e+00> : vector<10x384xf32>
    %16 = tpu.matmul %15, %12, %cst_13 {dimension_numbers = #tpu.dot_dimension_numbers<[1], [0], [0], [1], [0, 0, 1, 1], [], []>} : vector<10x128xbf16>, vector<128x384xbf16>, vector<10x384xf32> -> vector<10x384xf32>
    %17 = vector.broadcast %14 : vector<1x384xf32> to vector<10x384xf32>
    %18 = arith.addf %16, %17 : vector<10x384xf32>
    %19 = vector.extract_strided_slice %18 {offsets = [0, 0], sizes = [10, 128], strides = [1, 1]} : vector<10x384xf32> to vector<10x128xf32>
    %cst_14 = arith.constant 0.176776692 : f32
    %20 = vector.broadcast %cst_14 : f32 to vector<10x128xf32>
    %21 = arith.mulf %19, %20 : vector<10x128xf32>
    %22 = arith.truncf %21 : vector<10x128xf32> to vector<10x128xbf16>
    %23 = vector.extract_strided_slice %18 {offsets = [0, 128], sizes = [10, 128], strides = [1, 1]} : vector<10x384xf32> to vector<10x128xf32>
    %24 = arith.truncf %23 : vector<10x128xf32> to vector<10x128xbf16>
    %25 = vector.extract_strided_slice %18 {offsets = [0, 256], sizes = [10, 128], strides = [1, 1]} : vector<10x384xf32> to vector<10x128xf32>
    %26 = arith.truncf %25 : vector<10x128xf32> to vector<10x128xbf16>
    %27 = vector.extract_strided_slice %22 {offsets = [0, 0], sizes = [10, 32], strides = [1, 1]} : vector<10x128xbf16> to vector<10x32xbf16>
    %28 = vector.extract_strided_slice %24 {offsets = [0, 0], sizes = [10, 32], strides = [1, 1]} : vector<10x128xbf16> to vector<10x32xbf16>
    %cst_15 = arith.constant dense<0.000000e+00> : vector<10x10xf32>
    %29 = tpu.matmul %27, %28, %cst_15 {dimension_numbers = #tpu.dot_dimension_numbers<[1], [1], [0], [0], [0, 0, 1, 0], [], []>} : vector<10x32xbf16>, vector<10x32xbf16>, vector<10x10xf32> -> vector<10x10xf32>
    %30 = vector.broadcast %10 : vector<1x10xf32> to vector<10x10xf32>
    %31 = arith.addf %29, %30 : vector<10x10xf32>
    %cst_16 = arith.constant dense<0xFF800000> : vector<10xf32>
    %32 = vector.multi_reduction <maximumf>, %31, %cst_16 [1] : vector<10x10xf32> to vector<10xf32>
    %33 = vector.shape_cast %32 : vector<10xf32> to vector<10x1xf32>
    %34 = vector.broadcast %33 : vector<10x1xf32> to vector<10x10xf32>
    %35 = arith.subf %31, %34 : vector<10x10xf32>
    %36 = math.exp %35 : vector<10x10xf32>
    %cst_17 = arith.constant dense<0.000000e+00> : vector<10xf32>
    %37 = vector.multi_reduction <add>, %36, %cst_17 [1] : vector<10x10xf32> to vector<10xf32>
    %38 = vector.shape_cast %37 : vector<10xf32> to vector<10x1xf32>
    %39 = vector.broadcast %38 : vector<10x1xf32> to vector<10x10xf32>
    %40 = arith.divf %36, %39 : vector<10x10xf32>
    %41 = arith.truncf %40 : vector<10x10xf32> to vector<10x10xbf16>
    %42 = vector.extract_strided_slice %26 {offsets = [0, 0], sizes = [10, 32], strides = [1, 1]} : vector<10x128xbf16> to vector<10x32xbf16>
    %cst_18 = arith.constant dense<0.000000e+00> : vector<10x32xf32>
    %43 = tpu.matmul %41, %42, %cst_18 {dimension_numbers = #tpu.dot_dimension_numbers<[1], [0], [0], [1], [0, 0, 1, 1], [], []>} : vector<10x10xbf16>, vector<10x32xbf16>, vector<10x32xf32> -> vector<10x32xf32>
    %c0_19 = arith.constant 0 : index
    %c0_20 = arith.constant 0 : index
    %44 = vector.load %arg18[%c0_19, %c0_20] : memref<10x128xf32, #tpu.memory_space<vmem>>, vector<10x32xf32>
    tpu.vector_store %arg18[%c0_19, %c0_20], %43 {strides = array<i32>} : memref<10x128xf32, #tpu.memory_space<vmem>>, vector<10x32xf32>,
    %45 = vector.extract_strided_slice %22 {offsets = [0, 32], sizes = [10, 32], strides = [1, 1]} : vector<10x128xbf16> to vector<10x32xbf16>
    %46 = vector.extract_strided_slice %24 {offsets = [0, 32], sizes = [10, 32], strides = [1, 1]} : vector<10x128xbf16> to vector<10x32xbf16>
    %cst_21 = arith.constant dense<0.000000e+00> : vector<10x10xf32>
    %47 = tpu.matmul %45, %46, %cst_21 {dimension_numbers = #tpu.dot_dimension_numbers<[1], [1], [0], [0], [0, 0, 1, 0], [], []>} : vector<10x32xbf16>, vector<10x32xbf16>, vector<10x10xf32> -> vector<10x10xf32>
    %48 = vector.broadcast %10 : vector<1x10xf32> to vector<10x10xf32>
    %49 = arith.addf %47, %48 : vector<10x10xf32>
    %cst_22 = arith.constant dense<0xFF800000> : vector<10xf32>
    %50 = vector.multi_reduction <maximumf>, %49, %cst_22 [1] : vector<10x10xf32> to vector<10xf32>
    %51 = vector.shape_cast %50 : vector<10xf32> to vector<10x1xf32>
    %52 = vector.broadcast %51 : vector<10x1xf32> to vector<10x10xf32>
    %53 = arith.subf %49, %52 : vector<10x10xf32>
    %54 = math.exp %53 : vector<10x10xf32>
    %cst_23 = arith.constant dense<0.000000e+00> : vector<10xf32>
    %55 = vector.multi_reduction <add>, %54, %cst_23 [1] : vector<10x10xf32> to vector<10xf32>
    %56 = vector.shape_cast %55 : vector<10xf32> to vector<10x1xf32>
    %57 = vector.broadcast %56 : vector<10x1xf32> to vector<10x10xf32>
    %58 = arith.divf %54, %57 : vector<10x10xf32>
    %59 = arith.truncf %58 : vector<10x10xf32> to vector<10x10xbf16>
    %60 = vector.extract_strided_slice %26 {offsets = [0, 32], sizes = [10, 32], strides = [1, 1]} : vector<10x128xbf16> to vector<10x32xbf16>
    %cst_24 = arith.constant dense<0.000000e+00> : vector<10x32xf32>
    %61 = tpu.matmul %59, %60, %cst_24 {dimension_numbers = #tpu.dot_dimension_numbers<[1], [0], [0], [1], [0, 0, 1, 1], [], []>} : vector<10x10xbf16>, vector<10x32xbf16>, vector<10x32xf32> -> vector<10x32xf32>
    %c0_25 = arith.constant 0 : index
    %c32 = arith.constant 32 : index
    %62 = vector.load %arg18[%c0_25, %c32] : memref<10x128xf32, #tpu.memory_space<vmem>>, vector<10x32xf32>
    tpu.vector_store %arg18[%c0_25, %c32], %61 {strides = array<i32>} : memref<10x128xf32, #tpu.memory_space<vmem>>, vector<10x32xf32>,
    %63 = vector.extract_strided_slice %22 {offsets = [0, 64], sizes = [10, 32], strides = [1, 1]} : vector<10x128xbf16> to vector<10x32xbf16>
    %64 = vector.extract_strided_slice %24 {offsets = [0, 64], sizes = [10, 32], strides = [1, 1]} : vector<10x128xbf16> to vector<10x32xbf16>
    %cst_26 = arith.constant dense<0.000000e+00> : vector<10x10xf32>
    %65 = tpu.matmul %63, %64, %cst_26 {dimension_numbers = #tpu.dot_dimension_numbers<[1], [1], [0], [0], [0, 0, 1, 0], [], []>} : vector<10x32xbf16>, vector<10x32xbf16>, vector<10x10xf32> -> vector<10x10xf32>
    %66 = vector.broadcast %10 : vector<1x10xf32> to vector<10x10xf32>
    %67 = arith.addf %65, %66 : vector<10x10xf32>
    %cst_27 = arith.constant dense<0xFF800000> : vector<10xf32>
    %68 = vector.multi_reduction <maximumf>, %67, %cst_27 [1] : vector<10x10xf32> to vector<10xf32>
    %69 = vector.shape_cast %68 : vector<10xf32> to vector<10x1xf32>
    %70 = vector.broadcast %69 : vector<10x1xf32> to vector<10x10xf32>
    %71 = arith.subf %67, %70 : vector<10x10xf32>
    %72 = math.exp %71 : vector<10x10xf32>
    %cst_28 = arith.constant dense<0.000000e+00> : vector<10xf32>
    %73 = vector.multi_reduction <add>, %72, %cst_28 [1] : vector<10x10xf32> to vector<10xf32>
    %74 = vector.shape_cast %73 : vector<10xf32> to vector<10x1xf32>
    %75 = vector.broadcast %74 : vector<10x1xf32> to vector<10x10xf32>
    %76 = arith.divf %72, %75 : vector<10x10xf32>
    %77 = arith.truncf %76 : vector<10x10xf32> to vector<10x10xbf16>
    %78 = vector.extract_strided_slice %26 {offsets = [0, 64], sizes = [10, 32], strides = [1, 1]} : vector<10x128xbf16> to vector<10x32xbf16>
    %cst_29 = arith.constant dense<0.000000e+00> : vector<10x32xf32>
    %79 = tpu.matmul %77, %78, %cst_29 {dimension_numbers = #tpu.dot_dimension_numbers<[1], [0], [0], [1], [0, 0, 1, 1], [], []>} : vector<10x10xbf16>, vector<10x32xbf16>, vector<10x32xf32> -> vector<10x32xf32>
    %c0_30 = arith.constant 0 : index
    %c64 = arith.constant 64 : index
    %80 = vector.load %arg18[%c0_30, %c64] : memref<10x128xf32, #tpu.memory_space<vmem>>, vector<10x32xf32>
    tpu.vector_store %arg18[%c0_30, %c64], %79 {strides = array<i32>} : memref<10x128xf32, #tpu.memory_space<vmem>>, vector<10x32xf32>,
    %81 = vector.extract_strided_slice %22 {offsets = [0, 96], sizes = [10, 32], strides = [1, 1]} : vector<10x128xbf16> to vector<10x32xbf16>
    %82 = vector.extract_strided_slice %24 {offsets = [0, 96], sizes = [10, 32], strides = [1, 1]} : vector<10x128xbf16> to vector<10x32xbf16>
    %cst_31 = arith.constant dense<0.000000e+00> : vector<10x10xf32>
    %83 = tpu.matmul %81, %82, %cst_31 {dimension_numbers = #tpu.dot_dimension_numbers<[1], [1], [0], [0], [0, 0, 1, 0], [], []>} : vector<10x32xbf16>, vector<10x32xbf16>, vector<10x10xf32> -> vector<10x10xf32>
    %84 = vector.broadcast %10 : vector<1x10xf32> to vector<10x10xf32>
    %85 = arith.addf %83, %84 : vector<10x10xf32>
    %cst_32 = arith.constant dense<0xFF800000> : vector<10xf32>
    %86 = vector.multi_reduction <maximumf>, %85, %cst_32 [1] : vector<10x10xf32> to vector<10xf32>
    %87 = vector.shape_cast %86 : vector<10xf32> to vector<10x1xf32>
    %88 = vector.broadcast %87 : vector<10x1xf32> to vector<10x10xf32>
    %89 = arith.subf %85, %88 : vector<10x10xf32>
    %90 = math.exp %89 : vector<10x10xf32>
    %cst_33 = arith.constant dense<0.000000e+00> : vector<10xf32>
    %91 = vector.multi_reduction <add>, %90, %cst_33 [1] : vector<10x10xf32> to vector<10xf32>
    %92 = vector.shape_cast %91 : vector<10xf32> to vector<10x1xf32>
    %93 = vector.broadcast %92 : vector<10x1xf32> to vector<10x10xf32>
    %94 = arith.divf %90, %93 : vector<10x10xf32>
    %95 = arith.truncf %94 : vector<10x10xf32> to vector<10x10xbf16>
    %96 = vector.extract_strided_slice %26 {offsets = [0, 96], sizes = [10, 32], strides = [1, 1]} : vector<10x128xbf16> to vector<10x32xbf16>
    %cst_34 = arith.constant dense<0.000000e+00> : vector<10x32xf32>
    %97 = tpu.matmul %95, %96, %cst_34 {dimension_numbers = #tpu.dot_dimension_numbers<[1], [0], [0], [1], [0, 0, 1, 1], [], []>} : vector<10x10xbf16>, vector<10x32xbf16>, vector<10x32xf32> -> vector<10x32xf32>
    %c0_35 = arith.constant 0 : index
    %c96 = arith.constant 96 : index
    %98 = vector.load %arg18[%c0_35, %c96] : memref<10x128xf32, #tpu.memory_space<vmem>>, vector<10x32xf32>
    tpu.vector_store %arg18[%c0_35, %c96], %97 {strides = array<i32>} : memref<10x128xf32, #tpu.memory_space<vmem>>, vector<10x32xf32>,
    %c0_36 = arith.constant 0 : index
    %c0_37 = arith.constant 0 : index
    %99 = vector.load %arg18[%c0_36, %c0_37] : memref<10x128xf32, #tpu.memory_space<vmem>>, vector<10x128xf32>
    %c0_38 = arith.constant 0 : index
    %c0_39 = arith.constant 0 : index
    %c0_40 = arith.constant 0 : index
    %100 = vector.load %arg6[%c0_38, %c0_39, %c0_40] : memref<1x128x128xbf16, #tpu.memory_space<vmem>>, vector<1x128x128xbf16>
    %101 = vector.shape_cast %100 : vector<1x128x128xbf16> to vector<128x128xbf16>
    %c0_41 = arith.constant 0 : index
    %c0_42 = arith.constant 0 : index
    %c0_43 = arith.constant 0 : index
    %102 = vector.load %arg7[%c0_41, %c0_42, %c0_43] : memref<1x1x128xf32, #tpu.memory_space<vmem>>, vector<1x1x128xf32>
    %103 = vector.shape_cast %102 : vector<1x1x128xf32> to vector<1x128xf32>
    %104 = arith.truncf %99 : vector<10x128xf32> to vector<10x128xbf16>
    %cst_44 = arith.constant dense<0.000000e+00> : vector<10x128xf32>
    %105 = tpu.matmul %104, %101, %cst_44 {dimension_numbers = #tpu.dot_dimension_numbers<[1], [0], [0], [1], [0, 0, 1, 1], [], []>} : vector<10x128xbf16>, vector<128x128xbf16>, vector<10x128xf32> -> vector<10x128xf32>
    %106 = vector.broadcast %103 : vector<1x128xf32> to vector<10x128xf32>
    %107 = arith.addf %105, %106 : vector<10x128xf32>
    %108 = arith.addf %107, %3 : vector<10x128xf32>
    %c0_45 = arith.constant 0 : index
    %c0_46 = arith.constant 0 : index
    %c0_47 = arith.constant 0 : index
    %109 = vector.load %arg8[%c0_45, %c0_46, %c0_47] : memref<1x1x128xf32, #tpu.memory_space<vmem>>, vector<1x1x128xf32>
    %110 = vector.shape_cast %109 : vector<1x1x128xf32> to vector<1x128xf32>
    %c0_48 = arith.constant 0 : index
    %c0_49 = arith.constant 0 : index
    %c0_50 = arith.constant 0 : index
    %111 = vector.load %arg9[%c0_48, %c0_49, %c0_50] : memref<1x1x128xf32, #tpu.memory_space<vmem>>, vector<1x1x128xf32>
    %112 = vector.shape_cast %111 : vector<1x1x128xf32> to vector<1x128xf32>
    %cst_51 = arith.constant dense<0.000000e+00> : vector<10xf32>
    %113 = vector.multi_reduction <add>, %108, %cst_51 [1] : vector<10x128xf32> to vector<10xf32>
    %114 = vector.shape_cast %113 : vector<10xf32> to vector<10x1xf32>
    %cst_52 = arith.constant 1.280000e+02 : f32
    %115 = vector.broadcast %cst_52 : f32 to vector<10x1xf32>
    %116 = arith.divf %114, %115 : vector<10x1xf32>
    %117 = vector.broadcast %116 : vector<10x1xf32> to vector<10x128xf32>
    %118 = arith.subf %108, %117 : vector<10x128xf32>
    %119 = arith.mulf %118, %118 : vector<10x128xf32>
    %cst_53 = arith.constant dense<0.000000e+00> : vector<10xf32>
    %120 = vector.multi_reduction <add>, %119, %cst_53 [1] : vector<10x128xf32> to vector<10xf32>
    %121 = vector.shape_cast %120 : vector<10xf32> to vector<10x1xf32>
    %cst_54 = arith.constant 1.280000e+02 : f32
    %122 = vector.broadcast %cst_54 : f32 to vector<10x1xf32>
    %123 = arith.divf %121, %122 : vector<10x1xf32>
    %124 = vector.broadcast %116 : vector<10x1xf32> to vector<10x128xf32>
    %125 = arith.subf %108, %124 : vector<10x128xf32>
    %cst_55 = arith.constant 9.99999996E-13 : f32
    %126 = vector.broadcast %cst_55 : f32 to vector<10x1xf32>
    %127 = arith.addf %123, %126 : vector<10x1xf32>
    %128 = math.rsqrt %127 : vector<10x1xf32>
    %129 = vector.broadcast %128 : vector<10x1xf32> to vector<10x128xf32>
    %130 = arith.mulf %125, %129 : vector<10x128xf32>
    %131 = vector.broadcast %110 : vector<1x128xf32> to vector<10x128xf32>
    %132 = arith.mulf %130, %131 : vector<10x128xf32>
    %133 = vector.broadcast %112 : vector<1x128xf32> to vector<10x128xf32>
    %134 = arith.addf %132, %133 : vector<10x128xf32>
    %c0_56 = arith.constant 0 : index
    %c0_57 = arith.constant 0 : index
    %c0_58 = arith.constant 0 : index
    %135 = vector.load %arg10[%c0_56, %c0_57, %c0_58] : memref<1x128x256xbf16, #tpu.memory_space<vmem>>, vector<1x128x256xbf16>
    %136 = vector.shape_cast %135 : vector<1x128x256xbf16> to vector<128x256xbf16>
    %c0_59 = arith.constant 0 : index
    %c0_60 = arith.constant 0 : index
    %c0_61 = arith.constant 0 : index
    %137 = vector.load %arg11[%c0_59, %c0_60, %c0_61] : memref<1x1x256xf32, #tpu.memory_space<vmem>>, vector<1x1x256xf32>
    %138 = vector.shape_cast %137 : vector<1x1x256xf32> to vector<1x256xf32>
    %139 = arith.truncf %134 : vector<10x128xf32> to vector<10x128xbf16>
    %cst_62 = arith.constant dense<0.000000e+00> : vector<10x256xf32>
    %140 = tpu.matmul %139, %136, %cst_62 {dimension_numbers = #tpu.dot_dimension_numbers<[1], [0], [0], [1], [0, 0, 1, 1], [], []>} : vector<10x128xbf16>, vector<128x256xbf16>, vector<10x256xf32> -> vector<10x256xf32>
    %141 = vector.broadcast %138 : vector<1x256xf32> to vector<10x256xf32>
    %142 = arith.addf %140, %141 : vector<10x256xf32>
    %143 = arith.mulf %142, %142 : vector<10x256xf32>
    %144 = arith.mulf %142, %143 : vector<10x256xf32>
    %cst_63 = arith.constant 4.471500e-02 : f32
    %145 = vector.broadcast %cst_63 : f32 to vector<10x256xf32>
    %146 = arith.mulf %145, %144 : vector<10x256xf32>
    %147 = arith.addf %142, %146 : vector<10x256xf32>
    %cst_64 = arith.constant 0.797884583 : f32
    %148 = vector.broadcast %cst_64 : f32 to vector<10x256xf32>
    %149 = arith.mulf %148, %147 : vector<10x256xf32>
    %150 = math.tanh %149 : vector<10x256xf32>
    %cst_65 = arith.constant 1.000000e+00 : f32
    %151 = vector.broadcast %cst_65 : f32 to vector<10x256xf32>
    %152 = arith.addf %151, %150 : vector<10x256xf32>
    %cst_66 = arith.constant 5.000000e-01 : f32
    %153 = vector.broadcast %cst_66 : f32 to vector<10x256xf32>
    %154 = arith.mulf %153, %152 : vector<10x256xf32>
    %155 = arith.mulf %142, %154 : vector<10x256xf32>
    %156 = arith.truncf %155 : vector<10x256xf32> to vector<10x256xbf16>
    %c0_67 = arith.constant 0 : index
    %c0_68 = arith.constant 0 : index
    %c0_69 = arith.constant 0 : index
    %157 = vector.load %arg12[%c0_67, %c0_68, %c0_69] : memref<1x256x128xbf16, #tpu.memory_space<vmem>>, vector<1x256x128xbf16>
    %158 = vector.shape_cast %157 : vector<1x256x128xbf16> to vector<256x128xbf16>
    %cst_70 = arith.constant dense<0.000000e+00> : vector<10x128xf32>
    %159 = tpu.matmul %156, %158, %cst_70 {dimension_numbers = #tpu.dot_dimension_numbers<[1], [0], [0], [1], [0, 0, 1, 1], [], []>} : vector<10x256xbf16>, vector<256x128xbf16>, vector<10x128xf32> -> vector<10x128xf32>
    %c0_71 = arith.constant 0 : index
    %c0_72 = arith.constant 0 : index
    %c0_73 = arith.constant 0 : index
    %160 = vector.load %arg13[%c0_71, %c0_72, %c0_73] : memref<1x1x128xf32, #tpu.memory_space<vmem>>, vector<1x1x128xf32>
    %161 = vector.shape_cast %160 : vector<1x1x128xf32> to vector<1x128xf32>
    %162 = vector.broadcast %161 : vector<1x128xf32> to vector<10x128xf32>
    %163 = arith.addf %159, %162 : vector<10x128xf32>
    %164 = arith.addf %163, %134 : vector<10x128xf32>
    %c0_74 = arith.constant 0 : index
    %c0_75 = arith.constant 0 : index
    %c0_76 = arith.constant 0 : index
    %165 = vector.load %arg14[%c0_74, %c0_75, %c0_76] : memref<1x1x128xf32, #tpu.memory_space<vmem>>, vector<1x1x128xf32>
    %166 = vector.shape_cast %165 : vector<1x1x128xf32> to vector<1x128xf32>
    %c0_77 = arith.constant 0 : index
    %c0_78 = arith.constant 0 : index
    %c0_79 = arith.constant 0 : index
    %167 = vector.load %arg15[%c0_77, %c0_78, %c0_79] : memref<1x1x128xf32, #tpu.memory_space<vmem>>, vector<1x1x128xf32>
    %168 = vector.shape_cast %167 : vector<1x1x128xf32> to vector<1x128xf32>
    %cst_80 = arith.constant dense<0.000000e+00> : vector<10xf32>
    %169 = vector.multi_reduction <add>, %164, %cst_80 [1] : vector<10x128xf32> to vector<10xf32>
    %170 = vector.shape_cast %169 : vector<10xf32> to vector<10x1xf32>
    %cst_81 = arith.constant 1.280000e+02 : f32
    %171 = vector.broadcast %cst_81 : f32 to vector<10x1xf32>
    %172 = arith.divf %170, %171 : vector<10x1xf32>
    %173 = vector.broadcast %172 : vector<10x1xf32> to vector<10x128xf32>
    %174 = arith.subf %164, %173 : vector<10x128xf32>
    %175 = arith.mulf %174, %174 : vector<10x128xf32>
    %cst_82 = arith.constant dense<0.000000e+00> : vector<10xf32>
    %176 = vector.multi_reduction <add>, %175, %cst_82 [1] : vector<10x128xf32> to vector<10xf32>
    %177 = vector.shape_cast %176 : vector<10xf32> to vector<10x1xf32>
    %cst_83 = arith.constant 1.280000e+02 : f32
    %178 = vector.broadcast %cst_83 : f32 to vector<10x1xf32>
    %179 = arith.divf %177, %178 : vector<10x1xf32>
    %180 = vector.broadcast %172 : vector<10x1xf32> to vector<10x128xf32>
    %181 = arith.subf %164, %180 : vector<10x128xf32>
    %cst_84 = arith.constant 9.99999996E-13 : f32
    %182 = vector.broadcast %cst_84 : f32 to vector<10x1xf32>
    %183 = arith.addf %179, %182 : vector<10x1xf32>
    %184 = math.rsqrt %183 : vector<10x1xf32>
    %185 = vector.broadcast %184 : vector<10x1xf32> to vector<10x128xf32>
    %186 = arith.mulf %181, %185 : vector<10x128xf32>
    %187 = vector.broadcast %166 : vector<1x128xf32> to vector<10x128xf32>
    %188 = arith.mulf %186, %187 : vector<10x128xf32>
    %189 = vector.broadcast %168 : vector<1x128xf32> to vector<10x128xf32>
    %190 = arith.addf %188, %189 : vector<10x128xf32>
    %c0_85 = arith.constant 0 : index
    %c0_86 = arith.constant 0 : index
    %191 = vector.load %arg17[%c0_85, %c0_86] : memref<10x128xf32, #tpu.memory_space<vmem>>, vector<10x128xf32>
    tpu.vector_store %arg17[%c0_85, %c0_86], %190 {strides = array<i32>} : memref<10x128xf32, #tpu.memory_space<vmem>>, vector<10x128xf32>,
    %c1_i32 = arith.constant 1 : i32
    %192 = arith.cmpi eq, %arg1, %c1_i32 : i32
    %193 = arith.extui %192 : i1 to i32
    %c0_i32_87 = arith.constant 0 : i32
    %194 = arith.cmpi ne, %193, %c0_i32_87 : i32
    scf.if %194 {
      %c0_88 = arith.constant 0 : index
      %c0_89 = arith.constant 0 : index
      %c0_90 = arith.constant 0 : index
      %195 = vector.load %arg16[%c0_88, %c0_89, %c0_90] : memref<1x10x128xf32, #tpu.memory_space<vmem>>, vector<1x10x128xf32>
      %196 = vector.shape_cast %195 : vector<1x10x128xf32> to vector<10x128xf32>
      %197 = vector.shape_cast %190 : vector<10x128xf32> to vector<1x10x128xf32>
      tpu.vector_store %arg16[%c0_88, %c0_89, %c0_90], %197 {strides = array<i32>} : memref<1x10x128xf32, #tpu.memory_space<vmem>>, vector<1x10x128xf32>,
    } else {
    }
    return
  }
  func.func @transform_0(%arg0: i32, %arg1: i32) -> (i32, i32, i32) {
    %c0_i32 = arith.constant 0 : i32
    %c0_i32_0 = arith.constant 0 : i32
    %c0_i32_1 = arith.constant 0 : i32
    return %arg0, %c0_i32, %c0_i32_0 : i32, i32, i32
  }
  func.func @transform_1(%arg0: i32, %arg1: i32) -> (i32, i32, i32) {
    %c0_i32 = arith.constant 0 : i32
    %c0_i32_0 = arith.constant 0 : i32
    %c0_i32_1 = arith.constant 0 : i32
    return %arg0, %c0_i32, %c0_i32_0 : i32, i32, i32
  }
  func.func @transform_2(%arg0: i32, %arg1: i32) -> (i32, i32, i32) {
    %c0_i32 = arith.constant 0 : i32
    %c0_i32_0 = arith.constant 0 : i32
    %c0_i32_1 = arith.constant 0 : i32
    return %arg1, %c0_i32, %c0_i32_0 : i32, i32, i32
  }
  func.func @transform_3(%arg0: i32, %arg1: i32) -> (i32, i32, i32) {
    %c0_i32 = arith.constant 0 : i32
    %c0_i32_0 = arith.constant 0 : i32
    %c0_i32_1 = arith.constant 0 : i32
    return %arg1, %c0_i32, %c0_i32_0 : i32, i32, i32
  }
  func.func @transform_4(%arg0: i32, %arg1: i32) -> (i32, i32, i32) {
    %c0_i32 = arith.constant 0 : i32
    %c0_i32_0 = arith.constant 0 : i32
    %c0_i32_1 = arith.constant 0 : i32
    return %arg1, %c0_i32, %c0_i32_0 : i32, i32, i32
  }
  func.func @transform_5(%arg0: i32, %arg1: i32) -> (i32, i32, i32) {
    %c0_i32 = arith.constant 0 : i32
    %c0_i32_0 = arith.constant 0 : i32
    %c0_i32_1 = arith.constant 0 : i32
    return %arg1, %c0_i32, %c0_i32_0 : i32, i32, i32
  }
  func.func @transform_6(%arg0: i32, %arg1: i32) -> (i32, i32, i32) {
    %c0_i32 = arith.constant 0 : i32
    %c0_i32_0 = arith.constant 0 : i32
    %c0_i32_1 = arith.constant 0 : i32
    return %arg1, %c0_i32, %c0_i32_0 : i32, i32, i32
  }
  func.func @transform_7(%arg0: i32, %arg1: i32) -> (i32, i32, i32) {
    %c0_i32 = arith.constant 0 : i32
    %c0_i32_0 = arith.constant 0 : i32
    %c0_i32_1 = arith.constant 0 : i32
    return %arg1, %c0_i32, %c0_i32_0 : i32, i32, i32
  }
  func.func @transform_8(%arg0: i32, %arg1: i32) -> (i32, i32, i32) {
    %c0_i32 = arith.constant 0 : i32
    %c0_i32_0 = arith.constant 0 : i32
    %c0_i32_1 = arith.constant 0 : i32
    return %arg1, %c0_i32, %c0_i32_0 : i32, i32, i32
  }
  func.func @transform_9(%arg0: i32, %arg1: i32) -> (i32, i32, i32) {
    %c0_i32 = arith.constant 0 : i32
    %c0_i32_0 = arith.constant 0 : i32
    %c0_i32_1 = arith.constant 0 : i32
    return %arg1, %c0_i32, %c0_i32_0 : i32, i32, i32
  }
  func.func @transform_10(%arg0: i32, %arg1: i32) -> (i32, i32, i32) {
    %c0_i32 = arith.constant 0 : i32
    %c0_i32_0 = arith.constant 0 : i32
    %c0_i32_1 = arith.constant 0 : i32
    return %arg1, %c0_i32, %c0_i32_0 : i32, i32, i32
  }
  func.func @transform_11(%arg0: i32, %arg1: i32) -> (i32, i32, i32) {
    %c0_i32 = arith.constant 0 : i32
    %c0_i32_0 = arith.constant 0 : i32
    %c0_i32_1 = arith.constant 0 : i32
    return %arg1, %c0_i32, %c0_i32_0 : i32, i32, i32
  }
  func.func @transform_12(%arg0: i32, %arg1: i32) -> (i32, i32, i32) {
    %c0_i32 = arith.constant 0 : i32
    %c0_i32_0 = arith.constant 0 : i32
    %c0_i32_1 = arith.constant 0 : i32
    return %arg1, %c0_i32, %c0_i32_0 : i32, i32, i32
  }
  func.func @transform_13(%arg0: i32, %arg1: i32) -> (i32, i32, i32) {
    %c0_i32 = arith.constant 0 : i32
    %c0_i32_0 = arith.constant 0 : i32
    %c0_i32_1 = arith.constant 0 : i32
    return %arg1, %c0_i32, %c0_i32_0 : i32, i32, i32
  }
  func.func @transform_14(%arg0: i32, %arg1: i32) -> (i32, i32, i32) {
    %c0_i32 = arith.constant 0 : i32
    %c0_i32_0 = arith.constant 0 : i32
    %c0_i32_1 = arith.constant 0 : i32
    return %arg0, %c0_i32, %c0_i32_0 : i32, i32, i32
  }
}

</mosaic_0001>

<bundles_post_ra>
// kernel: ms_forward.5
= control target key start
LH: loop header
LB: loop body
LE: loop exit
PB: predicated region body
PF: predicated region fallthrough
CT: control target
= control target key end

     0   :  { %s368_s0 = inlined_call_operand.hbm [shape: f32[2,10,128], index: 0, kind: input, shape index: {}]   ;;  %s369_s1 = inlined_call_operand.hbm [shape: f32[2,10], index: 1, kind: input, shape index: {}]   ;;  %s370_s2 = inlined_call_operand.hbm [shape: f32[2,128], index: 2, kind: input, shape index: {}]   ;;  %s371_s3 = inlined_call_operand.<no memory space> [shape: f32[1,1], index: 3, kind: input, shape index: {}]   ;;  %s372_s4 = inlined_call_operand.hbm [shape: f32[2,1], index: 4, kind: output, shape index: {}]  }
   0x1   :  { %v9_v0 = vstv %s371_s3 }
   0x2   :  { %10 = vst [vmem:[#allocation2] sm:$0x1] %v9_v0 }
   0x3   :  { %11 = vsyncpa [#allocation4], 0 }
   0x4   :  { %12 = vsyncpa [#allocation7], 0 }
   0x5   :  { %13 = vsyncpa [#allocation5], 0  ;;  %s276_s17 = smov [#allocation6]   ;;  %s277_s19 = smov [#allocation3]  }
   0x6   :  { %s32_s18 = sshll.u32 %s276_s17, 4  ;;  %s19_s20 = sshll.u32 %s277_s19, 4  ;;  %s33_s18 = int_to_ptr.vmem [resolvable:$true] %s32_s18  ;;  %s310_s20 = int_to_ptr.vmem [resolvable:$true] %s19_s20 }
   0x7   :  { %s182_s23 = scalar_lea.hbm %s369_s1, 32 }
   0x8   :  { %p183_p0 = scmp.ne.s32.totalorder %s369_s1, %s182_s23  ;;  %p186_p1 = scmp.lt.u32.totalorder %s182_s23, %s369_s1 }
   0xa   :  { %p188_p2 = pnand %p186_p1, %p183_p0 }
   0xc   :  { %191 = shalt.err (!%p188_p2)
}
   0xd   :  { %s192_s27 = scalar_lea.vmem %s33_s18, 32  ;;  %p197_p4 = scmp.lt.s32.totalorder %s33_s18, %s33_s18 }
   0xe   :  { %p193_p3 = scmp.ne.s32.totalorder %s33_s18, %s192_s27  ;;  %p198_p5 = scmp.lt.s32.totalorder %s192_s27, %s192_s27 }
  0x10   :  { %p199_p6 = por %p198_p5, %p197_p4 }
  0x12   :  { %p200_p7 = pnand %p199_p6, %p193_p3 }
  0x14   :  { %203 = shalt.err (!%p200_p7)
}
  0x15   :  { %35 = dma.hbm_to_vmem [thread:$0]  %s369_s1, 32, %s33_s18, [#allocation7]  }
  0x16   :  { %s204_s6 = scalar_lea.hbm %s368_s0, 512 }
  0x17   :  { %p205_p8 = scmp.ne.s32.totalorder %s368_s0, %s204_s6  ;;  %p208_p9 = scmp.lt.u32.totalorder %s204_s6, %s368_s0 }
  0x19   :  { %p210_p10 = pnand %p208_p9, %p205_p8 }
  0x1b   :  { %213 = shalt.err (!%p210_p10)
}
  0x1c   :  { %s214_s11 = scalar_lea.vmem %s310_s20, 512  ;;  %p219_p12 = scmp.lt.s32.totalorder %s310_s20, %s310_s20 }
  0x1d   :  { %p215_p11 = scmp.ne.s32.totalorder %s310_s20, %s214_s11  ;;  %p220_p13 = scmp.lt.s32.totalorder %s214_s11, %s214_s11 }
  0x1f   :  { %p221_p0 = por %p220_p13, %p219_p12 }
  0x21   :  { %p222_p1 = pnand %p221_p0, %p215_p11 }
  0x23   :  { %225 = shalt.err (!%p222_p1)
}
  0x24   :  { %s278_s1 = smov 128   ;;  %s279_s12 = smov 8  }
  0x25   :  { %25 = dma.hbm_to_vmem [thread:$0]  %s368_s0, 512, %s310_s20, [#allocation4], %s278_s1, %s278_s1, %s279_s12  }
  0x26   :  { %s280_s15 = smov [#allocation8]   ;;  %s226_s19 = scalar_lea.hbm %s370_s2, 32 }
  0x27   :  { %s42_s16 = sshll.u32 %s280_s15, 4  ;;  %p227_p2 = scmp.ne.s32.totalorder %s370_s2, %s226_s19  ;;  %s43_s16 = int_to_ptr.vmem [resolvable:$true] %s42_s16 }
  0x28   :  { %p230_p3 = scmp.lt.u32.totalorder %s226_s19, %s370_s2 }
  0x2a   :  { %p232_p4 = pnand %p230_p3, %p227_p2 }
  0x2c   :  { %235 = shalt.err (!%p232_p4)
}
  0x2d   :  { %s236_s25 = scalar_lea.vmem %s43_s16, 32  ;;  %p241_p6 = scmp.lt.s32.totalorder %s43_s16, %s43_s16 }
  0x2e   :  { %p237_p5 = scmp.ne.s32.totalorder %s43_s16, %s236_s25  ;;  %p242_p7 = scmp.lt.s32.totalorder %s236_s25, %s236_s25 }
  0x30   :  { %p243_p8 = por %p242_p7, %p241_p6 }
  0x32   :  { %p244_p9 = pnand %p243_p8, %p237_p5 }
  0x34   :  { %247 = shalt.err (!%p244_p9)
}
  0x35   :  { %45 = dma.hbm_to_vmem [thread:$0]  %s370_s2, 32, %s43_s16, [#allocation7]  }
  0x36   :  { %270 = dma.done.wait [#allocation4], 512  }
  0x37   :  { %271 = vsyncadd [#allocation4], 4294966784 }
  0x38   :  { %272 = dma.done.wait [#allocation7], 64  }
  0x39   :  { %273 = vsyncadd [#allocation7], 4294967232  ;;  %v62_v1 = vlaneseq  ;;  %vm88_vm0 = vcmask 74752   ;;  %v61_v5 = vld [vmem:[#allocation6] sm:$0x3]  ;;  %vm92_vm1 = vcmask 1041408  }
  0x3a   :  { %v89_v6 = vsel %vm88_vm0, %v61_v5, 0.0  ;;  %v58_v11 = vld [vmem:[#allocation3 + $0x8] sm:$0x3]  ;;  %v57_v14 = vld [vmem:[#allocation3] sm:$0xff]  ;;  %v60_v21 = vld [vmem:[#allocation3 + $0x18] sm:$0x3] }
  0x3b   :  { %v63_v2 = vshrl.u32 %v62_v1, 7  ;;  %90 = vadd.xlane.f32.xlu0 %v89_v6  ;;  %v59_v22 = vld [vmem:[#allocation3 + $0x10] sm:$0xff]  ;;  %v169_v43 = vld [vmem:[#allocation8] ss:$0 sm:$0xff]  ;;  %v170_v44 = vld [vmem:[#allocation8 + $0x1] ss:$0 sm:$0xff] }
  0x3c   :  { %v124_v45 = vmul.f32 %v169_v43, %v59_v22  ;;  %v123_v47 = vmul.f32 %v169_v43, %v57_v14  ;;  %vm137_vm2 = vcmask 1041409   ;;  %v171_v55 = vld [vmem:[#allocation2] ss:$0 sm:$0xff]  ;;  %s281_s2 = smov [#allocation9]   ;;  %vm151_vm3 = vcmask 1024  }
  0x3d   :  { %v75_v3 = vsub.s32 1, %v63_v2  ;;  %v64_v4 = vsub.s32 0, %v63_v2  ;;  %s159_s3 = sshll.u32 %s281_s2, 4  ;;  %s160_s3 = int_to_ptr.vmem [resolvable:$true] %s159_s3 }
  0x3e   :  { %s248_s26 = scalar_lea.vmem %s160_s3, 32  ;;  %p253_p11 = scmp.lt.s32.totalorder %s160_s3, %s160_s3 }
  0x3f   :  { %v76_v7 = vrot.slane %v61_v5, %v75_v3  ;;  %v65_v8 = vrot.slane %v61_v5, %v64_v4  ;;  %p249_p10 = scmp.ne.s32.totalorder %s160_s3, %s248_s26  ;;  %p254_p12 = scmp.lt.s32.totalorder %s248_s26, %s248_s26 }
  0x41   :  { %78 = vbcast.lane.b32.xlu1 %v76_v7, 256  ;;  %p255_p13 = por %p254_p12, %p253_p11 }
  0x43   :  { %p256_p0 = pnand %p255_p13, %p249_p10 }
  0x45   :  { %71 = vbcast.lane.b32.xlu1 %v65_v8, 264 }
  0x49   :  { %67 = vbcast.lane.b32.xlu1 %v65_v8, 256 }
  0x51   :  { %82 = vbcast.lane.b32.xlu0 %v76_v7, 264 }
  0xb3   :  { %v79_v9 = vpop.permute.xlu1 %78 }
  0xb4   :  { %v86_v27 = vmul.f32 %v79_v9, %v59_v22 }
  0xb7   :  { %v72_v10 = vpop.permute.xlu1 %71 }
  0xb8   :  { %v85_v12 = vmul.f32 %v72_v10, %v58_v11 }
  0xba   :  { %v93_v16 = vsel %vm92_vm1, %v85_v12, 0.0 }
  0xbb   :  { %v68_v13 = vpop.permute.xlu1 %67 }
  0xbc   :  { %v84_v15 = vmul.f32 %v68_v13, %v57_v14 }
  0xbe   :  { %v94_v17 = vadd.f32 %v93_v16, %v84_v15 }
  0xc0   :  { %v95_v18 = vrot.slane %v94_v17, 4 }
  0xc2   :  { %v96_v19 = vadd.f32 %v95_v18, %v94_v17 }
  0xc4   :  { %v97_v24 = vrot.slane %v96_v19, 2 }
  0xc6   :  { %v98_v30 = vadd.f32 %v97_v24, %v96_v19 }
  0xc8   :  { %v91_v20 = vpop.xlane.xlu0 %90  ;;  %v99_v33 = vrot.slane %v98_v30, 1 }
  0xc9   :  { %v109_v23 = vadd.f32 1e-05, %v91_v20 }
  0xca   :  { %v100_v36 = vadd.f32 %v99_v33, %v98_v30 }
  0xcb   :  { %v111_v28 = vrot.slane %v109_v23, 1  ;;  %178 = vrcp.f32 %v109_v23 }
  0xcc   :  { %v83_v25 = vpop.permute.xlu0 %82 }
  0xcd   :  { %v87_v26 = vmul.f32 %v83_v25, %v60_v21  ;;  %180 = vrcp.f32 %v111_v28 }
  0xcf   :  { %v101_v29 = vsel %vm92_vm1, %v87_v26, 0.0 }
  0xd0   :  { %v102_v31 = vadd.f32 %v101_v29, %v86_v27 }
  0xd2   :  { %v103_v32 = vrot.slane %v102_v31, 4 }
  0xd4   :  { %v104_v34 = vadd.f32 %v103_v32, %v102_v31 }
  0xd5   :  { %v179_v38 = vpop.eup %178 }
  0xd6   :  { %v105_v35 = vrot.slane %v104_v34, 2  ;;  %v115_v41 = vmul.f32 %v179_v38, %v100_v36 }
  0xd7   :  { %v181_v42 = vpop.eup %180 }
  0xd8   :  { %v106_v37 = vadd.f32 %v105_v35, %v104_v34  ;;  %v130_v48 = vmul.f32 %v170_v44, %v115_v41 }
  0xda   :  { %v107_v39 = vrot.slane %v106_v37, 1  ;;  %v132_v51 = vadd.f32 %v130_v48, %v123_v47 }
  0xdc   :  { %v108_v40 = vadd.f32 %v107_v39, %v106_v37 }
  0xde   :  { %v117_v46 = vmul.f32 %v181_v42, %v108_v40 }
  0xe0   :  { %v131_v49 = vmul.f32 %v170_v44, %v117_v46 }
  0xe2   :  { %v133_v50 = vadd.f32 %v131_v49, %v124_v45 }
  0xe4   :  { %v136_v52 = vrot.slane %v133_v50, 7 }
  0xe6   :  { %v138_v53 = vsel %vm137_vm2, %v136_v52, %v132_v51 }
  0xe7   :  { %v140_v54 = vsel %vm92_vm1, %v138_v53, 0.0 }
  0xe8   :  { %141 = vadd.xlane.f32.xlu1 %v140_v54 }
 0x175   :  { %v142_v56 = vpop.xlane.xlu1 %141 }
 0x176   :  { %v150_v57 = vadd.f32 %v171_v55, %v142_v56 }
 0x178   :  { %152 = vst.msk [vmem:[#allocation9] sm:$0x3] %vm151_vm3, %v150_v57 }
 0x179   :  { %259 = shalt.err (!%p256_p0)
}
 0x17a   :  { %s260_s29 = scalar_lea.hbm %s372_s4, 32 }
 0x17b   :  { %p261_p1 = scmp.ne.s32.totalorder %s372_s4, %s260_s29  ;;  %p264_p2 = scmp.lt.u32.totalorder %s260_s29, %s372_s4 }
 0x17d   :  { %p266_p3 = pnand %p264_p2, %p261_p1 }
 0x17f   :  { %269 = shalt.err (!%p266_p3)
}
 0x180   :  { %162 = dma.vmem_to_hbm [thread:$0]  %s160_s3, 32, %s372_s4, [#allocation5]  }
 0x181   :  { %274 = dma.done.wait [#allocation5], 32  }
 0x182   :  { %275 = vsyncadd [#allocation5], 4294967264 }
 0x183   :  { %166 = vsyncpa [#allocation4], 1 }
 0x184   :  { %167 = vsyncpa [#allocation7], 1 }
 0x185   :  { %168 = vsyncpa [#allocation5], 1 }

// kernel: ms_forward.3
= control target key start
LH: loop header
LB: loop body
LE: loop exit
PB: predicated region body
PF: predicated region fallthrough
CT: control target
= control target key end

     0   :  { %s1737_s0 = inlined_call_operand.hbm [shape: f32[2,8,32], index: 0, kind: input, shape index: {}]   ;;  %s1738_s1 = inlined_call_operand.hbm [shape: bf16[32,128], index: 1, kind: input, shape index: {}]   ;;  %s1739_s2 = inlined_call_operand.hbm [shape: f32[1,128], index: 2, kind: input, shape index: {}]   ;;  %s1740_s3 = inlined_call_operand.hbm [shape: f32[1,128], index: 3, kind: input, shape index: {}]   ;;  %s1741_s4 = inlined_call_operand.hbm [shape: f32[1,128], index: 4, kind: input, shape index: {}]   ;;  %s1742_s5 = inlined_call_operand.hbm [shape: f32[2,128], index: 5, kind: input, shape index: {}]   ;;  %s1743_s6 = inlined_call_operand.hbm [shape: f32[10,128], index: 6, kind: input, shape index: {}]   ;;  %s1744_s7 = inlined_call_operand.hbm [shape: f32[1,128], index: 7, kind: input, shape index: {}]   ;;  %s1745_s8 = inlined_call_operand.hbm [shape: f32[1,128], index: 8, kind: input, shape index: {}]   ;;  %s1746_s9 = inlined_call_operand.hbm [shape: f32[2,10,128], index: 9, kind: output, shape index: {}]  }
   0x1   :  { %1751 = sst [smem:[#allocation24_spill]] %s1738_s1 }
   0x2   :  { %1752 = sst [smem:[#allocation25_spill]] %s1746_s9 }
   0x3   :  { %14 = vsyncpa [#allocation3], 0 }
   0x4   :  { %16 = vsyncpa [#allocation3 + $0x1], 0 }
   0x5   :  { %17 = vsyncpa [#allocation6], 0 }
   0x6   :  { %18 = vsyncpa [#allocation9], 0 }
   0x7   :  { %19 = vsyncpa [#allocation12], 0 }
   0x8   :  { %20 = vsyncpa [#allocation15], 0 }
   0x9   :  { %21 = vsyncpa [#allocation4], 0 }
   0xa   :  { %23 = vsyncpa [#allocation4 + $0x1], 0  ;;  %s1371_s30 = smov 0   ;;  %s1373_s10 = smov 0  }
   0xb   :  { %s1375_s11 = smov 0   ;;  %s1377_s12 = smov 0  }
   0xc LB: > { %s1303_s13 = smov [#allocation5]   ;;  %s1392_s15 = sadd.s32 4294967295, %s1301_s12   ;;  %s1301_s12 = sphi %s1377_s12, %s1779_s12   ;;  %s1297_s11 = sphi %s1375_s11, %s1778_s11   ;;  %s1293_s10 = sphi %s1373_s10, %s1777_s10   ;;  %s1289_s30 = sphi %s1371_s30, %s1776_s30  }
   0xd   : > { %s266_s14 = sshll.u32 %s1303_s13, 4  ;;  %p774_p0 = scmp.ge.s32.totalorder %s1301_s12, 1  ;;  %s1397_s14 = int_to_ptr.vmem [resolvable:$true] %s266_s14 }
   0xe   : > { %p1748_p1 = scmp.eq.s32.totalorder %s1392_s15, 0  ;;  %p254_p2 = scmp.lt.s32.totalorder %s1301_s12, 3 }
   0xf   : > { %s1304_s17 = smov [#allocation8]   ;;  %s1305_s20 = smov [#allocation11]  }
  0x10   : > { %p1399_p3 = pnand %p774_p0, %p254_p2  ;;  %s291_s18 = sshll.u32 %s1304_s17, 4  ;;  %s1412_s18 = int_to_ptr.vmem [resolvable:$true] %s291_s18 }
  0x11   : > { %s313_s21 = sshll.u32 %s1305_s20, 4  ;;  %s1755_s1 = sld [smem:[#allocation24_spill]]  ;;  %s1414_s21 = int_to_ptr.vmem [resolvable:$true] %s313_s21 }
  0x12   : > { %s1753_s16 = scalar_select %p1399_p3, 1, 0 }
  0x13   : > { %p858_p5 = pneg %p1399_p3 }
  0x15   : > { %p1408_p6 = pnand %p858_p5, %p1748_p1 }
  0x17   : > { %s965_s24 = scalar_lea.hbm %s1755_s1, 256  ;;  %p1424_p8 = pneg %p1408_p6 }
  0x18   : > { %p966_p7 = scmp.ne.s32.totalorder %s1755_s1, %s965_s24  ;;  %p972_p11 = scmp.lt.u32.totalorder %s965_s24, %s1755_s1 }
  0x1a   : > { %p968_p9 = pnand %p1424_p8, %p966_p7 }
  0x1c   : > { %p969_p10 = pneg %p968_p9 }
  0x1e   : > { %p974_p12 = pnand %p972_p11, %p969_p10 }
  0x20   : > { %977 = shalt.err (!%p974_p12)
}
  0x21   : > { %s978_s13 = scalar_lea.vmem %s1397_s14, 256  ;;  %p986_p5 = scmp.lt.s32.totalorder %s1397_s14, %s1397_s14 }
  0x22   : > { %p979_p13 = scmp.ne.s32.totalorder %s1397_s14, %s978_s13  ;;  %p987_p4 = scmp.lt.s32.totalorder %s978_s13, %s978_s13 }
  0x24   : > { %p981_p0 = pnand %p979_p13, %p1424_p8  ;;  %p988_p7 = por %p987_p4, %p986_p5 }
  0x26   : > { %p982_p2 = pneg %p981_p0 }
  0x28   : > { %p989_p9 = pnand %p988_p7, %p982_p2 }
  0x2a   : > { %992 = shalt.err (!%p989_p9)
}
  0x2b   : > { %s1306_s17 = smov 64   ;;  %s1307_s20 = smov 4  }
  0x2c   : > { %861 = dma.hbm_to_vmem [thread:$0]  (!%p1408_p6), %s1755_s1, 256, %s1397_s14, [#allocation6], %s1306_s17, %s1306_s17, %s1307_s20  }
  0x2d   : > { %s993_s26 = scalar_lea.hbm %s1740_s3, 16 }
  0x2e   : > { %p994_p4 = scmp.ne.s32.totalorder %s1740_s3, %s993_s26  ;;  %p1000_p12 = scmp.lt.u32.totalorder %s993_s26, %s1740_s3 }
  0x30   : > { %p996_p10 = pnand %p994_p4, %p1424_p8 }
  0x32   : > { %p997_p11 = pneg %p996_p10 }
  0x34   : > { %p1002_p13 = pnand %p1000_p12, %p997_p11 }
  0x36   : > { %1005 = shalt.err (!%p1002_p13)
}
  0x37   : > { %s1006_s14 = scalar_lea.vmem %s1412_s18, 16  ;;  %s1013_s17 = scalar_lea.vmem %s1412_s18, 32 }
  0x38   : > { %p1007_p0 = scmp.ne.s32.totalorder %s1412_s18, %s1006_s14  ;;  %p1014_p7 = scmp.lt.s32.totalorder %s1412_s18, %s1412_s18 }
  0x39   : > { %p1015_p9 = scmp.lt.s32.totalorder %s1013_s17, %s1006_s14 }
  0x3a   : > { %p1009_p2 = pnand %p1007_p0, %p1424_p8 }
  0x3b   : > { %p1016_p4 = por %p1015_p9, %p1014_p7 }
  0x3c   : > { %p1010_p5 = pneg %p1009_p2 }
  0x3e   : > { %p1017_p10 = pnand %p1016_p4, %p1010_p5 }
  0x40   : > { %1020 = shalt.err (!%p1017_p10)
}
  0x41   : > { %867 = dma.hbm_to_vmem [thread:$0]  (!%p1408_p6), %s1740_s3, 16, %s1412_s18, [#allocation9]  }
  0x42   : > { %s1021_s24 = scalar_lea.hbm %s1742_s5, 32 }
  0x43   : > { %p1022_p11 = scmp.ne.s32.totalorder %s1742_s5, %s1021_s24  ;;  %p1028_p0 = scmp.lt.u32.totalorder %s1021_s24, %s1742_s5 }
  0x45   : > { %p1024_p12 = pnand %p1022_p11, %p1424_p8 }
  0x47   : > { %p1025_p13 = pneg %p1024_p12 }
  0x49   : > { %p1030_p2 = pnand %p1028_p0, %p1025_p13 }
  0x4b   : > { %1033 = shalt.err (!%p1030_p2)
}
  0x4c   : > { %s1034_s18 = scalar_lea.vmem %s1414_s21, 32  ;;  %p1042_p4 = scmp.lt.s32.totalorder %s1414_s21, %s1414_s21 }
  0x4d   : > { %p1035_p5 = scmp.ne.s32.totalorder %s1414_s21, %s1034_s18  ;;  %p1043_p10 = scmp.lt.s32.totalorder %s1034_s18, %s1034_s18 }
  0x4f   : > { %p1037_p7 = pnand %p1035_p5, %p1424_p8  ;;  %p1044_p11 = por %p1043_p10, %p1042_p4 }
  0x51   : > { %p1038_p9 = pneg %p1037_p7 }
  0x53   : > { %p1045_p12 = pnand %p1044_p11, %p1038_p9 }
  0x55   : > { %1048 = shalt.err (!%p1045_p12)
}
  0x56   : > { %873 = dma.hbm_to_vmem [thread:$0]  (!%p1408_p6), %s1742_s5, 32, %s1414_s21, [#allocation12]  }
  0x57   : > { %s1308_s17 = smov [#allocation14]   ;;  %s1309_s20 = smov [#allocation7]  }
  0x58   : > { %s337_s9 = sshll.u32 %s1308_s17, 4  ;;  %s280_s22 = sshll.u32 %s1309_s20, 4  ;;  %s338_s9 = int_to_ptr.vmem [resolvable:$true] %s337_s9  ;;  %s281_s22 = int_to_ptr.vmem [resolvable:$true] %s280_s22 }
  0x59   : > { %s1049_s25 = scalar_lea.hbm %s1744_s7, 16 }
  0x5a   : > { %p1050_p13 = scmp.ne.s32.totalorder %s1744_s7, %s1049_s25  ;;  %p1056_p5 = scmp.lt.u32.totalorder %s1049_s25, %s1744_s7 }
  0x5c   : > { %p1052_p0 = pnand %p1050_p13, %p1424_p8 }
  0x5e   : > { %p1053_p2 = pneg %p1052_p0 }
  0x60   : > { %p1058_p7 = pnand %p1056_p5, %p1053_p2 }
  0x62   : > { %1061 = shalt.err (!%p1058_p7)
}
  0x63   : > { %s1062_s21 = scalar_lea.vmem %s338_s9, 16  ;;  %s1069_s13 = scalar_lea.vmem %s338_s9, 32 }
  0x64   : > { %p1063_p9 = scmp.ne.s32.totalorder %s338_s9, %s1062_s21  ;;  %p1070_p11 = scmp.lt.s32.totalorder %s338_s9, %s338_s9 }
  0x65   : > { %p1071_p12 = scmp.lt.s32.totalorder %s1069_s13, %s1062_s21 }
  0x66   : > { %p1065_p4 = pnand %p1063_p9, %p1424_p8 }
  0x67   : > { %p1072_p1 = por %p1071_p12, %p1070_p11 }
  0x68   : > { %p1066_p10 = pneg %p1065_p4 }
  0x6a   : > { %p1073_p3 = pnand %p1072_p1, %p1066_p10 }
  0x6c   : > { %1076 = shalt.err (!%p1073_p3)
}
  0x6d   : > { %879 = dma.hbm_to_vmem [thread:$0]  (!%p1408_p6), %s1744_s7, 16, %s338_s9, [#allocation15]  }
  0x6e   : > { %s1077_s24 = scalar_lea.hbm %s1739_s2, 16 }
  0x6f   : > { %p1078_p13 = scmp.ne.s32.totalorder %s1739_s2, %s1077_s24  ;;  %p1084_p3 = scmp.lt.u32.totalorder %s1077_s24, %s1739_s2 }
  0x71   : > { %p1080_p0 = pnand %p1078_p13, %p1424_p8 }
  0x73   : > { %p1081_p1 = pneg %p1080_p0 }
  0x75   : > { %p1086_p2 = pnand %p1084_p3, %p1081_p1 }
  0x77   : > { %1089 = shalt.err (!%p1086_p2)
}
  0x78   : > { %s1090_s18 = scalar_lea.vmem %s281_s22, 16  ;;  %s1097_s9 = scalar_lea.vmem %s281_s22, 32 }
  0x79   : > { %p1091_p5 = scmp.ne.s32.totalorder %s281_s22, %s1090_s18  ;;  %p1098_p4 = scmp.lt.s32.totalorder %s281_s22, %s281_s22 }
  0x7a   : > { %p1099_p10 = scmp.lt.s32.totalorder %s1097_s9, %s1090_s18 }
  0x7b   : > { %p1093_p7 = pnand %p1091_p5, %p1424_p8 }
  0x7c   : > { %p1100_p11 = por %p1099_p10, %p1098_p4 }
  0x7d   : > { %p1094_p9 = pneg %p1093_p7 }
  0x7f   : > { %p1101_p12 = pnand %p1100_p11, %p1094_p9 }
  0x81   : > { %1104 = shalt.err (!%p1101_p12)
}
  0x82   : > { %864 = dma.hbm_to_vmem [thread:$0]  (!%p1408_p6), %s1739_s2, 16, %s281_s22, [#allocation6]  }
  0x83   : > { %s1310_s14 = smov [#allocation10]   ;;  %s1311_s20 = smov [#allocation13]  }
  0x84   : > { %s302_s17 = sshll.u32 %s1310_s14, 4  ;;  %s323_s23 = sshll.u32 %s1311_s20, 4  ;;  %s303_s17 = int_to_ptr.vmem [resolvable:$true] %s302_s17  ;;  %s324_s23 = int_to_ptr.vmem [resolvable:$true] %s323_s23 }
  0x85   : > { %s1105_s26 = scalar_lea.hbm %s1741_s4, 16 }
  0x86   : > { %p1106_p13 = scmp.ne.s32.totalorder %s1741_s4, %s1105_s26  ;;  %p1112_p3 = scmp.lt.u32.totalorder %s1105_s26, %s1741_s4 }
  0x88   : > { %p1108_p0 = pnand %p1106_p13, %p1424_p8 }
  0x8a   : > { %p1109_p1 = pneg %p1108_p0 }
  0x8c   : > { %p1114_p2 = pnand %p1112_p3, %p1109_p1 }
  0x8e   : > { %1117 = shalt.err (!%p1114_p2)
}
  0x8f   : > { %s1118_s22 = scalar_lea.vmem %s303_s17, 16  ;;  %s1125_s21 = scalar_lea.vmem %s303_s17, 32 }
  0x90   : > { %p1119_p5 = scmp.ne.s32.totalorder %s303_s17, %s1118_s22  ;;  %p1126_p4 = scmp.lt.s32.totalorder %s303_s17, %s303_s17 }
  0x91   : > { %p1127_p10 = scmp.lt.s32.totalorder %s1125_s21, %s1118_s22 }
  0x92   : > { %p1121_p7 = pnand %p1119_p5, %p1424_p8 }
  0x93   : > { %p1128_p11 = por %p1127_p10, %p1126_p4 }
  0x94   : > { %p1122_p9 = pneg %p1121_p7 }
  0x96   : > { %p1129_p12 = pnand %p1128_p11, %p1122_p9 }
  0x98   : > { %1132 = shalt.err (!%p1129_p12)
}
  0x99   : > { %870 = dma.hbm_to_vmem [thread:$0]  (!%p1408_p6), %s1741_s4, 16, %s303_s17, [#allocation9]  }
  0x9a   : > { %s1133_s25 = scalar_lea.hbm %s1743_s6, 256 }
  0x9b   : > { %p1134_p13 = scmp.ne.s32.totalorder %s1743_s6, %s1133_s25  ;;  %p1140_p3 = scmp.lt.u32.totalorder %s1133_s25, %s1743_s6 }
  0x9d   : > { %p1136_p0 = pnand %p1134_p13, %p1424_p8 }
  0x9f   : > { %p1137_p1 = pneg %p1136_p0 }
  0xa1   : > { %p1142_p2 = pnand %p1140_p3, %p1137_p1 }
  0xa3   : > { %1145 = shalt.err (!%p1142_p2)
}
  0xa4   : > { %s1146_s9 = scalar_lea.vmem %s324_s23, 256  ;;  %p1154_p4 = scmp.lt.s32.totalorder %s324_s23, %s324_s23 }
  0xa5   : > { %p1147_p5 = scmp.ne.s32.totalorder %s324_s23, %s1146_s9  ;;  %p1155_p10 = scmp.lt.s32.totalorder %s1146_s9, %s1146_s9 }
  0xa7   : > { %p1149_p7 = pnand %p1147_p5, %p1424_p8  ;;  %p1156_p11 = por %p1155_p10, %p1154_p4 }
  0xa9   : > { %p1150_p9 = pneg %p1149_p7 }
  0xab   : > { %p1157_p12 = pnand %p1156_p11, %p1150_p9 }
  0xad   : > { %1160 = shalt.err (!%p1157_p12)
}
  0xae   : > { %s1312_s17 = smov 128   ;;  %s1313_s22 = smov 8  }
  0xaf   : > { %876 = dma.hbm_to_vmem [thread:$0]  (!%p1408_p6), %s1743_s6, 256, %s324_s23, [#allocation12], %s1312_s17, %s1312_s17, %s1313_s22  }
  0xb0   : > { %s1314_s14 = smov [#allocation16]   ;;  %s1161_s26 = scalar_lea.hbm %s1745_s8, 16 }
  0xb1   : > { %s348_s20 = sshll.u32 %s1314_s14, 4  ;;  %p1162_p13 = scmp.ne.s32.totalorder %s1745_s8, %s1161_s26  ;;  %s349_s20 = int_to_ptr.vmem [resolvable:$true] %s348_s20 }
  0xb2   : > { %p1168_p3 = scmp.lt.u32.totalorder %s1161_s26, %s1745_s8 }
  0xb3   : > { %p1164_p0 = pnand %p1162_p13, %p1424_p8 }
  0xb5   : > { %p1165_p1 = pneg %p1164_p0 }
  0xb7   : > { %p1170_p2 = pnand %p1168_p3, %p1165_p1 }
  0xb9   : > { %1173 = shalt.err (!%p1170_p2)
}
  0xba   : > { %s1174_s23 = scalar_lea.vmem %s349_s20, 16  ;;  %s1181_s17 = scalar_lea.vmem %s349_s20, 32 }
  0xbb   : > { %p1175_p5 = scmp.ne.s32.totalorder %s349_s20, %s1174_s23  ;;  %p1182_p4 = scmp.lt.s32.totalorder %s349_s20, %s349_s20 }
  0xbc   : > { %p1183_p10 = scmp.lt.s32.totalorder %s1181_s17, %s1174_s23 }
  0xbd   : > { %p1177_p7 = pnand %p1175_p5, %p1424_p8 }
  0xbe   : > { %p1184_p11 = por %p1183_p10, %p1182_p4 }
  0xbf   : > { %p1178_p9 = pneg %p1177_p7 }
  0xc1   : > { %p1185_p12 = pnand %p1184_p11, %p1178_p9 }
  0xc3   : > { %1188 = shalt.err (!%p1185_p12)
}
  0xc4   : > { %882 = dma.hbm_to_vmem [thread:$0]  (!%p1408_p6), %s1745_s8, 16, %s349_s20, [#allocation15]  }
  0xc5   : > { %s773_s27 = sadd.s32 4294967294, %s1301_s12   ;;  %s1584_s19 = sadd.s32 1, %s1301_s12  }
  0xc6   : > { %s33_s13 = ssub.s32 %s1301_s12, %s1584_s19  ;;  %s36_s14 = sadd.s32 1, %s1297_s11 }
  0xc7   : > { %p34_p8 = scmp.eq.s32.totalorder %s33_s13, 0  ;;  %p43_p13 = scmp.ne.s32.totalorder %s1297_s11, %s1293_s10 }
  0xc8   : > { %p44_p0 = scmp.eq.s32.totalorder %s1301_s12, 0  ;;  %p49_p1 = scmp.ne.s32.totalorder %s1293_s10, %s1289_s30 }
  0xc9   : > { %s1595_s24 = scalar_select %p34_p8, %s1297_s11, %s36_s14  }
  0xca   : > { %p1597_p3 = por %p44_p0, %p43_p13  ;;  %p1758_p2 = scmp.eq.s32.totalorder %s1392_s15, 0 }
  0xcb   : > { %p241_p5 = scmp.eq.s32.totalorder %s1392_s15, 1  ;;  %p247_p7 = scmp.eq.s32.totalorder %s773_s27, 1 }
  0xcc   : > { %p1603_p6 = por %p1758_p2, %p49_p1  ;;  %p899_p9 = scmp.lt.s32.totalorder %s1301_s12, 2 }
  0xcd   : > { %s359_s26 = sand.u32 1, %s1297_s11   ;;  %p1610_p4 = por %p241_p5, %p43_p13 }
  0xce   : > { %p1614_p10 = por %p247_p7, %p49_p1  ;;  %s784_s18 = sshll.u32 %s359_s26, 3 }
  0xcf   : > { %s1760_s28 = scalar_select %p1610_p4, 1, 0 }
  0xd0   : > { %s1761_s29 = scalar_select %p1614_p10, 1, 0 }
  0xd1   : > { %s785_s9 = sshll.u32 %s1301_s12, 7  ;;  %s363_s21 = scalar_lea.vmem [#allocation2], %s784_s18 }
  0xd2   : > { %s1622_s22 = scalar_lea.hbm %s1737_s0, %s785_s9  ;;  %s370_s27 = sshll.u32 %s363_s21, 4  ;;  %s1624_s27 = int_to_ptr.vmem [resolvable:$true] %s370_s27 }
  0xd3   : > { %p1628_p11 = pnand %p899_p9, %p1597_p3  ;;  %s360_s14 = scalar_lea.sflag [#allocation3], %s359_s26 }
  0xd4   : > { %s1189_s1 = scalar_lea.hbm %s1622_s22, 128  ;;  %s1194_s23 = scalar_lea.hbm %s1737_s0, 256 }
  0xd5   : > { %p1190_p12 = scmp.ne.s32.totalorder %s1622_s22, %s1189_s1  ;;  %p1191_p8 = pneg %p1628_p11 }
  0xd6   : > { %p1195_p1 = scmp.lt.u32.totalorder %s1622_s22, %s1737_s0  ;;  %p1196_p3 = scmp.lt.u32.totalorder %s1194_s23, %s1189_s1 }
  0xd7   : > { %p1192_p13 = pnand %p1191_p8, %p1190_p12  ;;  %p1198_p5 = scmp.lt.u32.totalorder %s1189_s1, %s1622_s22 }
  0xd8   : > { %p1197_p2 = por %p1196_p3, %p1195_p1 }
  0xd9   : > { %p1193_p0 = pneg %p1192_p13 }
  0xda   : > { %p1199_p7 = por %p1198_p5, %p1197_p2 }
  0xdc   : > { %p1200_p9 = pnand %p1199_p7, %p1193_p0 }
  0xde   : > { %1203 = shalt.err (!%p1200_p9)
}
  0xdf   : > { %s1204_s26 = scalar_lea.vmem %s1624_s27, 128  ;;  %s1315_s21 = smov [#allocation2]  }
  0xe0   : > { %p1205_p12 = scmp.ne.s32.totalorder %s1624_s27, %s1204_s26  ;;  %s1209_s18 = sshll.u32 %s1315_s21, 4  ;;  %s1210_s18 = int_to_ptr.vmem [resolvable:$false] %s1209_s18 }
  0xe1   : > { %s1211_s9 = scalar_lea.vmem %s1210_s18, 256  ;;  %p1212_p4 = scmp.lt.s32.totalorder %s1624_s27, %s1210_s18 }
  0xe2   : > { %p1207_p13 = pnand %p1205_p12, %p1191_p8  ;;  %p1213_p1 = scmp.lt.s32.totalorder %s1211_s9, %s1204_s26 }
  0xe4   : > { %p1208_p10 = pneg %p1207_p13  ;;  %p1214_p3 = por %p1213_p1, %p1212_p4 }
  0xe6   : > { %p1215_p2 = pnand %p1214_p3, %p1208_p10 }
  0xe8   : > { %1218 = shalt.err (!%p1215_p2)
}
  0xe9   : > { %886 = dma.hbm_to_vmem [thread:$0]  (!%p1628_p11), %s1622_s22, 128, %s1624_s27, %s360_s14  }
  0xea   : > { %p1763_p0 = scmp.ne.s32.totalorder %s1753_s16, 0 }
  0xeb   : > { %s1660_s1 = sand.u32 (!%p1763_p0), 1, %s1293_s10  }
  0xec   : > { %379 = sbr.rel (%p1763_p0) target bundleno = 1126 (0x466), region = 56  ;;  %s787_s23 = sshll.u32 (!%p1763_p0), %s1660_s1, 3 }
  0xed   : > { %s382_s25 = scalar_lea.sflag (!%p1763_p0), [#allocation3], %s1660_s1  ;;  %s385_s17 = scalar_lea.vmem (!%p1763_p0), [#allocation2], %s787_s23 }
  0xf3   : > { %1264 = dma.done.wait (%p1603_p6), %s382_s25, 128  }
  0xf4   : > { %1266 = vsyncadd (%p1603_p6), %s382_s25, 4294967168  ;;  %p1764_p4 = scmp.eq.s32.totalorder %s1392_s15, 0 }
  0xf6   : > { %1268 = dma.done.wait (%p1764_p4), [#allocation6], 272   ;;  %p1765_p10 = pmov %p1764_p4 }
  0xf7   : > { %p1766_p11 = pmov %p1764_p4 }
  0xf8   : > { %1270 = vsyncadd (%p1765_p10), [#allocation6], 4294967024 }
  0xf9   : > { %1272 = dma.done.wait (%p1766_p11), [#allocation9], 32   ;;  %p1767_p8 = pmov %p1764_p4 }
  0xfa   : > { %p1768_p5 = pmov %p1764_p4 }
  0xfb   : > { %1274 = vsyncadd (%p1767_p8), [#allocation9], 4294967264 }
  0xfc   : > { %1276 = dma.done.wait (%p1768_p5), [#allocation12], 288   ;;  %p1769_p7 = pmov %p1764_p4 }
  0xfd   : > { %p1770_p6 = pmov %p1764_p4 }
  0xfe   : > { %1278 = vsyncadd (%p1769_p7), [#allocation12], 4294967008 }
  0xff   : > { %1280 = dma.done.wait (%p1770_p6), [#allocation15], 32   ;;  %p1771_p9 = pmov %p1764_p4 }
 0x100   : > { %v1316_v0 = vmov 0.0   ;;  %vm1317_vm0 = vmmov 0   ;;  %v957_v1 = vld [vmem:[#allocation5] sm:$0xff]   ;;  %v958_v2 = vld [vmem:[#allocation5 + $0x8] sm:$0xff]   ;;  %v453_v3 = vld [vmem:[%s385_s17] sm:$0xff]  ;;  %vm478_vm1 = vcmask 261120  }
 0x101   : > { %1282 = vsyncadd (%p1771_p9), [#allocation15], 4294967264  ;;  %814 = vmatprep.subr.bf16.mxu0 %v1316_v0  ;;  %818 = vmatprep.mubr.msk.bf16.mxu0 %vm1317_vm0, %v1316_v0  ;;  %v459_v4 = vpack.c.bf16 %v453_v3, %v453_v3  ;;  %v797_v5 = vld [vmem:[#allocation7] ss:$0 sm:$0xff]  ;;  %v801_v19 = vld [vmem:[#allocation8] ss:$0 sm:$0xff] }
 0x102   : > { %815 = vmatpush3.bf16.msra.mxu0 %v957_v1  ;;  %v802_v21 = vld [vmem:[#allocation10] ss:$0 sm:$0xff]  ;;  %v551_v22 = vld [vmem:[#allocation11 + $0x1] sm:$0x1]  ;;  %vm558_vm2 = vcmask 1040384   ;;  %vm569_vm3 = vcmask 1041408  }
 0x103   : > { %816 = vmatprep.subr.bf16.mxu0 %v1316_v0  ;;  %v556_v25 = vrot.slane %v551_v22, 7  ;;  %v562_v27 = vld [vmem:[#allocation13 + $0x8] sm:$0x3]  ;;  %v550_v29 = vld [vmem:[#allocation11] sm:$0x1]  ;;  %v561_v33 = vld [vmem:[#allocation13] sm:$0xff] }
 0x104   : > { %v803_v51 = vld [vmem:[#allocation14] ss:$0 sm:$0xff]  ;;  %s796_s16 = sshll.u32 %s1660_s1, 4  ;;  %v804_v53 = vld [vmem:[#allocation16] ss:$0 sm:$0xff]  ;;  %s810_s20 = sshll.u32 %s1392_s15, 8 }
 0x105   : > { %s451_s22 = scalar_lea.vmem [#allocation17], %s796_s16  ;;  %s1772_s26 = sld [smem:[#allocation25_spill]] }
 0x106   : > { %817 = vmatpush3.bf16.msra.mxu0 %v958_v2  ;;  %s624_s27 = sshll.u32 %s451_s22, 4  ;;  %s611_s18 = scalar_lea.sflag [#allocation4], %s1660_s1  ;;  %s1693_s27 = int_to_ptr.vmem [resolvable:$true] %s624_s27 }
 0x107   : > { %s1219_s9 = scalar_lea.vmem %s1693_s27, 256  ;;  %p1773_p13 = scmp.ne.s32.totalorder %s1760_s28, 0 }
 0x108   : > { %p1220_p12 = scmp.ne.s32.totalorder %s1693_s27, %s1219_s9  ;;  %s1318_s15 = smov [#allocation17]  }
 0x109   : > { %819 = vmatmul.mubr.msk.bf16.vlgmr.msra.gmra.mrb[0].mxu0 %vm478_vm1, %v459_v4  ;;  %s1223_s23 = sshll.u32 %s1318_s15, 4  ;;  %s1224_s23 = int_to_ptr.vmem [resolvable:$false] %s1223_s23 }
 0x10a   : > { %p1221_p1 = pnand %p1220_p12, %p1773_p13  ;;  %s1225_s25 = scalar_lea.vmem %s1224_s23, 512 }
 0x10b   : > { %s1691_s21 = scalar_lea.hbm %s1772_s26, %s810_s20  ;;  %p1226_p2 = scmp.lt.s32.totalorder %s1693_s27, %s1224_s23 }
 0x10c   : > { %p1222_p3 = pneg %p1221_p1  ;;  %p1227_p0 = scmp.lt.s32.totalorder %s1225_s25, %s1219_s9 }
 0x10e   : > { %p1228_p4 = por %p1227_p0, %p1226_p2 }
 0x110   : > { %p1229_p10 = pnand %p1228_p4, %p1222_p3 }
 0x1dc   : > { %v516_v6 = vpop.f32.mrb[0].mxu0 }
 0x1dd   : > { %v517_v7 = vadd.f32 %v797_v5, %v516_v6  ;;  %v820_v8 = vpop.f32.mrb[1].mxu0 }
 0x1de   : > { %v519_v9 = vpop.f32.mrb[2].mxu0 }
 0x1df   : > { %524 = vadd.xlane.f32.xlu0 %v517_v7  ;;  %v821_v10 = vpop.f32.mrb[3].mxu0 }
 0x26c   : > { %v525_v11 = vpop.xlane.xlu0 %524 }
 0x26d   : > { %v527_v12 = vmul.f32 0.0078125, %v525_v11 }
 0x26f   : > { %v528_v13 = vsub.f32 %v517_v7, %v527_v12 }
 0x271   : > { %v529_v14 = vmul.f32 %v528_v13, %v528_v13 }
 0x273   : > { %530 = vadd.xlane.f32.xlu0 %v529_v14 }
 0x300   : > { %v531_v15 = vpop.xlane.xlu0 %530 }
 0x301   : > { %v532_v16 = vmul.f32 0.0078125, %v531_v15 }
 0x303   : > { %v533_v17 = vadd.f32 1e-05, %v532_v16 }
 0x305   : > { %959 = vrsqrt.f32 %v533_v17 }
 0x30f   : > { %v960_v18 = vpop.eup %959 }
 0x310   : > { %v535_v20 = vmul.f32 %v960_v18, %v528_v13 }
 0x312   : > { %v542_v23 = vmul.f32 %v801_v19, %v535_v20 }
 0x314   : > { %v549_v24 = vadd.f32 %v802_v21, %v542_v23 }
 0x316   : > { %v553_v26 = vrot.slane %v549_v24, 7 }
 0x318   : > { %v560_v28 = vsel %vm558_vm2, %v553_v26, %v556_v25  ;;  %v559_v32 = vsel %vm558_vm2, %v550_v29, %v553_v26 }
 0x319   : > { %v564_v30 = vadd.f32 %v562_v27, %v560_v28  ;;  %v563_v34 = vadd.f32 %v561_v33, %v559_v32 }
 0x31b   : > { %v570_v31 = vsel %vm569_vm3, %v564_v30, 0.0 }
 0x31c   : > { %571 = vadd.xlane.f32.xlu1 %v570_v31 }
 0x320   : > { %567 = vadd.xlane.f32.xlu1 %v563_v34 }
 0x3a9   : > { %v572_v35 = vpop.xlane.xlu1 %571 }
 0x3aa   : > { %v574_v36 = vmul.f32 0.0078125, %v572_v35 }
 0x3ac   : > { %v576_v37 = vsub.f32 %v564_v30, %v574_v36 }
 0x3ad   : > { %v568_v38 = vpop.xlane.xlu1 %567 }
 0x3ae   : > { %v573_v39 = vmul.f32 0.0078125, %v568_v38  ;;  %v578_v40 = vmul.f32 %v576_v37, %v576_v37 }
 0x3b0   : > { %v575_v41 = vsub.f32 %v563_v34, %v573_v39  ;;  %v581_v42 = vsel %vm569_vm3, %v578_v40, 0.0 }
 0x3b1   : > { %582 = vadd.xlane.f32.xlu1 %v581_v42 }
 0x3b2   : > { %v577_v43 = vmul.f32 %v575_v41, %v575_v41 }
 0x3b4   : > { %579 = vadd.xlane.f32.xlu0 %v577_v43 }
 0x43e   : > { %v583_v44 = vpop.xlane.xlu1 %582 }
 0x43f   : > { %v585_v45 = vmul.f32 0.0078125, %v583_v44 }
 0x441   : > { %v587_v46 = vadd.f32 1e-12, %v585_v45  ;;  %v580_v47 = vpop.xlane.xlu0 %579 }
 0x442   : > { %v584_v48 = vmul.f32 0.0078125, %v580_v47 }
 0x443   : > { %961 = vrsqrt.f32 %v587_v46 }
 0x444   : > { %v586_v49 = vadd.f32 1e-12, %v584_v48 }
 0x446   : > { %963 = vrsqrt.f32 %v586_v49 }
 0x44d   : > { %v962_v50 = vpop.eup %961 }
 0x44e   : > { %v591_v52 = vmul.f32 %v962_v50, %v576_v37 }
 0x450   : > { %v964_v54 = vpop.eup %963  ;;  %v599_v55 = vmul.f32 %v803_v51, %v591_v52 }
 0x451   : > { %v590_v56 = vmul.f32 %v964_v54, %v575_v41 }
 0x452   : > { %v607_v57 = vadd.f32 %v804_v53, %v599_v55 }
 0x453   : > { %v598_v58 = vmul.f32 %v803_v51, %v590_v56 }
 0x454   : > { %609 = vst [vmem:[%s451_s22 + $0x8] sm:$0x3] %v607_v57 }
 0x455   : > { %v606_v59 = vadd.f32 %v804_v53, %v598_v58 }
 0x457   : > { %608 = vst [vmem:[%s451_s22] sm:$0xff] %v606_v59 }
 0x458   : > { %1232 = shalt.err (!%p1229_p10)
}
 0x459   : > { %s1233_s17 = scalar_lea.hbm %s1691_s21, 256  ;;  %s1237_s22 = scalar_lea.hbm %s1772_s26, 512 }
 0x45a   : > { %p1234_p11 = scmp.ne.s32.totalorder %s1691_s21, %s1233_s17  ;;  %p1238_p7 = scmp.lt.u32.totalorder %s1691_s21, %s1772_s26 }
 0x45b   : > { %p1239_p6 = scmp.lt.u32.totalorder %s1237_s22, %s1233_s17  ;;  %p1241_p12 = scmp.lt.u32.totalorder %s1233_s17, %s1691_s21 }
 0x45c   : > { %p1235_p8 = pnand %p1234_p11, %p1773_p13 }
 0x45d   : > { %p1240_p9 = por %p1239_p6, %p1238_p7 }
 0x45e   : > { %p1236_p5 = pneg %p1235_p8 }
 0x45f   : > { %p1242_p1 = por %p1241_p12, %p1240_p9 }
 0x461   : > { %p1243_p3 = pnand %p1242_p1, %p1236_p5 }
 0x463   : > { %1246 = shalt.err (!%p1243_p3)
}
 0x464   : > { %s1319_s9 = smov 128   ;;  %s1320_s15 = smov 8  }
 0x465   : > { %856 = dma.vmem_to_hbm [thread:$0]  (%p1773_p13), %s1693_s27, 256, %s1691_s21, %s611_s18, %s1319_s9, %s1319_s9, %s1320_s15  }
 0x466 PF: > { %s639_s23 = sand.u32 1, %s1289_s30   ;;  %p1774_p2 = scmp.ne.s32.totalorder %s1761_s29, 0 }
 0x467   : > { %p1775_p0 = scmp.ge.s32.totalorder %s1301_s12, 2  ;;  %s640_s25 = scalar_lea.sflag [#allocation4], %s639_s23 }
 0x469   : > { %p888_p4 = pnand %p1775_p0, %p1774_p2 }
 0x46b   : > { %1284 = dma.done.wait (!%p888_p4), %s640_s25, 256  }
 0x46c   : > { %1286 = vsyncadd (!%p888_p4), %s640_s25, 4294967040  ;;  %p26_p10 = scmp.ge.s32.totalorder %s1584_s19, 4   ;;  %s1776_s30 = smov %s1293_s10 }
 0x46d   : > { %s1777_s10 = smov %s1297_s11  ;;  %s1778_s11 = smov %s1595_s24 }
 0x46e   : > { %s1779_s12 = smov %s1584_s19  ;;  %28 = sbr.rel (!%p26_p10) target bundleno = 12 (0xc), region = 133 }
 0x475   :  { %645 = vsyncpa [#allocation3], 1 }
 0x476   :  { %647 = vsyncpa [#allocation3 + $0x1], 1 }
 0x477   :  { %648 = vsyncpa [#allocation6], 1 }
 0x478   :  { %649 = vsyncpa [#allocation9], 1 }
 0x479   :  { %650 = vsyncpa [#allocation12], 1 }
 0x47a   :  { %651 = vsyncpa [#allocation15], 1 }
 0x47b   :  { %652 = vsyncpa [#allocation4], 1 }
 0x47c   :  { %654 = vsyncpa [#allocation4 + $0x1], 1 }

// kernel: ms_forward.4
= control target key start
LH: loop header
LB: loop body
LE: loop exit
PB: predicated region body
PF: predicated region fallthrough
CT: control target
= control target key end

     0   :  { %s4865_s0 = inlined_call_operand.hbm [shape: f32[2,10,128], index: 0, kind: input, shape index: {}, may-alias: {0,14}]   ;;  %s4866_s1 = inlined_call_operand.hbm [shape: f32[2,1,10], index: 1, kind: input, shape index: {}]   ;;  %s4867_s2 = inlined_call_operand.hbm [shape: bf16[2,128,384], index: 2, kind: input, shape index: {}]   ;;  %s4868_s3 = inlined_call_operand.hbm [shape: f32[2,1,384], index: 3, kind: input, shape index: {}]   ;;  %s4869_s4 = inlined_call_operand.hbm [shape: bf16[2,128,128], index: 4, kind: input, shape index: {}]   ;;  %s4870_s5 = inlined_call_operand.hbm [shape: f32[2,1,128], index: 5, kind: input, shape index: {}]   ;;  %s4871_s6 = inlined_call_operand.hbm [shape: f32[2,1,128], index: 6, kind: input, shape index: {}]   ;;  %s4872_s7 = inlined_call_operand.hbm [shape: f32[2,1,128], index: 7, kind: input, shape index: {}]   ;;  %s4873_s8 = inlined_call_operand.hbm [shape: bf16[2,128,256], index: 8, kind: input, shape index: {}]   ;;  %s4874_s9 = inlined_call_operand.hbm [shape: f32[2,1,256], index: 9, kind: input, shape index: {}]   ;;  %s4875_s10 = inlined_call_operand.hbm [shape: bf16[2,256,128], index: 10, kind: input, shape index: {}]   ;;  %s4876_s11 = inlined_call_operand.hbm [shape: f32[2,1,128], index: 11, kind: input, shape index: {}]   ;;  %s4877_s12 = inlined_call_operand.hbm [shape: f32[2,1,128], index: 12, kind: input, shape index: {}]   ;;  %s4878_s13 = inlined_call_operand.hbm [shape: f32[2,1,128], index: 13, kind: input, shape index: {}]   ;;  %s4879_s14 = inlined_call_operand.hbm [shape: f32[2,10,128], index: 14, kind: output, shape index: {}, may-alias: {0,14}]  }
   0x1   :  { %4918 = sst [smem:[#allocation53_spill]] %s4865_s0 }
   0x2   :  { %4919 = sst [smem:[#allocation54_spill]] %s4866_s1 }
   0x3   :  { %4920 = sst [smem:[#allocation55_spill]] %s4867_s2 }
   0x4   :  { %4921 = sst [smem:[#allocation56_spill]] %s4868_s3 }
   0x5   :  { %4922 = sst [smem:[#allocation57_spill]] %s4869_s4 }
   0x6   :  { %4923 = sst [smem:[#allocation58_spill]] %s4871_s6 }
   0x7   :  { %4924 = sst [smem:[#allocation59_spill]] %s4873_s8 }
   0x8   :  { %4925 = sst [smem:[#allocation60_spill]] %s4875_s10 }
   0x9   :  { %4926 = sst [smem:[#allocation61_spill]] %s4877_s12 }
   0xa   :  { %4927 = sst [smem:[#allocation62_spill]] %s4878_s13 }
   0xb   :  { %4928 = sst [smem:[#allocation63_spill]] %s4879_s14 }
   0xc   :  { %19 = vsyncpa [#allocation5], 0 }
   0xd   :  { %21 = vsyncpa [#allocation5 + $0x1], 0 }
   0xe   :  { %22 = vsyncpa [#allocation8], 0 }
   0xf   :  { %24 = vsyncpa [#allocation8 + $0x1], 0 }
  0x10   :  { %25 = vsyncpa [#allocation11], 0 }
  0x11   :  { %27 = vsyncpa [#allocation11 + $0x1], 0 }
  0x12   :  { %28 = vsyncpa [#allocation14], 0 }
  0x13   :  { %30 = vsyncpa [#allocation14 + $0x1], 0 }
  0x14   :  { %31 = vsyncpa [#allocation17], 0 }
  0x15   :  { %33 = vsyncpa [#allocation17 + $0x1], 0 }
  0x16   :  { %34 = vsyncpa [#allocation20], 0 }
  0x17   :  { %36 = vsyncpa [#allocation20 + $0x1], 0 }
  0x18   :  { %37 = vsyncpa [#allocation23], 0 }
  0x19   :  { %39 = vsyncpa [#allocation23 + $0x1], 0 }
  0x1a   :  { %40 = vsyncpa [#allocation26], 0 }
  0x1b   :  { %42 = vsyncpa [#allocation26 + $0x1], 0 }
  0x1c   :  { %43 = vsyncpa [#allocation6], 0 }
  0x1d   :  { %45 = vsyncpa [#allocation6 + $0x1], 0  ;;  %s3905_s29 = smov 0   ;;  %s3907_s30 = smov 0  }
  0x1e   :  { %s3909_s15 = smov 0   ;;  %s3911_s16 = smov 0  }
  0x1f   :  { %s3913_s17 = smov 0   ;;  %s3915_s18 = smov 0  }
  0x20   :  { %s3917_s19 = smov 0   ;;  %s3919_s20 = smov 0  }
  0x21   :  { %s3921_s21 = smov 0   ;;  %s3923_s22 = smov 0  }
  0x22   :  { %s3925_s23 = smov 0  }
  0x23 LB: > { %4929 = sst [smem:[#allocation38_spill]] %s3762_s30  ;;  %s3961_s24 = sadd.s32 4294967295, %s3798_s23   ;;  %s3798_s23 = sphi %s3925_s23, %s51_s23   ;;  %s3794_s22 = sphi %s3923_s22, %s5007_s22   ;;  %s3790_s21 = sphi %s3921_s21, %s5006_s21   ;;  %s3786_s20 = sphi %s3919_s20, %s5005_s20   ;;  %s3782_s19 = sphi %s3917_s19, %s5004_s19   ;;  %s3778_s18 = sphi %s3915_s18, %s4999_s18   ;;  %s3774_s17 = sphi %s3913_s17, %s5003_s17   ;;  %s3770_s16 = sphi %s3911_s16, %s5002_s16   ;;  %s3766_s15 = sphi %s3909_s15, %s4997_s15   ;;  %s3762_s30 = sphi %s3907_s30, %s4996_s30   ;;  %s3758_s29 = sphi %s3905_s29, %s4995_s29  }
  0x24   : > { %4930 = sst [smem:[#allocation39_spill]] %s3766_s15  ;;  %s2711_s25 = sadd.s32 4294967294, %s3798_s23  }
  0x25   : > { %4931 = sst [smem:[#allocation40_spill]] %s3770_s16  ;;  %s60_s26 = sadd.s32 1, %s3790_s21 }
  0x26   : > { %4932 = sst [smem:[#allocation41_spill]] %s3778_s18  ;;  %s63_s27 = sadd.s32 1, %s3794_s22 }
  0x27   : > { %4933 = sst [smem:[#allocation42_spill]] %s3782_s19  ;;  %p61_p0 = scmp.ge.s32.totalorder %s60_s26, 2 }
  0x28   : > { %4934 = sst [smem:[#allocation43_spill]] %s3786_s20  ;;  %s70_s28 = sadd.s32 1, %s3778_s18 }
  0x29   : > { %4935 = sst [smem:[#allocation44_spill]] %s3961_s24  ;;  %p77_p1 = scmp.ne.s32.totalorder %s3778_s18, %s3774_s17 }
  0x2a   : > { %p78_p2 = scmp.eq.s32.totalorder %s3798_s23, 0  ;;  %s5009_s26 = smov (%p61_p0, %s60_s26), 0 }
  0x2b   : > { %4936 = sst [smem:[#allocation45_spill]] %s5009_s26  ;;  %s5011_s27 = smov (!%p61_p0, %s63_s27), %s3794_s22 }
  0x2c   : > { %p3978_p3 = por %p78_p2, %p77_p1  ;;  %p4887_p4 = scmp.ne.s32.totalorder %s3774_s17, %s3770_s16 }
  0x2d   : > { %p65_p5 = scmp.ge.s32.totalorder %s5011_s27, 2  ;;  %p84_p6 = scmp.eq.s32.totalorder %s3961_s24, 0 }
  0x2e   : > { %s4937_s14 = scalar_select %p3978_p3, 1, 0 }
  0x2f   : > { %s119_s20 = ssub.s32 %s3790_s21, %s5009_s26  ;;  %s122_s19 = sadd.s32 1, %s3766_s15 }
  0x30   : > { %s5013_s27 = smov (%p65_p5, %s5011_s27), 0  ;;  %p3995_p7 = por %p84_p6, %p4887_p4 }
  0x31   : > { %4938 = sst [smem:[#allocation46_spill]] %s5013_s27  ;;  %p120_p8 = scmp.eq.s32.totalorder %s119_s20, 0 }
  0x32   : > { %s4939_s13 = scalar_select %p3995_p7, 1, 0 }
  0x33   : > { %s67_s12 = ssub.s32 %s3794_s22, %s5013_s27  ;;  %p129_p9 = scmp.ne.s32.totalorder %s3766_s15, %s3762_s30 }
  0x34   : > { %4940 = sst [smem:[#allocation47_spill]] %s4939_s13  ;;  %p68_p10 = scmp.eq.s32.totalorder %s67_s12, 0 }
  0x35   : > { %p135_p11 = scmp.ne.s32.totalorder %s3762_s30, %s3758_s29  ;;  %p4013_p12 = por %p129_p9, %p78_p2 }
  0x36   : > { %s4006_s10 = scalar_select %p120_p8, %s3766_s15, %s122_s19  }
  0x37   : > { %s4009_s26 = scalar_select %p68_p10, %s3778_s18, %s70_s28  }
  0x38   : > { %4941 = sst [smem:[#allocation48_spill]] %s4006_s10  ;;  %p4019_p13 = por %p135_p11, %p84_p6 }
  0x39   : > { %4942 = sst [smem:[#allocation49_spill]] %s4009_s26  ;;  %p445_p0 = scmp.eq.s32.totalorder %s3961_s24, 3 }
  0x3a   : > { %s4943_s8 = scalar_select %p4013_p12, 1, 0 }
  0x3b   : > { %s4944_s6 = scalar_select %p4019_p13, 1, 0 }
  0x3c   : > { %p451_p5 = scmp.eq.s32.totalorder %s2711_s25, 3  ;;  %p4027_p4 = por %p445_p0, %p77_p1 }
  0x3d   : > { %4945 = sst [smem:[#allocation50_spill]] %s4944_s6  ;;  %p4948_p8 = scmp.ne.s32.totalorder %s3774_s17, %s3770_s16 }
  0x3e   : > { %s4946_s12 = scalar_select %p4027_p4, 1, 0 }
  0x3f   : > { %p4034_p10 = por %p451_p5, %p4948_p8  ;;  %p2713_p2 = scmp.ge.s32.totalorder %s3798_s23, 4 }
  0x40   : > { %4947 = sst [smem:[#allocation51_spill]] %s4946_s12  ;;  %s4040_s19 = sand.u32 (!%p2713_p2), 1, %s3778_s18  }
  0x41   : > { %s4949_s29 = scalar_select %p4034_p10, 1, 0 }
  0x42   : > { %467 = sbr.rel (%p2713_p2) target bundleno = 451 (0x1c3), region = 16  ;;  %s4043_s20 = sand.u32 (!%p2713_p2), 1, %s3798_s23  }
  0x43   : > { %4950 = sst [smem:[#allocation52_spill]] %s4949_s29  ;;  %s2717_s25 = sshll.u32 (!%p2713_p2), %s3794_s22, 4 }
  0x44   : > { %s495_s28 = scalar_lea.vmem (!%p2713_p2), [#allocation7], %s4040_s19  ;;  %s4951_s1 = sld [smem:[#allocation54_spill]] (!%p2713_p2) }
  0x45   : > { %s502_s27 = sshll.u32 (!%p2713_p2), %s495_s28, 4  ;;  %s4902_s16 = scalar_lea.sflag (!%p2713_p2), [#allocation8], %s4043_s20  ;;  %s503_s27 = int_to_ptr.vmem [resolvable:$true] %s502_s27 }
  0x4a   : > { %s4050_s29 = scalar_lea.hbm %s4951_s1, %s2717_s25  ;;  %s3256_s28 = scalar_lea.hbm %s4951_s1, 32 }
  0x4b   : > { %s3252_s18 = scalar_lea.hbm %s4050_s29, 16  ;;  %p3257_p11 = scmp.lt.u32.totalorder %s4050_s29, %s4951_s1 }
  0x4c   : > { %p3253_p1 = scmp.ne.s32.totalorder %s4050_s29, %s3252_s18  ;;  %p3258_p0 = scmp.lt.u32.totalorder %s3256_s28, %s3252_s18 }
  0x4d   : > { %p3260_p8 = scmp.lt.u32.totalorder %s3252_s18, %s4050_s29 }
  0x4e   : > { %p3254_p6 = pnand %p3253_p1, %p3978_p3  ;;  %p3259_p5 = por %p3258_p0, %p3257_p11 }
  0x50   : > { %p3255_p9 = pneg %p3254_p6  ;;  %p3261_p2 = por %p3260_p8, %p3259_p5 }
  0x52   : > { %p3262_p10 = pnand %p3261_p2, %p3255_p9 }
  0x54   : > { %3265 = shalt.err (!%p3262_p10)
}
  0x55   : > { %s3266_s10 = scalar_lea.vmem %s503_s27, 16  ;;  %s3800_s26 = smov [#allocation7]  }
  0x56   : > { %p3267_p4 = scmp.ne.s32.totalorder %s503_s27, %s3266_s10  ;;  %s3270_s25 = sshll.u32 %s3800_s26, 4  ;;  %s3271_s25 = int_to_ptr.vmem [resolvable:$false] %s3270_s25 }
  0x57   : > { %s3272_s6 = scalar_lea.vmem %s3271_s25, 32  ;;  %p3273_p13 = scmp.lt.s32.totalorder %s503_s27, %s3271_s25 }
  0x58   : > { %p3268_p1 = pnand %p3267_p4, %p3978_p3  ;;  %p3274_p7 = scmp.lt.s32.totalorder %s3272_s6, %s3266_s10 }
  0x5a   : > { %p3269_p6 = pneg %p3268_p1  ;;  %p3275_p12 = por %p3274_p7, %p3273_p13 }
  0x5c   : > { %p3276_p0 = pnand %p3275_p12, %p3269_p6 }
  0x5e   : > { %3279 = shalt.err (!%p3276_p0)
}
  0x5f   : > { %2987 = dma.hbm_to_vmem [thread:$0]  (%p3978_p3), %s4050_s29, 16, %s503_s27, %s4902_s16  }
  0x60   : > { %s4073_s30 = sand.u32 1, %s3766_s15   ;;  %s2983_s24 = smul.u32 48, %s3790_s21 }
  0x61   : > { %s2982_s18 = smul.u32 3, %s4073_s30  ;;  %s4078_s12 = sshll.u32 %s3790_s21, 4 }
  0x62   : > { %s4952_s3 = sld [smem:[#allocation56_spill]]  ;;  %s4091_s16 = scalar_lea.hbm %s4870_s5, %s4078_s12 }
  0x63   : > { %s534_s25 = scalar_lea.vmem [#allocation10], %s2982_s18  ;;  %s4912_s1 = scalar_lea.sflag [#allocation11], %s4043_s20 }
  0x64   : > { %s542_s6 = sshll.u32 %s534_s25, 4  ;;  %p4953_p7 = scmp.ne.s32.totalorder %s4943_s8, 0  ;;  %s4085_s6 = int_to_ptr.vmem [resolvable:$true] %s542_s6 }
  0x68   : > { %s4083_s26 = scalar_lea.hbm %s4952_s3, %s2983_s24  ;;  %s3284_s10 = scalar_lea.hbm %s4952_s3, 96 }
  0x69   : > { %s3280_s15 = scalar_lea.hbm %s4083_s26, 48  ;;  %p3285_p10 = scmp.lt.u32.totalorder %s4083_s26, %s4952_s3 }
  0x6a   : > { %p3281_p4 = scmp.ne.s32.totalorder %s4083_s26, %s3280_s15  ;;  %p3286_p9 = scmp.lt.u32.totalorder %s3284_s10, %s3280_s15 }
  0x6b   : > { %p3288_p5 = scmp.lt.u32.totalorder %s3280_s15, %s4083_s26 }
  0x6c   : > { %p3282_p12 = pnand %p3281_p4, %p4953_p7  ;;  %p3287_p11 = por %p3286_p9, %p3285_p10 }
  0x6e   : > { %p3283_p13 = pneg %p3282_p12  ;;  %p3289_p8 = por %p3288_p5, %p3287_p11 }
  0x70   : > { %p3290_p2 = pnand %p3289_p8, %p3283_p13 }
  0x72   : > { %3293 = shalt.err (!%p3290_p2)
}
  0x73   : > { %s3294_s25 = scalar_lea.vmem %s4085_s6, 48  ;;  %s3801_s27 = smov [#allocation10]  }
  0x74   : > { %p3295_p1 = scmp.ne.s32.totalorder %s4085_s6, %s3294_s25  ;;  %s3298_s29 = sshll.u32 %s3801_s27, 4  ;;  %s3299_s29 = int_to_ptr.vmem [resolvable:$false] %s3298_s29 }
  0x75   : > { %s3300_s13 = scalar_lea.vmem %s3299_s29, 96  ;;  %p3301_p4 = scmp.lt.s32.totalorder %s4085_s6, %s3299_s29 }
  0x76   : > { %p3296_p6 = pnand %p3295_p1, %p4953_p7  ;;  %p3302_p12 = scmp.lt.s32.totalorder %s3300_s13, %s3294_s25 }
  0x78   : > { %p3297_p0 = pneg %p3296_p6  ;;  %p3303_p10 = por %p3302_p12, %p3301_p4 }
  0x7a   : > { %p3304_p9 = pnand %p3303_p10, %p3297_p0 }
  0x7c   : > { %3307 = shalt.err (!%p3304_p9)
}
  0x7d   : > { %2989 = dma.hbm_to_vmem [thread:$0]  (%p4953_p7), %s4083_s26, 48, %s4085_s6, %s4912_s1  }
  0x7e   : > { %s573_s15 = scalar_lea.vmem [#allocation13], %s4073_s30  ;;  %s4908_s28 = scalar_lea.sflag [#allocation14], %s4043_s20 }
  0x7f   : > { %s580_s24 = sshll.u32 %s573_s15, 4  ;;  %s3308_s10 = scalar_lea.hbm %s4091_s16, 16  ;;  %s581_s24 = int_to_ptr.vmem [resolvable:$true] %s580_s24 }
  0x80   : > { %p3309_p13 = scmp.ne.s32.totalorder %s4091_s16, %s3308_s10  ;;  %s3312_s27 = scalar_lea.hbm %s4870_s5, 32 }
  0x81   : > { %p3313_p8 = scmp.lt.u32.totalorder %s4091_s16, %s4870_s5  ;;  %p3314_p2 = scmp.lt.u32.totalorder %s3312_s27, %s3308_s10 }
  0x82   : > { %p3310_p11 = pnand %p3309_p13, %p4953_p7  ;;  %p3316_p6 = scmp.lt.u32.totalorder %s3308_s10, %s4091_s16 }
  0x83   : > { %p3315_p1 = por %p3314_p2, %p3313_p8 }
  0x84   : > { %p3311_p5 = pneg %p3310_p11 }
  0x85   : > { %p3317_p0 = por %p3316_p6, %p3315_p1 }
  0x87   : > { %p3318_p4 = pnand %p3317_p0, %p3311_p5 }
  0x89   : > { %3321 = shalt.err (!%p3318_p4)
}
  0x8a   : > { %s3322_s26 = scalar_lea.vmem %s581_s24, 16  ;;  %s3802_s6 = smov [#allocation13]  }
  0x8b   : > { %p3323_p12 = scmp.ne.s32.totalorder %s581_s24, %s3322_s26  ;;  %s3326_s15 = sshll.u32 %s3802_s6, 4  ;;  %s3327_s15 = int_to_ptr.vmem [resolvable:$false] %s3326_s15 }
  0x8c   : > { %s3328_s18 = scalar_lea.vmem %s3327_s15, 32  ;;  %p3329_p13 = scmp.lt.s32.totalorder %s581_s24, %s3327_s15 }
  0x8d   : > { %p3324_p10 = pnand %p3323_p12, %p4953_p7  ;;  %p3330_p11 = scmp.lt.s32.totalorder %s3328_s18, %s3322_s26 }
  0x8f   : > { %p3325_p9 = pneg %p3324_p10  ;;  %p3331_p3 = por %p3330_p11, %p3329_p13 }
  0x91   : > { %p3332_p2 = pnand %p3331_p3, %p3325_p9 }
  0x93   : > { %3335 = shalt.err (!%p3332_p2)
}
  0x94   : > { %2991 = dma.hbm_to_vmem [thread:$0]  (%p4953_p7), %s4091_s16, 16, %s581_s24, %s4908_s28  }
  0x95   : > { %s4142_s27 = scalar_lea.hbm %s4872_s7, %s4078_s12  ;;  %s607_s29 = scalar_lea.vmem [#allocation16], %s4073_s30 }
  0x96   : > { %s614_s13 = sshll.u32 %s607_s29, 4  ;;  %s4909_s26 = scalar_lea.sflag [#allocation17], %s4043_s20  ;;  %s615_s13 = int_to_ptr.vmem [resolvable:$true] %s614_s13 }
  0x97   : > { %s3336_s6 = scalar_lea.hbm %s4142_s27, 16  ;;  %s3340_s24 = scalar_lea.hbm %s4872_s7, 32 }
  0x98   : > { %p3337_p3 = scmp.ne.s32.totalorder %s4142_s27, %s3336_s6  ;;  %p3341_p1 = scmp.lt.u32.totalorder %s4142_s27, %s4872_s7 }
  0x99   : > { %p3342_p6 = scmp.lt.u32.totalorder %s3340_s24, %s3336_s6  ;;  %p3344_p4 = scmp.lt.u32.totalorder %s3336_s6, %s4142_s27 }
  0x9a   : > { %p3338_p5 = pnand %p3337_p3, %p4953_p7 }
  0x9b   : > { %p3343_p0 = por %p3342_p6, %p3341_p1 }
  0x9c   : > { %p3339_p8 = pneg %p3338_p5 }
  0x9d   : > { %p3345_p12 = por %p3344_p4, %p3343_p0 }
  0x9f   : > { %p3346_p10 = pnand %p3345_p12, %p3339_p8 }
  0xa1   : > { %3349 = shalt.err (!%p3346_p10)
}
  0xa2   : > { %s3350_s25 = scalar_lea.vmem %s615_s13, 16  ;;  %s3803_s29 = smov [#allocation16]  }
  0xa3   : > { %p3351_p9 = scmp.ne.s32.totalorder %s615_s13, %s3350_s25  ;;  %s3354_s28 = sshll.u32 %s3803_s29, 4  ;;  %s3355_s28 = int_to_ptr.vmem [resolvable:$false] %s3354_s28 }
  0xa4   : > { %s3356_s15 = scalar_lea.vmem %s3355_s28, 32  ;;  %p3357_p2 = scmp.lt.s32.totalorder %s615_s13, %s3355_s28 }
  0xa5   : > { %p3352_p13 = pnand %p3351_p9, %p4953_p7  ;;  %p3358_p3 = scmp.lt.s32.totalorder %s3356_s15, %s3350_s25 }
  0xa7   : > { %p3353_p11 = pneg %p3352_p13  ;;  %p3359_p5 = por %p3358_p3, %p3357_p2 }
  0xa9   : > { %p3360_p1 = pnand %p3359_p5, %p3353_p11 }
  0xab   : > { %3363 = shalt.err (!%p3360_p1)
}
  0xac   : > { %2993 = dma.hbm_to_vmem [thread:$0]  (%p4953_p7), %s4142_s27, 16, %s615_s13, %s4909_s26  }
  0xad   : > { %s2729_s6 = sshll.u32 %s4073_s30, 1  ;;  %s2833_s16 = sshll.u32 %s3790_s21, 5 }
  0xae   : > { %s4170_s28 = scalar_lea.hbm %s4874_s9, %s2833_s16  ;;  %s646_s10 = scalar_lea.vmem [#allocation19], %s2729_s6 }
  0xaf   : > { %s654_s25 = sshll.u32 %s646_s10, 4  ;;  %s4910_s29 = scalar_lea.sflag [#allocation20], %s4043_s20  ;;  %s655_s25 = int_to_ptr.vmem [resolvable:$true] %s654_s25 }
  0xb0   : > { %s3364_s15 = scalar_lea.hbm %s4170_s28, 32  ;;  %s3368_s26 = scalar_lea.hbm %s4874_s9, 64 }
  0xb1   : > { %p3365_p8 = scmp.ne.s32.totalorder %s4170_s28, %s3364_s15  ;;  %p3369_p4 = scmp.lt.u32.totalorder %s4170_s28, %s4874_s9 }
  0xb2   : > { %p3370_p12 = scmp.lt.u32.totalorder %s3368_s26, %s3364_s15  ;;  %p3372_p9 = scmp.lt.u32.totalorder %s3364_s15, %s4170_s28 }
  0xb3   : > { %p3366_p6 = pnand %p3365_p8, %p4953_p7 }
  0xb4   : > { %p3371_p10 = por %p3370_p12, %p3369_p4 }
  0xb5   : > { %p3367_p0 = pneg %p3366_p6 }
  0xb6   : > { %p3373_p13 = por %p3372_p9, %p3371_p10 }
  0xb8   : > { %p3374_p11 = pnand %p3373_p13, %p3367_p0 }
  0xba   : > { %3377 = shalt.err (!%p3374_p11)
}
  0xbb   : > { %s3378_s6 = scalar_lea.vmem %s655_s25, 32  ;;  %s3804_s18 = smov [#allocation19]  }
  0xbc   : > { %p3379_p2 = scmp.ne.s32.totalorder %s655_s25, %s3378_s6  ;;  %s3382_s10 = sshll.u32 %s3804_s18, 4  ;;  %s3383_s10 = int_to_ptr.vmem [resolvable:$false] %s3382_s10 }
  0xbd   : > { %s3384_s27 = scalar_lea.vmem %s3383_s10, 64  ;;  %p3385_p1 = scmp.lt.s32.totalorder %s655_s25, %s3383_s10 }
  0xbe   : > { %p3380_p3 = pnand %p3379_p2, %p4953_p7  ;;  %p3386_p8 = scmp.lt.s32.totalorder %s3384_s27, %s3378_s6 }
  0xc0   : > { %p3381_p5 = pneg %p3380_p3  ;;  %p3387_p6 = por %p3386_p8, %p3385_p1 }
  0xc2   : > { %p3388_p4 = pnand %p3387_p6, %p3381_p5 }
  0xc4   : > { %3391 = shalt.err (!%p3388_p4)
}
  0xc5   : > { %2995 = dma.hbm_to_vmem [thread:$0]  (%p4953_p7), %s4170_s28, 32, %s655_s25, %s4910_s29  }
  0xc6   : > { %s4196_s13 = scalar_lea.hbm %s4876_s11, %s4078_s12  ;;  %s685_s24 = scalar_lea.vmem [#allocation22], %s4073_s30 }
  0xc7   : > { %s692_s16 = sshll.u32 %s685_s24, 4  ;;  %s4911_s6 = scalar_lea.sflag [#allocation23], %s4043_s20  ;;  %s693_s16 = int_to_ptr.vmem [resolvable:$true] %s692_s16 }
  0xc8   : > { %s3392_s18 = scalar_lea.hbm %s4196_s13, 16  ;;  %s3396_s25 = scalar_lea.hbm %s4876_s11, 32 }
  0xc9   : > { %p3393_p0 = scmp.ne.s32.totalorder %s4196_s13, %s3392_s18  ;;  %p3397_p9 = scmp.lt.u32.totalorder %s4196_s13, %s4876_s11 }
  0xca   : > { %p3398_p13 = scmp.lt.u32.totalorder %s3396_s25, %s3392_s18  ;;  %p3400_p2 = scmp.lt.u32.totalorder %s3392_s18, %s4196_s13 }
  0xcb   : > { %p3394_p12 = pnand %p3393_p0, %p4953_p7 }
  0xcc   : > { %p3399_p11 = por %p3398_p13, %p3397_p9 }
  0xcd   : > { %p3395_p10 = pneg %p3394_p12 }
  0xce   : > { %p3401_p3 = por %p3400_p2, %p3399_p11 }
  0xd0   : > { %p3402_p5 = pnand %p3401_p3, %p3395_p10 }
  0xd2   : > { %3405 = shalt.err (!%p3402_p5)
}
  0xd3   : > { %s3406_s15 = scalar_lea.vmem %s693_s16, 16  ;;  %s3805_s24 = smov [#allocation22]  }
  0xd4   : > { %p3407_p1 = scmp.ne.s32.totalorder %s693_s16, %s3406_s15  ;;  %s3410_s29 = sshll.u32 %s3805_s24, 4  ;;  %s3411_s29 = int_to_ptr.vmem [resolvable:$false] %s3410_s29 }
  0xd5   : > { %s3412_s10 = scalar_lea.vmem %s3411_s29, 32  ;;  %p3413_p4 = scmp.lt.s32.totalorder %s693_s16, %s3411_s29 }
  0xd6   : > { %p3408_p8 = pnand %p3407_p1, %p4953_p7  ;;  %p3414_p0 = scmp.lt.s32.totalorder %s3412_s10, %s3406_s15 }
  0xd8   : > { %p3409_p6 = pneg %p3408_p8  ;;  %p3415_p12 = por %p3414_p0, %p3413_p4 }
  0xda   : > { %p3416_p9 = pnand %p3415_p12, %p3409_p6 }
  0xdc   : > { %3419 = shalt.err (!%p3416_p9)
}
  0xdd   : > { %2997 = dma.hbm_to_vmem [thread:$0]  (%p4953_p7), %s4196_s13, 16, %s693_s16, %s4911_s6  }
  0xde   : > { %s2714_s18 = sshll.u32 %s4040_s19, 4  ;;  %s2830_s28 = sshll.u32 %s3794_s22, 8 }
  0xdf   : > { %s4954_s0 = sld [smem:[#allocation53_spill]]  ;;  %s475_s26 = scalar_lea.vmem [#allocation4], %s2714_s18 }
  0xe0   : > { %s482_s15 = sshll.u32 %s475_s26, 4  ;;  %s472_s24 = scalar_lea.sflag [#allocation5], %s4040_s19  ;;  %s4226_s15 = int_to_ptr.vmem [resolvable:$true] %s482_s15 }
  0xe1   : > { %p4955_p13 = scmp.ne.s32.totalorder %s4937_s14, 0 }
  0xe5   : > { %s4224_s29 = scalar_lea.hbm %s4954_s0, %s2830_s28  ;;  %s3424_s25 = scalar_lea.hbm %s4954_s0, 512 }
  0xe6   : > { %s3420_s10 = scalar_lea.hbm %s4224_s29, 256  ;;  %p3425_p3 = scmp.lt.u32.totalorder %s4224_s29, %s4954_s0 }
  0xe7   : > { %p3421_p10 = scmp.ne.s32.totalorder %s4224_s29, %s3420_s10  ;;  %p3426_p5 = scmp.lt.u32.totalorder %s3424_s25, %s3420_s10 }
  0xe8   : > { %p3428_p8 = scmp.lt.u32.totalorder %s3420_s10, %s4224_s29 }
  0xe9   : > { %p3422_p11 = pnand %p3421_p10, %p4955_p13  ;;  %p3427_p1 = por %p3426_p5, %p3425_p3 }
  0xeb   : > { %p3423_p2 = pneg %p3422_p11  ;;  %p3429_p6 = por %p3428_p8, %p3427_p1 }
  0xed   : > { %p3430_p4 = pnand %p3429_p6, %p3423_p2 }
  0xef   : > { %3433 = shalt.err (!%p3430_p4)
}
  0xf0   : > { %s3434_s18 = scalar_lea.vmem %s4226_s15, 256  ;;  %s3806_s26 = smov [#allocation4]  }
  0xf1   : > { %p3435_p0 = scmp.ne.s32.totalorder %s4226_s15, %s3434_s18  ;;  %s3438_s13 = sshll.u32 %s3806_s26, 4  ;;  %s3439_s13 = int_to_ptr.vmem [resolvable:$false] %s3438_s13 }
  0xf2   : > { %s3440_s16 = scalar_lea.vmem %s3439_s13, 512  ;;  %p3441_p10 = scmp.lt.s32.totalorder %s4226_s15, %s3439_s13 }
  0xf3   : > { %p3436_p12 = pnand %p3435_p0, %p4955_p13  ;;  %p3442_p11 = scmp.lt.s32.totalorder %s3440_s16, %s3434_s18 }
  0xf5   : > { %p3437_p9 = pneg %p3436_p12  ;;  %p3443_p3 = por %p3442_p11, %p3441_p10 }
  0xf7   : > { %p3444_p5 = pnand %p3443_p3, %p3437_p9 }
  0xf9   : > { %3447 = shalt.err (!%p3444_p5)
}
  0xfa   : > { %s4913_s10 = smov 128   ;;  %s3808_s25 = smov 8  }
  0xfb   : > { %2986 = dma.hbm_to_vmem [thread:$0]  (%p4955_p13), %s4224_s29, 256, %s4226_s15, %s472_s24, %s4913_s10, %s4913_s10, %s3808_s25  }
  0xfc   : > { %s2980_s28 = smul.u32 192, %s4073_s30  ;;  %s2720_s18 = sshll.u32 %s4073_s30, 6 }
  0xfd   : > { %s2981_s27 = smul.u32 3072, %s3790_s21  ;;  %s4956_s2 = sld [smem:[#allocation55_spill]] }
  0xfe   : > { %s513_s6 = scalar_lea.vmem [#allocation9], %s2980_s28 }
  0xff   : > { %s520_s1 = sshll.u32 %s513_s6, 4  ;;  %s4263_s1 = int_to_ptr.vmem [resolvable:$true] %s520_s1 }
 0x103   : > { %s4261_s16 = scalar_lea.hbm %s4956_s2, %s2981_s27  ;;  %s3452_s15 = scalar_lea.hbm %s4956_s2, 6144 }
 0x104   : > { %s3448_s14 = scalar_lea.hbm %s4261_s16, 3072  ;;  %p3453_p8 = scmp.lt.u32.totalorder %s4261_s16, %s4956_s2 }
 0x105   : > { %p3449_p2 = scmp.ne.s32.totalorder %s4261_s16, %s3448_s14  ;;  %p3454_p6 = scmp.lt.u32.totalorder %s3452_s15, %s3448_s14 }
 0x106   : > { %p3456_p0 = scmp.lt.u32.totalorder %s3448_s14, %s4261_s16 }
 0x107   : > { %p3450_p13 = pnand %p3449_p2, %p4953_p7  ;;  %p3455_p4 = por %p3454_p6, %p3453_p8 }
 0x109   : > { %p3451_p1 = pneg %p3450_p13  ;;  %p3457_p12 = por %p3456_p0, %p3455_p4 }
 0x10b   : > { %p3458_p9 = pnand %p3457_p12, %p3451_p1 }
 0x10d   : > { %3461 = shalt.err (!%p3458_p9)
}
 0x10e   : > { %s3462_s6 = scalar_lea.vmem %s4263_s1, 3072  ;;  %s3809_s28 = smov [#allocation9]  }
 0x10f   : > { %p3463_p10 = scmp.ne.s32.totalorder %s4263_s1, %s3462_s6  ;;  %s3466_s26 = sshll.u32 %s3809_s28, 4  ;;  %s3467_s26 = int_to_ptr.vmem [resolvable:$false] %s3466_s26 }
 0x110   : > { %s3468_s13 = scalar_lea.vmem %s3467_s26, 6144  ;;  %p3469_p5 = scmp.lt.s32.totalorder %s4263_s1, %s3467_s26 }
 0x111   : > { %p3464_p11 = pnand %p3463_p10, %p4953_p7  ;;  %p3470_p2 = scmp.lt.s32.totalorder %s3468_s13, %s3462_s6 }
 0x113   : > { %p3465_p3 = pneg %p3464_p11  ;;  %p3471_p13 = por %p3470_p2, %p3469_p5 }
 0x115   : > { %p3472_p8 = pnand %p3471_p13, %p3465_p3 }
 0x117   : > { %3475 = shalt.err (!%p3472_p8)
}
 0x118   : > { %s3810_s14 = smov 192   ;;  %s3811_s19 = smov 12  }
 0x119   : > { %s4957_s29 = scalar_lea.sflag [#allocation8], %s4043_s20  ;;  %s2831_s15 = sshll.u32 %s3790_s21, 10 }
 0x11a   : > { %2988 = dma.hbm_to_vmem [thread:$0]  (%p4953_p7), %s4261_s16, 3072, %s4263_s1, %s4957_s29, %s3810_s14, %s3810_s14, %s3811_s19  }
 0x11b   : > { %s553_s24 = scalar_lea.vmem [#allocation12], %s2720_s18  ;;  %s4958_s4 = sld [smem:[#allocation57_spill]] }
 0x11c   : > { %s560_s27 = sshll.u32 %s553_s24, 4  ;;  %s4296_s27 = int_to_ptr.vmem [resolvable:$true] %s560_s27 }
 0x121   : > { %s4294_s26 = scalar_lea.hbm %s4958_s4, %s2831_s15  ;;  %s3480_s18 = scalar_lea.hbm %s4958_s4, 2048 }
 0x122   : > { %s3476_s13 = scalar_lea.hbm %s4294_s26, 1024  ;;  %p3481_p0 = scmp.lt.u32.totalorder %s4294_s26, %s4958_s4 }
 0x123   : > { %p3477_p1 = scmp.ne.s32.totalorder %s4294_s26, %s3476_s13  ;;  %p3482_p12 = scmp.lt.u32.totalorder %s3480_s18, %s3476_s13 }
 0x124   : > { %p3484_p10 = scmp.lt.u32.totalorder %s3476_s13, %s4294_s26 }
 0x125   : > { %p3478_p6 = pnand %p3477_p1, %p4953_p7  ;;  %p3483_p9 = por %p3482_p12, %p3481_p0 }
 0x127   : > { %p3479_p4 = pneg %p3478_p6  ;;  %p3485_p11 = por %p3484_p10, %p3483_p9 }
 0x129   : > { %p3486_p3 = pnand %p3485_p11, %p3479_p4 }
 0x12b   : > { %3489 = shalt.err (!%p3486_p3)
}
 0x12c   : > { %s3490_s29 = scalar_lea.vmem %s4296_s27, 1024  ;;  %s3812_s15 = smov [#allocation12]  }
 0x12d   : > { %p3491_p5 = scmp.ne.s32.totalorder %s4296_s27, %s3490_s29  ;;  %s3494_s24 = sshll.u32 %s3812_s15, 4  ;;  %s3495_s24 = int_to_ptr.vmem [resolvable:$false] %s3494_s24 }
 0x12e   : > { %s3496_s6 = scalar_lea.vmem %s3495_s24, 2048  ;;  %p3497_p8 = scmp.lt.s32.totalorder %s4296_s27, %s3495_s24 }
 0x12f   : > { %p3492_p2 = pnand %p3491_p5, %p4953_p7  ;;  %p3498_p1 = scmp.lt.s32.totalorder %s3496_s6, %s3490_s29 }
 0x131   : > { %p3493_p13 = pneg %p3492_p2  ;;  %p3499_p6 = por %p3498_p1, %p3497_p8 }
 0x133   : > { %p3500_p0 = pnand %p3499_p6, %p3493_p13 }
 0x135   : > { %3503 = shalt.err (!%p3500_p0)
}
 0x136   : > { %s4914_s28 = smov 64   ;;  %s4915_s13 = smov 4  }
 0x137   : > { %s4959_s1 = scalar_lea.sflag [#allocation11], %s4043_s20  ;;  %s4960_s14 = sld [smem:[#allocation58_spill]] }
 0x138   : > { %2990 = dma.hbm_to_vmem [thread:$0]  (%p4953_p7), %s4294_s26, 1024, %s4296_s27, %s4959_s1, %s4914_s28, %s4914_s28, %s4915_s13  }
 0x139   : > { %s590_s29 = scalar_lea.vmem [#allocation15], %s4073_s30  ;;  %s4916_s24 = sshll.u32 %s4073_s30, 7 }
 0x13a   : > { %s597_s15 = sshll.u32 %s590_s29, 4  ;;  %s598_s15 = int_to_ptr.vmem [resolvable:$true] %s597_s15 }
 0x13d   : > { %s4328_s19 = scalar_lea.hbm %s4960_s14, %s4078_s12  ;;  %s3508_s26 = scalar_lea.hbm %s4960_s14, 32 }
 0x13e   : > { %s3504_s6 = scalar_lea.hbm %s4328_s19, 16  ;;  %p3509_p10 = scmp.lt.u32.totalorder %s4328_s19, %s4960_s14 }
 0x13f   : > { %p3505_p4 = scmp.ne.s32.totalorder %s4328_s19, %s3504_s6  ;;  %p3510_p11 = scmp.lt.u32.totalorder %s3508_s26, %s3504_s6 }
 0x140   : > { %p3512_p5 = scmp.lt.u32.totalorder %s3504_s6, %s4328_s19 }
 0x141   : > { %p3506_p12 = pnand %p3505_p4, %p4953_p7  ;;  %p3511_p3 = por %p3510_p11, %p3509_p10 }
 0x143   : > { %p3507_p9 = pneg %p3506_p12  ;;  %p3513_p2 = por %p3512_p5, %p3511_p3 }
 0x145   : > { %p3514_p13 = pnand %p3513_p2, %p3507_p9 }
 0x147   : > { %3517 = shalt.err (!%p3514_p13)
}
 0x148   : > { %s3518_s18 = scalar_lea.vmem %s598_s15, 16  ;;  %s3815_s29 = smov [#allocation15]  }
 0x149   : > { %p3519_p8 = scmp.ne.s32.totalorder %s598_s15, %s3518_s18  ;;  %s3522_s28 = sshll.u32 %s3815_s29, 4  ;;  %s3523_s28 = int_to_ptr.vmem [resolvable:$false] %s3522_s28 }
 0x14a   : > { %s3524_s10 = scalar_lea.vmem %s3523_s28, 32  ;;  %p3525_p0 = scmp.lt.s32.totalorder %s598_s15, %s3523_s28 }
 0x14b   : > { %p3520_p1 = pnand %p3519_p8, %p4953_p7  ;;  %p3526_p4 = scmp.lt.s32.totalorder %s3524_s10, %s3518_s18 }
 0x14d   : > { %p3521_p6 = pneg %p3520_p1  ;;  %p3527_p12 = por %p3526_p4, %p3525_p0 }
 0x14f   : > { %p3528_p10 = pnand %p3527_p12, %p3521_p6 }
 0x151   : > { %3531 = shalt.err (!%p3528_p10)
}
 0x152   : > { %s4961_s6 = scalar_lea.sflag [#allocation14], %s4043_s20  ;;  %s2832_s27 = sshll.u32 %s3790_s21, 11 }
 0x153   : > { %2992 = dma.hbm_to_vmem [thread:$0]  (%p4953_p7), %s4328_s19, 16, %s598_s15, %s4961_s6  }
 0x154   : > { %s625_s26 = scalar_lea.vmem [#allocation18], %s4916_s24  ;;  %s4962_s18 = sld [smem:[#allocation59_spill]] }
 0x155   : > { %s632_s1 = sshll.u32 %s625_s26, 4  ;;  %s4361_s1 = int_to_ptr.vmem [resolvable:$true] %s632_s1 }
 0x15a   : > { %s4963_s10 = smov %s4962_s18  ;;  %s4359_s29 = scalar_lea.hbm %s4962_s18, %s2832_s27 }
 0x15b   : > { %s3532_s13 = scalar_lea.hbm %s4359_s29, 2048  ;;  %s3536_s6 = scalar_lea.hbm %s4963_s10, 4096 }
 0x15c   : > { %p3533_p9 = scmp.ne.s32.totalorder %s4359_s29, %s3532_s13  ;;  %p3537_p5 = scmp.lt.u32.totalorder %s4359_s29, %s4963_s10 }
 0x15d   : > { %p3538_p2 = scmp.lt.u32.totalorder %s3536_s6, %s3532_s13  ;;  %p3540_p8 = scmp.lt.u32.totalorder %s3532_s13, %s4359_s29 }
 0x15e   : > { %p3534_p11 = pnand %p3533_p9, %p4953_p7 }
 0x15f   : > { %p3539_p13 = por %p3538_p2, %p3537_p5 }
 0x160   : > { %p3535_p3 = pneg %p3534_p11 }
 0x161   : > { %p3541_p1 = por %p3540_p8, %p3539_p13 }
 0x163   : > { %p3542_p6 = pnand %p3541_p1, %p3535_p3 }
 0x165   : > { %3545 = shalt.err (!%p3542_p6)
}
 0x166   : > { %s3546_s28 = scalar_lea.vmem %s4361_s1, 2048  ;;  %s3816_s16 = smov [#allocation18]  }
 0x167   : > { %p3547_p0 = scmp.ne.s32.totalorder %s4361_s1, %s3546_s28  ;;  %s3550_s18 = sshll.u32 %s3816_s16, 4  ;;  %s3551_s18 = int_to_ptr.vmem [resolvable:$false] %s3550_s18 }
 0x168   : > { %s3552_s24 = scalar_lea.vmem %s3551_s18, 4096  ;;  %p3553_p10 = scmp.lt.s32.totalorder %s4361_s1, %s3551_s18 }
 0x169   : > { %p3548_p4 = pnand %p3547_p0, %p4953_p7  ;;  %p3554_p9 = scmp.lt.s32.totalorder %s3552_s24, %s3546_s28 }
 0x16b   : > { %p3549_p12 = pneg %p3548_p4  ;;  %p3555_p11 = por %p3554_p9, %p3553_p10 }
 0x16d   : > { %p3556_p5 = pnand %p3555_p11, %p3549_p12 }
 0x16f   : > { %3559 = shalt.err (!%p3556_p5)
}
 0x170   : > { %s4964_s13 = smov 128   ;;  %s4965_s19 = scalar_lea.sflag [#allocation17], %s4043_s20 }
 0x171   : > { %2994 = dma.hbm_to_vmem [thread:$0]  (%p4953_p7), %s4359_s29, 2048, %s4361_s1, %s4965_s19, %s4964_s13, %s4964_s13, %s3808_s25  }
 0x172   : > { %s4966_s26 = sld [smem:[#allocation60_spill]]  ;;  %s4967_s16 = sshll.u32 %s4073_s30, 7 }
 0x173   : > { %s665_s18 = scalar_lea.vmem [#allocation21], %s4967_s16  ;;  %s4968_s3 = sld [smem:[#allocation61_spill]] }
 0x174   : > { %s672_s24 = sshll.u32 %s665_s18, 4  ;;  %s4398_s24 = int_to_ptr.vmem [resolvable:$true] %s672_s24 }
 0x178   : > { %s4394_s28 = scalar_lea.hbm %s4966_s26, %s2832_s27  ;;  %s3564_s29 = scalar_lea.hbm %s4966_s26, 4096 }
 0x179   : > { %s4404_s4 = scalar_lea.hbm %s4968_s3, %s4078_s12  ;;  %s3560_s25 = scalar_lea.hbm %s4394_s28, 2048 }
 0x17a   : > { %p3561_p3 = scmp.ne.s32.totalorder %s4394_s28, %s3560_s25  ;;  %p3565_p8 = scmp.lt.u32.totalorder %s4394_s28, %s4966_s26 }
 0x17b   : > { %p3566_p1 = scmp.lt.u32.totalorder %s3564_s29, %s3560_s25  ;;  %p3568_p0 = scmp.lt.u32.totalorder %s3560_s25, %s4394_s28 }
 0x17c   : > { %p3562_p2 = pnand %p3561_p3, %p4953_p7 }
 0x17d   : > { %p3567_p6 = por %p3566_p1, %p3565_p8 }
 0x17e   : > { %p3563_p13 = pneg %p3562_p2 }
 0x17f   : > { %p3569_p4 = por %p3568_p0, %p3567_p6 }
 0x181   : > { %p3570_p12 = pnand %p3569_p4, %p3563_p13 }
 0x183   : > { %3573 = shalt.err (!%p3570_p12)
}
 0x184   : > { %s3574_s0 = scalar_lea.vmem %s4398_s24, 2048  ;;  %s3817_s2 = smov [#allocation21]  }
 0x185   : > { %p3575_p10 = scmp.ne.s32.totalorder %s4398_s24, %s3574_s0  ;;  %s3578_s15 = sshll.u32 %s3817_s2, 4  ;;  %s3579_s15 = int_to_ptr.vmem [resolvable:$false] %s3578_s15 }
 0x186   : > { %s3580_s6 = scalar_lea.vmem %s3579_s15, 4096  ;;  %p3581_p5 = scmp.lt.s32.totalorder %s4398_s24, %s3579_s15 }
 0x187   : > { %p3576_p9 = pnand %p3575_p10, %p4953_p7  ;;  %p3582_p3 = scmp.lt.s32.totalorder %s3580_s6, %s3574_s0 }
 0x189   : > { %p3577_p11 = pneg %p3576_p9  ;;  %p3583_p2 = por %p3582_p3, %p3581_p5 }
 0x18b   : > { %p3584_p8 = pnand %p3583_p2, %p3577_p11 }
 0x18d   : > { %3587 = shalt.err (!%p3584_p8)
}
 0x18e   : > { %s4969_s16 = smov 4   ;;  %s4970_s18 = smov 64  }
 0x18f   : > { %s4971_s25 = scalar_lea.sflag [#allocation20], %s4043_s20  ;;  %s702_s27 = scalar_lea.vmem [#allocation24], %s4073_s30 }
 0x190   : > { %2996 = dma.hbm_to_vmem [thread:$0]  (%p4953_p7), %s4394_s28, 2048, %s4398_s24, %s4971_s25, %s4970_s18, %s4970_s18, %s4969_s16  }
 0x191   : > { %s709_s1 = sshll.u32 %s702_s27, 4  ;;  %s3588_s29 = scalar_lea.hbm %s4404_s4, 16  ;;  %s710_s1 = int_to_ptr.vmem [resolvable:$true] %s709_s1 }
 0x192   : > { %p3589_p13 = scmp.ne.s32.totalorder %s4404_s4, %s3588_s29  ;;  %s3592_s0 = scalar_lea.hbm %s4968_s3, 32 }
 0x193   : > { %p3593_p0 = scmp.lt.u32.totalorder %s4404_s4, %s4968_s3  ;;  %p3594_p4 = scmp.lt.u32.totalorder %s3592_s0, %s3588_s29 }
 0x194   : > { %p3590_p1 = pnand %p3589_p13, %p4953_p7  ;;  %p3596_p10 = scmp.lt.u32.totalorder %s3588_s29, %s4404_s4 }
 0x195   : > { %p3595_p12 = por %p3594_p4, %p3593_p0 }
 0x196   : > { %p3591_p6 = pneg %p3590_p1 }
 0x197   : > { %p3597_p9 = por %p3596_p10, %p3595_p12 }
 0x199   : > { %p3598_p11 = pnand %p3597_p9, %p3591_p6 }
 0x19b   : > { %3601 = shalt.err (!%p3598_p11)
}
 0x19c   : > { %s3602_s28 = scalar_lea.vmem %s710_s1, 16  ;;  %s3818_s24 = smov [#allocation24]  }
 0x19d   : > { %p3603_p5 = scmp.ne.s32.totalorder %s710_s1, %s3602_s28  ;;  %s3606_s6 = sshll.u32 %s3818_s24, 4  ;;  %s3607_s6 = int_to_ptr.vmem [resolvable:$false] %s3606_s6 }
 0x19e   : > { %s3608_s16 = scalar_lea.vmem %s3607_s6, 32  ;;  %p3609_p8 = scmp.lt.s32.totalorder %s710_s1, %s3607_s6 }
 0x19f   : > { %p3604_p3 = pnand %p3603_p5, %p4953_p7  ;;  %p3610_p13 = scmp.lt.s32.totalorder %s3608_s16, %s3602_s28 }
 0x1a1   : > { %p3605_p2 = pneg %p3604_p3  ;;  %p3611_p1 = por %p3610_p13, %p3609_p8 }
 0x1a3   : > { %p3612_p0 = pnand %p3611_p1, %p3605_p2 }
 0x1a5   : > { %3615 = shalt.err (!%p3612_p0)
}
 0x1a6   : > { %s4972_s18 = scalar_lea.sflag [#allocation23], %s4043_s20  ;;  %s4973_s29 = sld [smem:[#allocation62_spill]] }
 0x1a7   : > { %2998 = dma.hbm_to_vmem [thread:$0]  (%p4953_p7), %s4404_s4, 16, %s710_s1, %s4972_s18  }
 0x1a8   : > { %s719_s0 = scalar_lea.vmem [#allocation25], %s4073_s30  ;;  %s717_s15 = scalar_lea.sflag [#allocation26], %s4073_s30 }
 0x1a9   : > { %s726_s2 = sshll.u32 %s719_s0, 4  ;;  %s727_s2 = int_to_ptr.vmem [resolvable:$true] %s726_s2 }
 0x1ac   : > { %s4974_s13 = smov %s4973_s29  ;;  %s4456_s19 = scalar_lea.hbm %s4973_s29, %s4078_s12 }
 0x1ad   : > { %s3616_s20 = scalar_lea.hbm %s4456_s19, 16  ;;  %s3620_s1 = scalar_lea.hbm %s4974_s13, 32 }
 0x1ae   : > { %p3617_p6 = scmp.ne.s32.totalorder %s4456_s19, %s3616_s20  ;;  %p3621_p10 = scmp.lt.u32.totalorder %s4456_s19, %s4974_s13 }
 0x1af   : > { %p3622_p9 = scmp.lt.u32.totalorder %s3620_s1, %s3616_s20  ;;  %p3624_p5 = scmp.lt.u32.totalorder %s3616_s20, %s4456_s19 }
 0x1b0   : > { %p3618_p4 = pnand %p3617_p6, %p4953_p7 }
 0x1b1   : > { %p3623_p11 = por %p3622_p9, %p3621_p10 }
 0x1b2   : > { %p3619_p12 = pneg %p3618_p4 }
 0x1b3   : > { %p3625_p3 = por %p3624_p5, %p3623_p11 }
 0x1b5   : > { %p3626_p2 = pnand %p3625_p3, %p3619_p12 }
 0x1b7   : > { %3629 = shalt.err (!%p3626_p2)
}
 0x1b8   : > { %s3630_s30 = scalar_lea.vmem %s727_s2, 16  ;;  %s3819_s6 = smov [#allocation25]  }
 0x1b9   : > { %p3631_p8 = scmp.ne.s32.totalorder %s727_s2, %s3630_s30  ;;  %s3634_s16 = sshll.u32 %s3819_s6, 4  ;;  %s3635_s16 = int_to_ptr.vmem [resolvable:$false] %s3634_s16 }
 0x1ba   : > { %s3636_s18 = scalar_lea.vmem %s3635_s16, 32  ;;  %p3637_p0 = scmp.lt.s32.totalorder %s727_s2, %s3635_s16 }
 0x1bb   : > { %p3632_p13 = pnand %p3631_p8, %p4953_p7  ;;  %p3638_p6 = scmp.lt.s32.totalorder %s3636_s18, %s3630_s30 }
 0x1bd   : > { %p3633_p1 = pneg %p3632_p13  ;;  %p3639_p4 = por %p3638_p6, %p3637_p0 }
 0x1bf   : > { %p3640_p9 = pnand %p3639_p4, %p3633_p1 }
 0x1c1   : > { %3643 = shalt.err (!%p3640_p9)
}
 0x1c2   : > { %2999 = dma.hbm_to_vmem [thread:$0]  (%p4953_p7), %s4456_s19, 16, %s727_s2, %s717_s15  }
 0x1c3 PF: > { %p2738_p12 = scmp.ge.s32.totalorder %s3798_s23, 1  ;;  %p731_p10 = scmp.lt.s32.totalorder %s3798_s23, 5 }
 0x1c5   : > { %p732_p11 = pnand %p2738_p12, %p731_p10 }
 0x1c6   : > { %s4975_s25 = sld [smem:[#allocation47_spill]] (!%p732_p11)  ;;  %s4480_s27 = sand.u32 (!%p732_p11), 1, %s3774_s17  }
 0x1c7   : > { %735 = sbr.rel (%p732_p11) target bundleno = 3565 (0xded), region = 76  ;;  %s4917_s29 = sshll.u32 (!%p732_p11), %s4480_s27, 4 }
 0x1c8   : > { %s738_s0 = scalar_lea.sflag (!%p732_p11), [#allocation5], %s4480_s27  ;;  %s4486_s8 = scalar_lea.vmem (!%p732_p11), [#allocation4], %s4917_s29 }
 0x1cc   : > { %p4976_p7 = scmp.ne.s32.totalorder (!%p732_p11), %s4975_s25, 0 }
 0x1ce   : > { %3717 = dma.done.wait (%p4976_p7), %s738_s0, 256  }
 0x1cf   : > { %3719 = vsyncadd (%p4976_p7), %s738_s0, 4294967040  ;;  %s4977_s19 = sld [smem:[#allocation44_spill]] }
 0x1d5   : > { %s4493_s2 = sand.u32 1, %s4977_s19  }
 0x1d6   : > { %s747_s15 = scalar_lea.sflag [#allocation8], %s4493_s2 }
 0x1d7   : > { %3721 = dma.done.wait (%p4976_p7), %s747_s15, 16  }
 0x1d8   : > { %3723 = vsyncadd (%p4976_p7), %s747_s15, 4294967280  ;;  %s4978_s28 = sld [smem:[#allocation38_spill]]  ;;  %s4979_s4 = sld [smem:[#allocation50_spill]] }
 0x1de   : > { %s4502_s1 = sand.u32 1, %s4978_s28   ;;  %p4980_p5 = scmp.ne.s32.totalorder %s4979_s4, 0 }
 0x1df   : > { %s2984_s24 = smul.u32 192, %s4502_s1 }
 0x1e1   : > { %s4505_s12 = scalar_lea.vmem [#allocation9], %s2984_s24 }
 0x1e2   : > { %3725 = dma.done.wait (%p4980_p5), %s747_s15, 3072  }
 0x1e3   : > { %3727 = vsyncadd (%p4980_p5), %s747_s15, 4294964224  ;;  %s2985_s30 = smul.u32 3, %s4502_s1  ;;  %s764_s6 = scalar_lea.sflag [#allocation11], %s4493_s2 }
 0x1e5   : > { %s4513_s16 = scalar_lea.vmem [#allocation10], %s2985_s30 }
 0x1e6   : > { %3729 = dma.done.wait (%p4980_p5), %s764_s6, 1072  }
 0x1e7   : > { %3731 = vsyncadd (%p4980_p5), %s764_s6, 4294966224  ;;  %s2740_s18 = sshll.u32 %s4502_s1, 6  ;;  %s782_s0 = scalar_lea.sflag [#allocation14], %s4493_s2 }
 0x1e8   : > { %s4520_s25 = scalar_lea.vmem [#allocation12], %s2740_s18 }
 0x1e9   : > { %3733 = dma.done.wait (%p4980_p5), %s782_s0, 32  }
 0x1ea   : > { %3735 = vsyncadd (%p4980_p5), %s782_s0, 4294967264  ;;  %s798_s28 = scalar_lea.sflag [#allocation17], %s4493_s2 }
 0x1eb   : > { %3737 = dma.done.wait (%p4980_p5), %s798_s28, 2064  }
 0x1ec   : > { %3739 = vsyncadd (%p4980_p5), %s798_s28, 4294965232  ;;  %s2741_s30 = sshll.u32 %s4502_s1, 7  ;;  %s2742_s6 = sshll.u32 %s4502_s1, 1 }
 0x1ed   : > { %s4537_s18 = scalar_lea.vmem [#allocation18], %s2741_s30  ;;  %s815_s0 = scalar_lea.sflag [#allocation20], %s4493_s2 }
 0x1ee   : > { %s4540_s19 = scalar_lea.vmem [#allocation19], %s2742_s6 }
 0x1ef   : > { %3741 = dma.done.wait (%p4980_p5), %s815_s0, 2080  }
 0x1f0   : > { %3743 = vsyncadd (%p4980_p5), %s815_s0, 4294965216  ;;  %s4546_s28 = scalar_lea.vmem [#allocation21], %s2741_s30  ;;  %s833_s24 = scalar_lea.sflag [#allocation23], %s4493_s2 }
 0x1f1   : > { %s835_s15 = scalar_lea.vmem [#allocation22], %s4502_s1 }
 0x1f2   : > { %3745 = dma.done.wait (%p4980_p5), %s833_s24, 32  }
 0x1f3   : > { %3747 = vsyncadd (%p4980_p5), %s833_s24, 4294967264  ;;  %s843_s6 = scalar_lea.vmem [#allocation24], %s4502_s1  ;;  %s849_s20 = scalar_lea.sflag [#allocation26], %s4502_s1 }
 0x1f4   : > { %s851_s29 = scalar_lea.vmem [#allocation25], %s4502_s1 }
 0x1f5   : > { %3749 = dma.done.wait (%p4980_p5), %s849_s20, 16  }
 0x1f6   : > { %3751 = vsyncadd (%p4980_p5), %s849_s20, 4294967280  ;;  %s4981_s2 = sshll.u32 %s4480_s27, 4  ;;  %s4982_s0 = sld [smem:[#allocation42_spill]] }
 0x1f7   : > { %s4563_s30 = scalar_lea.vmem [#allocation27], %s4981_s2 }
 0x1fc   : > { %p2745_p3 = scmp.ne.s32.totalorder %s4982_s0, 0 }
 0x1fd   : > { %v959_v0 = vld [vmem:[%s4486_s8] sm:$0xff] (!%p2745_p3)  ;;  %v960_v1 = vld [vmem:[%s4486_s8 + $0x8] sm:$0x3] (!%p2745_p3) }
 0x1fe   : > { %958 = sbr.rel (%p2745_p3) target bundleno = 517 (0x205), region = 136  ;;  %961 = vst [vmem:[#allocation2] sm:$0xff] (!%p2745_p3), %v959_v0  ;;  %962 = vst [vmem:[#allocation2 + $0x8] sm:$0x3] (!%p2745_p3), %v960_v1 }
 0x205 PF: > { %v3124_v2 = vld [vmem:[%s4505_s12 + $0x4] ss:$12 sps:$4 sm:$0xff]   ;;  %v3126_v3 = vld [vmem:[%s4505_s12] ss:$12 sps:$4 sm:$0xff]   ;;  %v3820_v4 = vmov 0   ;;  %v3821_v5 = vmov 0.0   ;;  %v1003_v31 = vlaneseq }
 0x206   : > { %1178 = vmatprep.mubr.bf16.mxu0 %v3820_v4  ;;  %2892 = vmatprep.subr.bf16.mxu1 %v3821_v5  ;;  %v3127_v6 = vld [vmem:[%s4505_s12 + $0x1c] ss:$12 sps:$4 sm:$0xff]   ;;  %v3129_v7 = vld [vmem:[%s4505_s12 + $0x18] ss:$12 sps:$4 sm:$0xff]   ;;  %v3130_v8 = vld [vmem:[%s4505_s12 + $0x34] ss:$12 sps:$4 sm:$0xff]  }
 0x207   : > { %1146 = vmatprep.subr.bf16.mxu0 %v3124_v2  ;;  %v3132_v9 = vld [vmem:[%s4505_s12 + $0x30] ss:$12 sps:$4 sm:$0xff]   ;;  %v3133_v10 = vld [vmem:[%s4505_s12 + $0x4c] ss:$12 sps:$4 sm:$0xff]   ;;  %v3135_v11 = vld [vmem:[%s4505_s12 + $0x48] ss:$12 sps:$4 sm:$0xff]  }
 0x208   : > { %1147 = vmatpush1.bf16.msra.mxu0 %v3126_v3  ;;  %v3136_v12 = vld [vmem:[%s4505_s12 + $0x64] ss:$12 sps:$4 sm:$0xff]   ;;  %v3148_v13 = vld [vmem:[%s4505_s12 + $0x8] ss:$12 sps:$4 sm:$0xff]   ;;  %v3149_v14 = vld [vmem:[%s4505_s12 + $0x20] ss:$12 sps:$4 sm:$0xff]  }
 0x209   : > { %1148 = vmatprep.subr.bf16.mxu0 %v3127_v6  ;;  %2893 = vmatpush3.bf16.msra.mxu1 %v3148_v13  ;;  %v3138_v15 = vld [vmem:[%s4505_s12 + $0x60] ss:$12 sps:$4 sm:$0xff]   ;;  %v3139_v16 = vld [vmem:[%s4505_s12 + $0x7c] ss:$12 sps:$4 sm:$0xff]   ;;  %v3141_v17 = vld [vmem:[%s4505_s12 + $0x78] ss:$12 sps:$4 sm:$0xff]  }
 0x20a   : > { %2894 = vmatprep.subr.bf16.mxu1 %v3821_v5  ;;  %v3142_v18 = vld [vmem:[%s4505_s12 + $0x94] ss:$12 sps:$4 sm:$0xff]   ;;  %v3150_v19 = vld [vmem:[%s4505_s12 + $0x38] ss:$12 sps:$4 sm:$0xff]   ;;  %v3151_v20 = vld [vmem:[%s4505_s12 + $0x50] ss:$12 sps:$4 sm:$0xff]  }
 0x20b   : > { %v3144_v21 = vld [vmem:[%s4505_s12 + $0x90] ss:$12 sps:$4 sm:$0xff]   ;;  %v3145_v22 = vld [vmem:[%s4505_s12 + $0xac] ss:$12 sps:$4 sm:$0xff]   ;;  %v3152_v23 = vld [vmem:[%s4505_s12 + $0x68] ss:$12 sps:$4 sm:$0xff]  }
 0x20c   : > { %1149 = vmatpush1.bf16.msra.mxu0 %v3129_v7  ;;  %v3147_v24 = vld [vmem:[%s4505_s12 + $0xa8] ss:$12 sps:$4 sm:$0xff]   ;;  %v4594_v25 = vld [vmem:[#allocation2] sm:$0xff]  ;;  %v4596_v26 = vld [vmem:[#allocation2 + $0x8] sm:$0x3]  ;;  %vm3822_vm0 = vmmov 0  }
 0x20d   : > { %1150 = vmatprep.subr.bf16.mxu0 %v3130_v8  ;;  %2895 = vmatpush3.bf16.msra.mxu1 %v3149_v14  ;;  %v3153_v27 = vld [vmem:[%s4505_s12 + $0x80] ss:$12 sps:$4 sm:$0xff]   ;;  %v1001_v28 = vpack.c.bf16 %v4596_v26, %v4594_v25  ;;  %v3154_v29 = vld [vmem:[%s4505_s12 + $0x98] ss:$12 sps:$4 sm:$0xff]   ;;  %v3155_v30 = vld [vmem:[%s4505_s12 + $0xb0] ss:$12 sps:$4 sm:$0xff]  }
 0x20e   : > { %2896 = vmatprep.subr.bf16.mxu1 %v3821_v5  ;;  %2908 = vmatprep.mubr.msk.bf16.mxu1 %vm3822_vm0, %v3821_v5  ;;  %v4615_v32 = vshrl.u32 %v1003_v31, 7  ;;  %v1000_v34 = vld [vmem:[%s4513_s16] sm:$0x7]  ;;  %vm1241_vm1 = vcmask 261120   ;;  %vm1317_vm2 = vcmask 1044480   ;;  %s4983_s8 = scalar_lea.vmem [#allocation7], %s4480_s27 }
 0x20f   : > { %v965_v61 = vld [vmem:[%s4983_s8] sm:$0x1]  ;;  %v3823_v62 = vmov -1e+09   ;;  %vm1289_vm4 = vcmask 80896   ;;  %vm1293_vm5 = vcmask 74752  }
 0x210   : > { %1151 = vmatpush1.bf16.msra.mxu0 %v3132_v9  ;;  %v4618_v33 = vsub.s32 0, %v4615_v32  ;;  %v1009_v35 = vsub.s32 1, %v4615_v32  ;;  %v1013_v51 = vsub.s32 2, %v4615_v32  ;;  %vm966_vm3 = vcmp.gt.f32.partialorder %v965_v61, 0.0  ;;  %s3824_s20 = smov 96   ;;  %s3825_s4 = smov 32  }
 0x211   : > { %1152 = vmatprep.subr.bf16.mxu0 %v3133_v10  ;;  %2897 = vmatpush3.bf16.msra.mxu1 %v3150_v19  ;;  %v967_v63 = vsel %vm966_vm3, 0.0, %v3823_v62  ;;  %s3826_s12 = smov 64   ;;  %vm1363_vm6 = vcmask 254976   ;;  %vm1499_vm7 = vcmask 523520   ;;  %vm1501_vm8 = vcmask 517376   ;;  %s4984_s16 = scalar_lea.vmem [#allocation13], %s4502_s1 }
 0x212   : > { %2898 = vmatprep.subr.bf16.mxu1 %v3821_v5  ;;  %v1006_v36 = vrot.slane %v1000_v34, %v4618_v33  ;;  %v1010_v38 = vrot.slane %v1000_v34, %v1009_v35  ;;  %v1014_v52 = vrot.slane %v1000_v34, %v1013_v51  ;;  %v4639_v0 = vrot.slane %v967_v63, %v4618_v33  ;;  %s4986_s24 = scalar_lea.vmem [#allocation16], %s4502_s1 }
 0x213   : > { %vm1634_vm9 = vcmask 785920   ;;  %vm1636_vm10 = vcmask 779776   ;;  %vm1769_vm11 = vcmask 1048320   ;;  %vm1771_vm12 = vcmask 1042176  }
 0x214   : > { %1153 = vmatpush1.bf16.msra.mxu0 %v3135_v11  ;;  %vm1894_vm13 = vcmask 1041408  }
 0x215   : > { %1154 = vmatprep.subr.bf16.mxu0 %v3136_v12  ;;  %2899 = vmatpush3.bf16.msra.mxu1 %v3151_v20 }
 0x216   : > { %2900 = vmatprep.subr.bf16.mxu1 %v3821_v5 }
 0x218   : > { %1155 = vmatpush1.bf16.msra.mxu0 %v3138_v15 }
 0x219   : > { %1156 = vmatprep.subr.bf16.mxu0 %v3139_v16  ;;  %2901 = vmatpush3.bf16.msra.mxu1 %v3152_v23 }
 0x21a   : > { %2902 = vmatprep.subr.bf16.mxu1 %v3821_v5 }
 0x21c   : > { %1157 = vmatpush1.bf16.msra.mxu0 %v3141_v17 }
 0x21d   : > { %1158 = vmatprep.subr.bf16.mxu0 %v3142_v18  ;;  %2903 = vmatpush3.bf16.msra.mxu1 %v3153_v27 }
 0x21e   : > { %2904 = vmatprep.subr.bf16.mxu1 %v3821_v5 }
 0x220   : > { %1159 = vmatpush1.bf16.msra.mxu0 %v3144_v21 }
 0x221   : > { %1160 = vmatprep.subr.bf16.mxu0 %v3145_v22  ;;  %2905 = vmatpush3.bf16.msra.mxu1 %v3154_v29 }
 0x222   : > { %2906 = vmatprep.subr.bf16.mxu1 %v3821_v5 }
 0x224   : > { %1161 = vmatpush1.bf16.msra.mxu0 %v3147_v24 }
 0x225   : > { %2936 = vmatprep.subr.bf16.mxu0 %v3821_v5  ;;  %2907 = vmatpush3.bf16.msra.mxu1 %v3155_v30 }
 0x226   : > { %2912 = vmatprep.subr.bf16.mxu1 %v3821_v5 }
 0x227   : > { %1179 = vmatmul.mubr.bf16.vlgmr.msra.gmra.mrb[0].mxu0 %v1001_v28 }
 0x228   : > { %2938 = vmatprep.mubr.msk.bf16.mxu0 %vm3822_vm0, %v3821_v5  ;;  %2909 = vmatmul.mubr.bf16.vlgmr.msra.gmra.mrb[0].mxu1 %v1001_v28 }
 0x229   : > { %2914 = vmatprep.mubr.msk.bf16.mxu1 %vm3822_vm0, %v3821_v5 }
 0x2fa   : > { %v1180_v37 = vpop.f32.mrb[0].mxu0 }
 0x2fb   : > { %v1181_v39 = vadd.f32 %v1180_v37, %v1006_v36  ;;  %v1182_v40 = vpop.f32.mrb[1].mxu0  ;;  %v1223_v53 = vpop.f32.mrb[0].mxu1 }
 0x2fc   : > { %v1184_v41 = vpop.f32.mrb[2].mxu0  ;;  %v1183_v44 = vadd.f32 %v1182_v40, %v1010_v38  ;;  %v1224_v54 = vadd.f32 %v1223_v53, %v1014_v52  ;;  %v2910_v55 = vpop.f32.mrb[1].mxu1 }
 0x2fd   : > { %v1185_v42 = vadd.f32 %v1184_v41, %v1006_v36  ;;  %v1186_v43 = vpop.f32.mrb[3].mxu0  ;;  %v1230_v46 = vmul.f32 0.17677669, %v1181_v39  ;;  %v1226_v56 = vpop.f32.mrb[2].mxu1 }
 0x2fe   : > { %v1187_v45 = vadd.f32 %v1186_v43, %v1010_v38  ;;  %v1227_v57 = vadd.f32 %v1226_v56, %v1014_v52  ;;  %v2911_v58 = vpop.f32.mrb[3].mxu1 }
 0x2ff   : > { %v1231_v47 = vmul.f32 0.17677669, %v1185_v42 }
 0x300   : > { %v1233_v48 = vpack.c.bf16 %v1187_v45, %v1183_v44  ;;  %v4631_v59 = vpack.c.bf16 %v1227_v57, %v1224_v54 }
 0x301   : > { %v1232_v49 = vpack.c.bf16 %v1231_v47, %v1230_v46 }
 0x302   : > { %v1246_v50 = vsel %vm1241_vm1, %v1233_v48, 0  ;;  %v1319_v60 = vsel %vm1317_vm2, %v4631_v59, 0 }
 0x303   : > { %2913 = vmatpush3.bf16.xpose.msra.mxu1 %v1246_v50 }
 0x304   : > { %2918 = vmatprep.subr.bf16.mxu1 %v3821_v5 }
 0x30a   : > { %2915 = vmatmul.mubr.msk.bf16.vlgmr.msra.gmra.mrb[4].mxu1 %vm1241_vm1, %v1232_v49 }
 0x30b   : > { %2920 = vmatprep.mubr.msk.bf16.mxu1 %vm3822_vm0, %v3821_v5  ;;  %2919 = vmatpush3.bf16.msra.mxu1 %v1319_v60 }
 0x30c   : > { %2924 = vmatprep.subr.bf16.mxu1 %v3821_v5 }
 0x3dd   : > { %v1282_v1 = vpop.f32.mrb[4].mxu1 }
 0x3de   : > { %v1283_v2 = vadd.f32 %v1282_v1, %v4639_v0  ;;  %v2916_v3 = vpop.f32.mrb[5].mxu1 }
 0x3df   : > { %v1285_v6 = vpop.f32.mrb[6].mxu1 }
 0x3e0   : > { %v1286_v7 = vadd.f32 %v1285_v6, %v4639_v0  ;;  %v2917_v8 = vpop.f32.mrb[7].mxu1  ;;  %v1290_v9 = vsel %vm1289_vm4, %v1283_v2, -inf }
 0x3e1   : > { %1291 = vmax.xlane.f32.xlu0 %v1290_v9 }
 0x3e2   : > { %v1294_v10 = vsel %vm1293_vm5, %v1286_v7, -inf }
 0x3e5   : > { %1295 = vmax.xlane.f32.xlu0 %v1294_v10 }
 0x3fb   : > { %1369 = vrot.lane.b32.xlu0 %v1233_v48, %s3824_s20 }
 0x3ff   : > { %1640 = vrot.lane.b32.xlu0 %v1233_v48, %s3825_s4 }
 0x46e   : > { %v1292_v11 = vpop.xlane.xlu0 %1291 }
 0x46f   : > { %v1297_v12 = vsub.f32 %v1283_v2, %v1292_v11 }
 0x471   : > { %v1299_v13 = vmul.f32 1.442695, %v1297_v12 }
 0x472   : > { %v1296_v14 = vpop.xlane.xlu0 %1295 }
 0x473   : > { %3204 = vpow2.f32 %v1299_v13  ;;  %v1298_v15 = vsub.f32 %v1286_v7, %v1296_v14 }
 0x475   : > { %v1301_v16 = vmul.f32 1.442695, %v1298_v15 }
 0x476   : > { %v1370_v24 = vpop.permute.xlu0 %1369 }
 0x477   : > { %3206 = vpow2.f32 %v1301_v16  ;;  %v1375_v38 = vsel %vm1241_vm1, %v1370_v24, 0 }
 0x47a   : > { %v1641_v36 = vpop.permute.xlu0 %1640 }
 0x47b   : > { %v1646_v40 = vsel %vm1241_vm1, %v1641_v36, 0 }
 0x47d   : > { %v3205_v17 = vpop.eup %3204 }
 0x47e   : > { %v1303_v18 = vsel %vm1289_vm4, %v3205_v17, 0.0 }
 0x47f   : > { %1304 = vadd.xlane.f32.xlu1 %v1303_v18 }
 0x481   : > { %v3207_v19 = vpop.eup %3206 }
 0x482   : > { %v1306_v20 = vsel %vm1293_vm5, %v3207_v19, 0.0 }
 0x483   : > { %1307 = vadd.xlane.f32.xlu1 %v1306_v20 }
 0x494   : > { %1366 = vrot.lane.b32.xlu1 %v1232_v49, %s3824_s20 }
 0x498   : > { %1505 = vrot.lane.b32.xlu1 %v1233_v48, %s3826_s12 }
 0x49c   : > { %1503 = vrot.lane.b32.xlu1 %v1232_v49, %s3826_s12 }
 0x4a0   : > { %1638 = vrot.lane.b32.xlu1 %v1232_v49, %s3825_s4 }
 0x50c   : > { %v1305_v21 = vpop.xlane.xlu1 %1304 }
 0x50d   : > { %3208 = vrcp.f32 %v1305_v21 }
 0x510   : > { %v1308_v22 = vpop.xlane.xlu1 %1307 }
 0x511   : > { %3210 = vrcp.f32 %v1308_v22 }
 0x514   : > { %v1367_v23 = vpop.permute.xlu1 %1366 }
 0x517   : > { %v3209_v28 = vpop.eup %3208 }
 0x518   : > { %v1506_v27 = vpop.permute.xlu1 %1505  ;;  %v1310_v31 = vmul.f32 %v3209_v28, %v3205_v17 }
 0x519   : > { %v1511_v29 = vsel %vm1241_vm1, %v1506_v27, 0 }
 0x51a   : > { %2937 = vmatpush3.bf16.xpose.msra.mxu0 %v1511_v29 }
 0x51b   : > { %v3211_v30 = vpop.eup %3210  ;;  %2948 = vmatprep.subr.bf16.mxu0 %v3821_v5 }
 0x51c   : > { %v1312_v34 = vmul.f32 %v3211_v30, %v3207_v19  ;;  %v1504_v39 = vpop.permute.xlu1 %1503 }
 0x51e   : > { %v1313_v37 = vpack.c.bf16 %v1312_v34, %v1310_v31 }
 0x520   : > { %2921 = vmatmul.mubr.msk.bf16.vlgmr.msra.gmra.mrb[8].mxu1 %vm1289_vm4, %v1313_v37  ;;  %v1639_v41 = vpop.permute.xlu1 %1638 }
 0x521   : > { %2925 = vmatpush3.bf16.xpose.msra.mxu1 %v1375_v38  ;;  %2939 = vmatmul.mubr.msk.bf16.vlgmr.msra.gmra.mrb[4].mxu0 %vm1241_vm1, %v1504_v39 }
 0x522   : > { %2949 = vmatpush3.bf16.xpose.msra.mxu0 %v1646_v40  ;;  %2926 = vmatprep.mubr.msk.bf16.mxu1 %vm3822_vm0, %v3821_v5 }
 0x523   : > { %2950 = vmatprep.mubr.msk.bf16.mxu0 %vm3822_vm0, %v3821_v5  ;;  %2930 = vmatprep.subr.bf16.mxu1 %v3821_v5 }
 0x524   : > { %2960 = vmatprep.subr.bf16.mxu0 %v3821_v5 }
 0x528   : > { %2927 = vmatmul.mubr.msk.bf16.vlgmr.msra.gmra.mrb[12].mxu1 %vm1241_vm1, %v1367_v23 }
 0x529   : > { %2951 = vmatmul.mubr.msk.bf16.vlgmr.msra.gmra.mrb[8].mxu0 %vm1241_vm1, %v1639_v41  ;;  %2932 = vmatprep.mubr.msk.bf16.mxu1 %vm3822_vm0, %v3821_v5 }
 0x52a   : > { %2976 = vmatprep.mubr.msk.bf16.mxu0 %vm3822_vm0, %v3821_v5 }
 0x5f3   : > { %v1355_v42 = vpop.f32.mrb[8].mxu1 }
 0x5f4   : > { %1362 = vst.msk [vmem:[#allocation3] sm:$0xff] %vm1241_vm1, %v1355_v42  ;;  %v2922_v43 = vpop.f32.mrb[9].mxu1  ;;  %v1547_v44 = vpop.f32.mrb[4].mxu0 }
 0x5f5   : > { %v1358_v45 = vpop.f32.mrb[10].mxu1  ;;  %v2940_v46 = vpop.f32.mrb[5].mxu0  ;;  %v1548_v56 = vadd.f32 %v1547_v44, %v4639_v0 }
 0x5f6   : > { %1364 = vst.msk [vmem:[#allocation3 + $0x8] sm:$0x3] %vm1363_vm6, %v1358_v45  ;;  %v2923_v47 = vpop.f32.mrb[11].mxu1  ;;  %v1550_v48 = vpop.f32.mrb[6].mxu0 }
 0x5f7   : > { %v2941_v49 = vpop.f32.mrb[7].mxu0  ;;  %v1551_v2 = vadd.f32 %v1550_v48, %v4639_v0  ;;  %v1554_v3 = vsel %vm1289_vm4, %v1548_v56, -inf }
 0x5f9   : > { %v1557_v8 = vsel %vm1293_vm5, %v1551_v2, -inf }
 0x5fb   : > { %v1411_v50 = vpop.f32.mrb[12].mxu1 }
 0x5fc   : > { %v1412_v51 = vadd.f32 %v1411_v50, %v4639_v0  ;;  %v2928_v52 = vpop.f32.mrb[13].mxu1  ;;  %v1682_v53 = vpop.f32.mrb[8].mxu0 }
 0x5fd   : > { %v1414_v54 = vpop.f32.mrb[14].mxu1  ;;  %v2952_v55 = vpop.f32.mrb[9].mxu0  ;;  %v1683_v7 = vadd.f32 %v1682_v53, %v4639_v0 }
 0x5fe   : > { %v1415_v57 = vadd.f32 %v1414_v54, %v4639_v0  ;;  %v2929_v58 = vpop.f32.mrb[15].mxu1  ;;  %v1685_v60 = vpop.f32.mrb[10].mxu0  ;;  %v1418_v61 = vsel %vm1289_vm4, %v1412_v51, -inf }
 0x5ff   : > { %v2953_v62 = vpop.f32.mrb[11].mxu0  ;;  %1419 = vmax.xlane.f32.xlu0 %v1418_v61  ;;  %v1686_v63 = vadd.f32 %v1685_v60, %v4639_v0  ;;  %v1689_v9 = vsel %vm1289_vm4, %v1683_v7, -inf }
 0x600   : > { %v1421_v1 = vsel %vm1293_vm5, %v1415_v57, -inf }
 0x601   : > { %1422 = vmax.xlane.f32.xlu1 %v1421_v1  ;;  %v1692_v6 = vsel %vm1293_vm5, %v1686_v63, -inf }
 0x603   : > { %1555 = vmax.xlane.f32.xlu0 %v1554_v3 }
 0x605   : > { %1693 = vmax.xlane.f32.xlu1 %v1692_v6 }
 0x607   : > { %1558 = vmax.xlane.f32.xlu0 %v1557_v8 }
 0x60b   : > { %1690 = vmax.xlane.f32.xlu0 %v1689_v9 }
 0x68c   : > { %v1420_v10 = vpop.xlane.xlu0 %1419 }
 0x68d   : > { %v1424_v19 = vsub.f32 %v1412_v51, %v1420_v10  ;;  %v3156_v10 = vld [vmem:[%s4520_s25] sm:$0xff]  }
 0x68e   : > { %v1423_v11 = vpop.xlane.xlu1 %1422  ;;  %2961 = vmatpush3.bf16.msra.mxu0 %v3156_v10  ;;  %v3182_v10 = vld [vmem:[%s4537_s18 + $0x60] ss:$8 sps:$4 sm:$0xff]  }
 0x68f   : > { %v1425_v20 = vsub.f32 %v1415_v57, %v1423_v11  ;;  %v1426_v24 = vmul.f32 1.442695, %v1424_v19  ;;  %2962 = vmatprep.subr.bf16.mxu0 %v3821_v5  ;;  %v3157_v11 = vld [vmem:[%s4520_s25 + $0x8] sm:$0xff]   ;;  %v3162_v19 = vld [vmem:[%s4520_s25 + $0x30] sm:$0xff]  }
 0x690   : > { %v1556_v12 = vpop.xlane.xlu0 %1555 }
 0x691   : > { %v1560_v13 = vsub.f32 %v1548_v56, %v1556_v12  ;;  %v1428_v27 = vmul.f32 1.442695, %v1425_v20  ;;  %v3158_v12 = vld [vmem:[%s4520_s25 + $0x10] sm:$0xff]  }
 0x692   : > { %v1694_v14 = vpop.xlane.xlu1 %1693  ;;  %2963 = vmatpush3.bf16.msra.mxu0 %v3157_v11  ;;  %v3187_v11 = vld [vmem:[%s4537_s18 + $0x74] ss:$8 sps:$4 sm:$0xff]  }
 0x693   : > { %v1562_v15 = vmul.f32 1.442695, %v1560_v13  ;;  %v1696_v16 = vsub.f32 %v1686_v63, %v1694_v14  ;;  %2964 = vmatprep.subr.bf16.mxu0 %v3821_v5  ;;  %v3159_v13 = vld [vmem:[%s4520_s25 + $0x18] sm:$0xff]   ;;  %v3160_v14 = vld [vmem:[%s4520_s25 + $0x20] sm:$0xff]  }
 0x694   : > { %v1559_v17 = vpop.xlane.xlu0 %1558 }
 0x695   : > { %3212 = vpow2.f32 %v1562_v15  ;;  %v1561_v18 = vsub.f32 %v1551_v2, %v1559_v17  ;;  %v1699_v21 = vmul.f32 1.442695, %v1696_v16 }
 0x696   : > { %2965 = vmatpush3.bf16.msra.mxu0 %v3158_v12  ;;  %v3185_v12 = vld [vmem:[%s4537_s18 + $0x70] ss:$8 sps:$4 sm:$0xff]  }
 0x697   : > { %v1564_v0 = vmul.f32 1.442695, %v1561_v18  ;;  %2966 = vmatprep.subr.bf16.mxu0 %v3821_v5  ;;  %v3161_v18 = vld [vmem:[%s4520_s25 + $0x28] sm:$0xff]  }
 0x698   : > { %v1691_v22 = vpop.xlane.xlu0 %1690 }
 0x699   : > { %3214 = vpow2.f32 %v1564_v0  ;;  %v1695_v23 = vsub.f32 %v1683_v7, %v1691_v22  ;;  %v3163_v22 = vld [vmem:[%s4520_s25 + $0x38] sm:$0xff]   ;;  %s4985_s25 = scalar_lea.vmem [#allocation15], %s4502_s1 }
 0x69a   : > { %3216 = vpow2.f32 %v1699_v21  ;;  %2967 = vmatpush3.bf16.msra.mxu0 %v3159_v13 }
 0x69b   : > { %v1697_v28 = vmul.f32 1.442695, %v1695_v23  ;;  %2968 = vmatprep.subr.bf16.mxu0 %v3821_v5 }
 0x69d   : > { %3218 = vpow2.f32 %v1697_v28 }
 0x69e   : > { %3220 = vpow2.f32 %v1426_v24  ;;  %2969 = vmatpush3.bf16.msra.mxu0 %v3160_v14 }
 0x69f   : > { %v3213_v29 = vpop.eup %3212  ;;  %3222 = vpow2.f32 %v1428_v27  ;;  %2970 = vmatprep.subr.bf16.mxu0 %v3821_v5 }
 0x6a0   : > { %v1566_v30 = vsel %vm1289_vm4, %v3213_v29, 0.0 }
 0x6a1   : > { %1567 = vadd.xlane.f32.xlu0 %v1566_v30 }
 0x6a2   : > { %2971 = vmatpush3.bf16.msra.mxu0 %v3161_v18 }
 0x6a3   : > { %v3215_v31 = vpop.eup %3214  ;;  %2972 = vmatprep.subr.bf16.mxu0 %v3821_v5 }
 0x6a4   : > { %v1569_v34 = vsel %vm1293_vm5, %v3215_v31, 0.0  ;;  %v3217_v36 = vpop.eup %3216 }
 0x6a5   : > { %1570 = vadd.xlane.f32.xlu1 %v1569_v34  ;;  %v1704_v40 = vsel %vm1293_vm5, %v3217_v36, 0.0 }
 0x6a6   : > { %2973 = vmatpush3.bf16.msra.mxu0 %v3162_v19 }
 0x6a7   : > { %v3219_v37 = vpop.eup %3218  ;;  %2974 = vmatprep.subr.bf16.mxu0 %v3821_v5 }
 0x6a8   : > { %v3221_v38 = vpop.eup %3220  ;;  %v1701_v39 = vsel %vm1289_vm4, %v3219_v37, 0.0 }
 0x6a9   : > { %v3223_v41 = vpop.eup %3222  ;;  %1702 = vadd.xlane.f32.xlu0 %v1701_v39  ;;  %1705 = vadd.xlane.f32.xlu1 %v1704_v40  ;;  %v1430_v42 = vsel %vm1289_vm4, %v3221_v38, 0.0 }
 0x6aa   : > { %v1433_v43 = vsel %vm1293_vm5, %v3223_v41, 0.0  ;;  %2975 = vmatpush3.bf16.msra.mxu0 %v3163_v22 }
 0x6ad   : > { %1431 = vadd.xlane.f32.xlu0 %v1430_v42  ;;  %1434 = vadd.xlane.f32.xlu1 %v1433_v43 }
 0x6be   : > { %1577 = vrot.lane.b32.xlu1 %v4631_v59, %s3826_s12 }
 0x6c2   : > { %1712 = vrot.lane.b32.xlu1 %v4631_v59, %s3825_s4 }
 0x6c3   : > { %1442 = vrot.lane.b32.xlu0 %v4631_v59, %s3824_s20 }
 0x72e   : > { %v1568_v44 = vpop.xlane.xlu0 %1567 }
 0x732   : > { %v1571_v45 = vpop.xlane.xlu1 %1570 }
 0x736   : > { %v1703_v46 = vpop.xlane.xlu0 %1702  ;;  %v1706_v47 = vpop.xlane.xlu1 %1705 }
 0x73a   : > { %v1432_v48 = vpop.xlane.xlu0 %1431  ;;  %v1435_v49 = vpop.xlane.xlu1 %1434 }
 0x73b   : > { %3224 = vrcp.f32 %v1432_v48 }
 0x73c   : > { %3226 = vrcp.f32 %v1435_v49 }
 0x73d   : > { %3228 = vrcp.f32 %v1571_v45 }
 0x73e   : > { %v1443_v50 = vpop.permute.xlu0 %1442  ;;  %3230 = vrcp.f32 %v1568_v44  ;;  %v1578_v55 = vpop.permute.xlu1 %1577 }
 0x73f   : > { %v1448_v51 = vsel %vm1317_vm2, %v1443_v50, 0  ;;  %3232 = vrcp.f32 %v1703_v46  ;;  %v1583_v58 = vsel %vm1317_vm2, %v1578_v55, 0 }
 0x740   : > { %2931 = vmatpush3.bf16.msra.mxu1 %v1448_v51  ;;  %3234 = vrcp.f32 %v1706_v47  ;;  %v3164_v51 = vld [vmem:[%s4537_s18] ss:$8 sps:$4 sm:$0xff]  }
 0x741   : > { %2942 = vmatprep.subr.bf16.mxu1 %v3821_v5 }
 0x742   : > { %v1713_v63 = vpop.permute.xlu1 %1712 }
 0x743   : > { %v1718_v6 = vsel %vm1317_vm2, %v1713_v63, 0  ;;  %v3170_v63 = vld [vmem:[%s4537_s18 + $0x20] ss:$8 sps:$4 sm:$0xff]  }
 0x745   : > { %v3225_v52 = vpop.eup %3224 }
 0x746   : > { %v3227_v53 = vpop.eup %3226  ;;  %v1437_v54 = vmul.f32 %v3225_v52, %v3221_v38  ;;  %v3166_v52 = vld [vmem:[%s4537_s18 + $0x4] ss:$8 sps:$4 sm:$0xff]  }
 0x747   : > { %v1439_v59 = vmul.f32 %v3227_v53, %v3223_v41  ;;  %v3229_v57 = vpop.eup %3228  ;;  %v2778_v41 = vld [vmem:[%s4984_s16] ss:$0 sm:$0xff]  ;;  %v3169_v53 = vld [vmem:[%s4537_s18 + $0x14] ss:$8 sps:$4 sm:$0xff]  }
 0x748   : > { %v3231_v60 = vpop.eup %3230  ;;  %v1575_v61 = vmul.f32 %v3229_v57, %v3215_v31 }
 0x749   : > { %v1440_v56 = vpack.c.bf16 %v1439_v59, %v1437_v54  ;;  %v1573_v62 = vmul.f32 %v3231_v60, %v3213_v29  ;;  %v3233_v1 = vpop.eup %3232  ;;  %v3167_v54 = vld [vmem:[%s4537_s18 + $0x10] ss:$8 sps:$4 sm:$0xff]  }
 0x74a   : > { %v3235_v3 = vpop.eup %3234  ;;  %v1708_v7 = vmul.f32 %v3233_v1, %v3219_v37  ;;  %v3175_v1 = vld [vmem:[%s4537_s18 + $0x34] ss:$8 sps:$4 sm:$0xff]  }
 0x74b   : > { %2933 = vmatmul.mubr.msk.bf16.vlgmr.msra.gmra.mrb[16].mxu1 %vm1289_vm4, %v1440_v56  ;;  %v1576_v2 = vpack.c.bf16 %v1575_v61, %v1573_v62  ;;  %v1710_v8 = vmul.f32 %v3235_v3, %v3217_v36  ;;  %v3172_v62 = vld [vmem:[%s4537_s18 + $0x24] ss:$8 sps:$4 sm:$0xff]  }
 0x74c   : > { %2943 = vmatpush3.bf16.msra.mxu1 %v1583_v58  ;;  %2944 = vmatprep.mubr.msk.bf16.mxu1 %vm3822_vm0, %v3821_v5  ;;  %v3178_v3 = vld [vmem:[%s4537_s18 + $0x44] ss:$8 sps:$4 sm:$0xff]  }
 0x74d   : > { %2954 = vmatprep.subr.bf16.mxu1 %v3821_v5  ;;  %v1711_v9 = vpack.c.bf16 %v1710_v8, %v1708_v7  ;;  %v3181_v7 = vld [vmem:[%s4537_s18 + $0x54] ss:$8 sps:$4 sm:$0xff]   ;;  %v3179_v8 = vld [vmem:[%s4537_s18 + $0x50] ss:$8 sps:$4 sm:$0xff]  }
 0x753   : > { %2945 = vmatmul.mubr.msk.bf16.vlgmr.msra.gmra.mrb[20].mxu1 %vm1289_vm4, %v1576_v2  ;;  %v3173_v2 = vld [vmem:[%s4537_s18 + $0x30] ss:$8 sps:$4 sm:$0xff]  }
 0x754   : > { %2955 = vmatpush3.bf16.msra.mxu1 %v1718_v6  ;;  %2956 = vmatprep.mubr.msk.bf16.mxu1 %vm3822_vm0, %v3821_v5  ;;  %v3176_v6 = vld [vmem:[%s4537_s18 + $0x40] ss:$8 sps:$4 sm:$0xff]  }
 0x755   : > { %2043 = vmatprep.subr.bf16.mxu1 %v3166_v52 }
 0x75b   : > { %2957 = vmatmul.mubr.msk.bf16.vlgmr.msra.gmra.mrb[24].mxu1 %vm1289_vm4, %v1711_v9  ;;  %v3184_v9 = vld [vmem:[%s4537_s18 + $0x64] ss:$8 sps:$4 sm:$0xff]  }
 0x75c   : > { %2075 = vmatprep.mubr.bf16.mxu1 %v3820_v4  ;;  %2044 = vmatpush1.bf16.msra.mxu1 %v3164_v51 }
 0x75d   : > { %2045 = vmatprep.subr.bf16.mxu1 %v3169_v53 }
 0x760   : > { %2046 = vmatpush1.bf16.msra.mxu1 %v3167_v54 }
 0x761   : > { %2047 = vmatprep.subr.bf16.mxu1 %v3172_v62 }
 0x764   : > { %2048 = vmatpush1.bf16.msra.mxu1 %v3170_v63 }
 0x765   : > { %2049 = vmatprep.subr.bf16.mxu1 %v3175_v1 }
 0x768   : > { %2050 = vmatpush1.bf16.msra.mxu1 %v3173_v2 }
 0x769   : > { %2051 = vmatprep.subr.bf16.mxu1 %v3178_v3 }
 0x76c   : > { %2052 = vmatpush1.bf16.msra.mxu1 %v3176_v6 }
 0x76d   : > { %2053 = vmatprep.subr.bf16.mxu1 %v3181_v7 }
 0x770   : > { %2054 = vmatpush1.bf16.msra.mxu1 %v3179_v8 }
 0x771   : > { %2055 = vmatprep.subr.bf16.mxu1 %v3184_v9 }
 0x774   : > { %2056 = vmatpush1.bf16.msra.mxu1 %v3182_v10 }
 0x775   : > { %2057 = vmatprep.subr.bf16.mxu1 %v3187_v11 }
 0x778   : > { %2058 = vmatpush1.bf16.msra.mxu1 %v3185_v12 }
 0x81e   : > { %v1484_v4 = vpop.f32.mrb[16].mxu1 }
 0x81f   : > { %1493 = vrot.lane.b32.xlu1 %v1484_v4, %s3825_s4  ;;  %v2934_v15 = vpop.f32.mrb[17].mxu1 }
 0x820   : > { %v1487_v16 = vpop.f32.mrb[18].mxu1 }
 0x821   : > { %1495 = vrot.lane.b32.xlu0 %v1487_v16, %s3825_s4  ;;  %v2935_v17 = vpop.f32.mrb[19].mxu1 }
 0x826   : > { %v1619_v20 = vpop.f32.mrb[20].mxu1 }
 0x827   : > { %1628 = vrot.lane.b32.xlu1 %v1619_v20, %s3826_s12  ;;  %v2946_v21 = vpop.f32.mrb[21].mxu1  ;;  %v2787_v20 = vld [vmem:[%s4985_s25] ss:$0 sm:$0xff] }
 0x828   : > { %v1622_v0 = vpop.f32.mrb[22].mxu1 }
 0x829   : > { %1630 = vrot.lane.b32.xlu0 %v1622_v0, %s3826_s12  ;;  %v2947_v23 = vpop.f32.mrb[23].mxu1 }
 0x82a   : > { %v2788_v23 = vld [vmem:[%s4986_s24] ss:$0 sm:$0xff] }
 0x82e   : > { %v1754_v24 = vpop.f32.mrb[24].mxu1 }
 0x82f   : > { %1763 = vrot.lane.b32.xlu1 %v1754_v24, %s3824_s20  ;;  %v2958_v27 = vpop.f32.mrb[25].mxu1 }
 0x830   : > { %v1757_v28 = vpop.f32.mrb[26].mxu1 }
 0x831   : > { %1765 = vrot.lane.b32.xlu0 %v1757_v28, %s3824_s20  ;;  %v2959_v29 = vpop.f32.mrb[27].mxu1 }
 0x891   : > { %v1494_v30 = vpop.permute.xlu1 %1493 }
 0x892   : > { %1500 = vst.msk [vmem:[#allocation3] sm:$0xff] %vm1499_vm7, %v1494_v30  ;;  %v3188_v30 = vld [vmem:[%s4546_s28 + $0x40] sm:$0xff]  }
 0x893   : > { %v1496_v31 = vpop.permute.xlu0 %1495  ;;  %2870 = vmatprep.subr.bf16.mxu0 %v3188_v30 }
 0x894   : > { %1502 = vst.msk [vmem:[#allocation3 + $0x8] sm:$0x3] %vm1501_vm8, %v1496_v31  ;;  %v3189_v31 = vld [vmem:[%s4546_s28] sm:$0xff]  }
 0x899   : > { %v1629_v34 = vpop.permute.xlu1 %1628 }
 0x89a   : > { %1635 = vst.msk [vmem:[#allocation3] sm:$0xff] %vm1634_vm9, %v1629_v34  ;;  %v3190_v34 = vld [vmem:[%s4546_s28 + $0x48] sm:$0xff]  }
 0x89b   : > { %v1631_v5 = vpop.permute.xlu0 %1630 }
 0x89c   : > { %1637 = vst.msk [vmem:[#allocation3 + $0x8] sm:$0x3] %vm1636_vm10, %v1631_v5  ;;  %v3191_v5 = vld [vmem:[%s4546_s28 + $0x8] sm:$0xff]  }
 0x8a1   : > { %v1764_v36 = vpop.permute.xlu1 %1763 }
 0x8a2   : > { %1770 = vst.msk [vmem:[#allocation3] sm:$0xff] %vm1769_vm11, %v1764_v36  ;;  %v3192_v36 = vld [vmem:[%s4546_s28 + $0x50] sm:$0xff]  }
 0x8a3   : > { %v1766_v37 = vpop.permute.xlu0 %1765 }
 0x8a4   : > { %1772 = vst.msk [vmem:[#allocation3 + $0x8] sm:$0x3] %vm1771_vm12, %v1766_v37  ;;  %v3193_v37 = vld [vmem:[%s4546_s28 + $0x10] sm:$0xff]  }
 0x8a9   : > { %v1773_v38 = vld [vmem:[#allocation3] sm:$0xff] }
 0x8ab   : > { %v1774_v39 = vld [vmem:[#allocation3 + $0x8] sm:$0x3] }
 0x8ac   : > { %v1792_v40 = vpack.c.bf16 %v1774_v39, %v1773_v38  ;;  %v3194_v38 = vld [vmem:[%s4546_s28 + $0x58] sm:$0xff]  }
 0x8ad   : > { %v3195_v39 = vld [vmem:[%s4546_s28 + $0x18] sm:$0xff]  }
 0x8ae   : > { %2977 = vmatmul.mubr.bf16.vlgmr.msra.gmra.mrb[12].mxu0 %v1792_v40  ;;  %v3196_v40 = vld [vmem:[%s4546_s28 + $0x60] sm:$0xff]  }
 0x8af   : > { %2871 = vmatpush3.bf16.msra.mxu0 %v3189_v31 }
 0x8b0   : > { %2872 = vmatprep.subr.bf16.mxu0 %v3190_v34 }
 0x8b3   : > { %2873 = vmatpush3.bf16.msra.mxu0 %v3191_v5 }
 0x8b4   : > { %2874 = vmatprep.subr.bf16.mxu0 %v3192_v36  ;;  %v2805_v36 = vld [vmem:[%s835_s15] ss:$0 sm:$0xff] }
 0x8b7   : > { %2875 = vmatpush3.bf16.msra.mxu0 %v3193_v37 }
 0x8b8   : > { %2876 = vmatprep.subr.bf16.mxu0 %v3194_v38 }
 0x8bb   : > { %2877 = vmatpush3.bf16.msra.mxu0 %v3195_v39 }
 0x8bc   : > { %2878 = vmatprep.subr.bf16.mxu0 %v3196_v40 }
 0x981   : > { %v1881_v42 = vpop.f32.mrb[12].mxu0 }
 0x982   : > { %v1882_v43 = vadd.f32 %v2778_v41, %v1881_v42  ;;  %v2978_v44 = vpop.f32.mrb[13].mxu0  ;;  %v3198_v42 = vld [vmem:[%s4546_s28 + $0x68] sm:$0xff]  }
 0x983   : > { %v1884_v45 = vpop.f32.mrb[14].mxu0  ;;  %v3200_v44 = vld [vmem:[%s4546_s28 + $0x70] sm:$0xff]  }
 0x984   : > { %v1885_v46 = vadd.f32 %v2778_v41, %v1884_v45  ;;  %v2979_v47 = vpop.f32.mrb[15].mxu0  ;;  %v1888_v48 = vadd.f32 %v1882_v43, %v4594_v25  ;;  %v3197_v41 = vld [vmem:[%s4546_s28 + $0x20] sm:$0xff]   ;;  %v3199_v43 = vld [vmem:[%s4546_s28 + $0x28] sm:$0xff]   ;;  %v3201_v45 = vld [vmem:[%s4546_s28 + $0x30] sm:$0xff]  }
 0x985   : > { %2879 = vmatpush3.bf16.msra.mxu0 %v3197_v41  ;;  %v3203_v47 = vld [vmem:[%s4546_s28 + $0x38] sm:$0xff]  }
 0x986   : > { %1892 = vadd.xlane.f32.xlu0 %v1888_v48  ;;  %v1889_v49 = vadd.f32 %v1885_v46, %v4596_v26  ;;  %2880 = vmatprep.subr.bf16.mxu0 %v3198_v42  ;;  %v3202_v46 = vld [vmem:[%s4546_s28 + $0x78] sm:$0xff]  }
 0x988   : > { %v1895_v50 = vsel %vm1894_vm13, %v1889_v49, 0.0 }
 0x989   : > { %1896 = vadd.xlane.f32.xlu1 %v1895_v50  ;;  %2881 = vmatpush3.bf16.msra.mxu0 %v3199_v43 }
 0x98a   : > { %2882 = vmatprep.subr.bf16.mxu0 %v3200_v44 }
 0x98d   : > { %2883 = vmatpush3.bf16.msra.mxu0 %v3201_v45 }
 0x98e   : > { %2884 = vmatprep.subr.bf16.mxu0 %v3202_v46 }
 0x991   : > { %2885 = vmatpush3.bf16.msra.mxu0 %v3203_v47 }
 0xa13   : > { %v1893_v59 = vpop.xlane.xlu0 %1892 }
 0xa14   : > { %v1899_v25 = vmul.f32 0.0078125, %v1893_v59 }
 0xa16   : > { %v1901_v55 = vsub.f32 %v1888_v48, %v1899_v25  ;;  %v1897_v56 = vpop.xlane.xlu1 %1896  ;;  %v1950_v48 = vld [vmem:[%s4540_s19] sm:$0x3]  ;;  %s4987_s19 = sld [smem:[#allocation42_spill]] }
 0xa17   : > { %v1900_v26 = vmul.f32 0.0078125, %v1897_v56  ;;  %v1960_v50 = vrot.slane %v1950_v48, %v1009_v35 }
 0xa18   : > { %v1903_v57 = vmul.f32 %v1901_v55, %v1901_v55 }
 0xa19   : > { %v1902_v58 = vsub.f32 %v1889_v49, %v1900_v26  ;;  %v1956_v49 = vrot.slane %v1950_v48, %v4618_v33 }
 0xa1a   : > { %1905 = vadd.xlane.f32.xlu0 %v1903_v57 }
 0xa1b   : > { %v1904_v60 = vmul.f32 %v1902_v58, %v1902_v58 }
 0xa1c   : > { %p2824_p2 = scmp.ne.s32.totalorder %s4987_s19, 1 }
 0xa1d   : > { %v1907_v61 = vsel %vm1894_vm13, %v1904_v60, 0.0 }
 0xa1e   : > { %1908 = vadd.xlane.f32.xlu0 %v1907_v61 }
 0xaa7   : > { %v1906_v13 = vpop.xlane.xlu0 %1905 }
 0xaa8   : > { %v1910_v14 = vmul.f32 0.0078125, %v1906_v13 }
 0xaaa   : > { %v1912_v4 = vadd.f32 1e-12, %v1910_v14 }
 0xaab   : > { %v1909_v15 = vpop.xlane.xlu0 %1908 }
 0xaac   : > { %3236 = vrsqrt.f32 %v1912_v4  ;;  %v1911_v16 = vmul.f32 0.0078125, %v1909_v15 }
 0xaae   : > { %v1913_v17 = vadd.f32 1e-12, %v1911_v16 }
 0xab0   : > { %3238 = vrsqrt.f32 %v1913_v17 }
 0xab6   : > { %v3237_v18 = vpop.eup %3236 }
 0xab7   : > { %v1916_v19 = vmul.f32 %v3237_v18, %v1901_v55 }
 0xab9   : > { %v1924_v22 = vmul.f32 %v2787_v20, %v1916_v19 }
 0xaba   : > { %v3239_v21 = vpop.eup %3238 }
 0xabb   : > { %v1917_v0 = vmul.f32 %v3239_v21, %v1902_v58  ;;  %v4756_v27 = vadd.f32 %v2788_v23, %v1924_v22 }
 0xabd   : > { %v1925_v24 = vmul.f32 %v2787_v20, %v1917_v0 }
 0xabf   : > { %v4758_v28 = vadd.f32 %v2788_v23, %v1925_v24 }
 0xac1   : > { %v1951_v29 = vpack.c.bf16 %v4758_v28, %v4756_v27 }
 0xac3   : > { %2076 = vmatmul.mubr.bf16.vlgmr.msra.gmra.mrb[28].mxu1 %v1951_v29 }
 0xb96   : > { %v2077_v51 = vpop.f32.mrb[28].mxu1 }
 0xb97   : > { %v2078_v52 = vadd.f32 %v2077_v51, %v1956_v49  ;;  %v2079_v53 = vpop.f32.mrb[29].mxu1 }
 0xb98   : > { %v2080_v54 = vadd.f32 %v2079_v53, %v1960_v50  ;;  %v2081_v59 = vpop.f32.mrb[30].mxu1 }
 0xb99   : > { %v2086_v25 = vmul.f32 %v2078_v52, %v2078_v52  ;;  %v2082_v55 = vadd.f32 %v2081_v59, %v1956_v49  ;;  %v2083_v56 = vpop.f32.mrb[31].mxu1 }
 0xb9a   : > { %v2087_v26 = vmul.f32 %v2080_v54, %v2080_v54  ;;  %v2084_v57 = vadd.f32 %v2083_v56, %v1960_v50 }
 0xb9b   : > { %v2090_v58 = vmul.f32 %v2086_v25, %v2078_v52  ;;  %v2088_v60 = vmul.f32 %v2082_v55, %v2082_v55 }
 0xb9c   : > { %v2091_v61 = vmul.f32 %v2087_v26, %v2080_v54  ;;  %v2089_v62 = vmul.f32 %v2084_v57, %v2084_v57 }
 0xb9d   : > { %v2094_v63 = vmul.f32 0.044715, %v2090_v58  ;;  %v2092_v1 = vmul.f32 %v2088_v60, %v2082_v55  ;;  %v2822_v58 = vld [vmem:[%s843_s6] ss:$0 sm:$0xff] }
 0xb9e   : > { %v2095_v33 = vmul.f32 0.044715, %v2091_v61  ;;  %v2093_v2 = vmul.f32 %v2089_v62, %v2084_v57  ;;  %v2823_v61 = vld [vmem:[%s851_s29] ss:$0 sm:$0xff] }
 0xb9f   : > { %v2098_v32 = vadd.f32 %v2094_v63, %v2078_v52  ;;  %v2096_v35 = vmul.f32 0.044715, %v2092_v1 }
 0xba0   : > { %v2099_v3 = vadd.f32 %v2095_v33, %v2080_v54  ;;  %v2097_v6 = vmul.f32 0.044715, %v2093_v2 }
 0xba1   : > { %v2102_v7 = vmul.f32 0.7978846, %v2098_v32  ;;  %v2100_v8 = vadd.f32 %v2096_v35, %v2082_v55 }
 0xba2   : > { %v2103_v9 = vmul.f32 0.7978846, %v2099_v3  ;;  %v2101_v10 = vadd.f32 %v2097_v6, %v2084_v57 }
 0xba3   : > { %3240 = vtanh.f32 %v2102_v7  ;;  %v2104_v11 = vmul.f32 0.7978846, %v2100_v8 }
 0xba4   : > { %3242 = vtanh.f32 %v2103_v9  ;;  %v2105_v12 = vmul.f32 0.7978846, %v2101_v10 }
 0xba5   : > { %3244 = vtanh.f32 %v2104_v11 }
 0xba6   : > { %3246 = vtanh.f32 %v2105_v12 }
 0xbad   : > { %v3241_v13 = vpop.eup %3240 }
 0xbae   : > { %v3243_v14 = vpop.eup %3242  ;;  %v2110_v4 = vadd.f32 1.0, %v3241_v13 }
 0xbaf   : > { %v3245_v15 = vpop.eup %3244  ;;  %v2111_v16 = vadd.f32 1.0, %v3243_v14 }
 0xbb0   : > { %v3247_v17 = vpop.eup %3246  ;;  %v2114_v18 = vmul.f32 0.5, %v2110_v4  ;;  %v2112_v19 = vadd.f32 1.0, %v3245_v15 }
 0xbb1   : > { %v2113_v20 = vadd.f32 1.0, %v3247_v17  ;;  %v2115_v21 = vmul.f32 0.5, %v2111_v16 }
 0xbb2   : > { %v2116_v0 = vmul.f32 0.5, %v2112_v19  ;;  %v2118_v23 = vmul.f32 %v2114_v18, %v2078_v52 }
 0xbb3   : > { %v2117_v22 = vmul.f32 0.5, %v2113_v20  ;;  %v2119_v29 = vmul.f32 %v2115_v21, %v2080_v54 }
 0xbb4   : > { %v2120_v24 = vmul.f32 %v2116_v0, %v2082_v55 }
 0xbb5   : > { %v2121_v30 = vmul.f32 %v2117_v22, %v2084_v57 }
 0xbb6   : > { %v2122_v31 = vpack.c.bf16 %v2120_v24, %v2118_v23 }
 0xbb7   : > { %v2123_v34 = vpack.c.bf16 %v2121_v30, %v2119_v29 }
 0xbb9   : > { %2291 = vmatprep.mubr.bf16.mxu0 %v2123_v34 }
 0xbba   : > { %2292 = vmatmul.mubr.bf16.vlgmr.msra.gmra.mrb[16].mxu0 %v2122_v31 }
 0xc8d   : > { %v2886_v5 = vpop.f32.mrb[16].mxu0 }
 0xc8e   : > { %v2887_v37 = vpop.f32.mrb[17].mxu0 }
 0xc8f   : > { %v2888_v38 = vadd.f32 %v2887_v37, %v2886_v5  ;;  %v2889_v39 = vpop.f32.mrb[18].mxu0 }
 0xc90   : > { %v2890_v40 = vpop.f32.mrb[19].mxu0 }
 0xc91   : > { %v2294_v41 = vadd.f32 %v2888_v38, %v2805_v36  ;;  %v2891_v42 = vadd.f32 %v2890_v40, %v2889_v39 }
 0xc93   : > { %v2297_v43 = vadd.f32 %v2891_v42, %v2805_v36  ;;  %v2300_v44 = vadd.f32 %v2294_v41, %v4756_v27 }
 0xc95   : > { %2304 = vadd.xlane.f32.xlu0 %v2300_v44  ;;  %v2301_v45 = vadd.f32 %v2297_v43, %v4758_v28 }
 0xc97   : > { %v2306_v46 = vsel %vm1894_vm13, %v2301_v45, 0.0 }
 0xc98   : > { %2307 = vadd.xlane.f32.xlu1 %v2306_v46 }
 0xd22   : > { %v2305_v47 = vpop.xlane.xlu0 %2304 }
 0xd23   : > { %v2309_v48 = vmul.f32 0.0078125, %v2305_v47 }
 0xd25   : > { %v2311_v49 = vsub.f32 %v2300_v44, %v2309_v48  ;;  %v2308_v50 = vpop.xlane.xlu1 %2307 }
 0xd26   : > { %v2310_v51 = vmul.f32 0.0078125, %v2308_v50 }
 0xd27   : > { %v2313_v52 = vmul.f32 %v2311_v49, %v2311_v49 }
 0xd28   : > { %v2312_v53 = vsub.f32 %v2301_v45, %v2310_v51 }
 0xd29   : > { %2315 = vadd.xlane.f32.xlu1 %v2313_v52 }
 0xd2a   : > { %v2314_v54 = vmul.f32 %v2312_v53, %v2312_v53 }
 0xd2c   : > { %v2317_v59 = vsel %vm1894_vm13, %v2314_v54, 0.0 }
 0xd2d   : > { %2318 = vadd.xlane.f32.xlu0 %v2317_v59 }
 0xdb6   : > { %v2316_v27 = vpop.xlane.xlu1 %2315 }
 0xdb7   : > { %v2320_v25 = vmul.f32 0.0078125, %v2316_v27 }
 0xdb9   : > { %v2322_v28 = vadd.f32 1e-12, %v2320_v25 }
 0xdba   : > { %v2319_v55 = vpop.xlane.xlu0 %2318 }
 0xdbb   : > { %3248 = vrsqrt.f32 %v2322_v28  ;;  %v2321_v56 = vmul.f32 0.0078125, %v2319_v55 }
 0xdbd   : > { %v2323_v26 = vadd.f32 1e-12, %v2321_v56 }
 0xdbf   : > { %3250 = vrsqrt.f32 %v2323_v26 }
 0xdc5   : > { %v3249_v57 = vpop.eup %3248 }
 0xdc6   : > { %v2326_v60 = vmul.f32 %v3249_v57, %v2311_v49 }
 0xdc8   : > { %v2334_v62 = vmul.f32 %v2822_v58, %v2326_v60 }
 0xdc9   : > { %v3251_v63 = vpop.eup %3250 }
 0xdca   : > { %v2342_v1 = vadd.f32 %v2823_v61, %v2334_v62  ;;  %v2327_v33 = vmul.f32 %v3251_v63, %v2312_v53  ;;  %2349 = sbr.rel (%p2824_p2) target bundleno = 3537 (0xdd1), region = 140 }
 0xdcc   : > { %2344 = vst [vmem:[#allocation2] sm:$0xff] %v2342_v1  ;;  %v2335_v2 = vmul.f32 %v2822_v58, %v2327_v33  ;;  %2350 = vst [vmem:[%s4563_s30] sm:$0xff] (!%p2824_p2), %v2342_v1 }
 0xdce   : > { %v2343_v32 = vadd.f32 %v2823_v61, %v2335_v2 }
 0xdd0   : > { %2345 = vst [vmem:[#allocation2 + $0x8] sm:$0x3] %v2343_v32  ;;  %2351 = vst [vmem:[%s4563_s30 + $0x8] sm:$0x3] (!%p2824_p2), %v2343_v32 }
 0xdd1 PF: > { %s4988_s15 = sld [smem:[#allocation43_spill]]  ;;  %s4989_s29 = sld [smem:[#allocation51_spill]] }
 0xdd2   : > { %s4990_s6 = sld [smem:[#allocation63_spill]]  ;;  %s2366_s0 = sshll.u32 %s4563_s30, 4  ;;  %s4802_s0 = int_to_ptr.vmem [resolvable:$true] %s2366_s0 }
 0xdd3   : > { %s2353_s8 = scalar_lea.sflag [#allocation6], %s4480_s27  ;;  %s3644_s20 = scalar_lea.vmem %s4802_s0, 256 }
 0xdd4   : > { %p3645_p8 = scmp.ne.s32.totalorder %s4802_s0, %s3644_s20  ;;  %s3827_s4 = smov [#allocation27]  }
 0xdd5   : > { %s3648_s12 = sshll.u32 %s3827_s4, 4  ;;  %s3649_s12 = int_to_ptr.vmem [resolvable:$false] %s3648_s12 }
 0xdd6   : > { %s3650_s16 = scalar_lea.vmem %s3649_s12, 512  ;;  %p3651_p6 = scmp.lt.s32.totalorder %s4802_s0, %s3649_s12 }
 0xdd7   : > { %s2835_s1 = sshll.u32 %s4988_s15, 8  ;;  %p4991_p13 = scmp.ne.s32.totalorder %s4989_s29, 0 }
 0xdd8   : > { %s4799_s2 = scalar_lea.hbm %s4990_s6, %s2835_s1  ;;  %p3652_p4 = scmp.lt.s32.totalorder %s3650_s16, %s3644_s20 }
 0xdd9   : > { %p3646_p1 = pnand %p3645_p8, %p4991_p13 }
 0xdda   : > { %p3653_p9 = por %p3652_p4, %p3651_p6 }
 0xddb   : > { %p3647_p0 = pneg %p3646_p1 }
 0xddd   : > { %p3654_p12 = pnand %p3653_p9, %p3647_p0 }
 0xddf   : > { %3657 = shalt.err (!%p3654_p12)
}
 0xde0   : > { %s3658_s30 = scalar_lea.hbm %s4799_s2, 256  ;;  %s3662_s19 = scalar_lea.hbm %s4990_s6, 512 }
 0xde1   : > { %p3659_p10 = scmp.ne.s32.totalorder %s4799_s2, %s3658_s30  ;;  %p3663_p5 = scmp.lt.u32.totalorder %s4799_s2, %s4990_s6 }
 0xde2   : > { %p3664_p3 = scmp.lt.u32.totalorder %s3662_s19, %s3658_s30  ;;  %p3666_p8 = scmp.lt.u32.totalorder %s3658_s30, %s4799_s2 }
 0xde3   : > { %p3660_p11 = pnand %p3659_p10, %p4991_p13 }
 0xde4   : > { %p3665_p2 = por %p3664_p3, %p3663_p5 }
 0xde5   : > { %p3661_p7 = pneg %p3660_p11 }
 0xde6   : > { %p3667_p1 = por %p3666_p8, %p3665_p2 }
 0xde8   : > { %p3668_p0 = pnand %p3667_p1, %p3661_p7 }
 0xdea   : > { %3671 = shalt.err (!%p3668_p0)
}
 0xdeb   : > { %s3828_s18 = smov 128   ;;  %s3829_s28 = smov 8  }
 0xdec   : > { %3014 = dma.vmem_to_hbm [thread:$0]  (%p4991_p13), %s4802_s0, 256, %s4799_s2, %s2353_s8, %s3828_s18, %s3828_s18, %s3829_s28  }
 0xded PF: > { %s4992_s20 = sld [smem:[#allocation40_spill]]  ;;  %s4993_s4 = sld [smem:[#allocation52_spill]] }
 0xdee   : > { %p3020_p6 = scmp.ge.s32.totalorder %s3798_s23, 2 }
 0xdf3   : > { %s2381_s12 = sand.u32 1, %s4992_s20   ;;  %p4994_p4 = scmp.ne.s32.totalorder %s4993_s4, 0 }
 0xdf4   : > { %s2382_s16 = scalar_lea.sflag [#allocation6], %s2381_s12 }
 0xdf5   : > { %p3017_p9 = pnand %p3020_p6, %p4994_p4 }
 0xdf7   : > { %3753 = dma.done.wait (!%p3017_p9), %s2382_s16, 256  }
 0xdf8   : > { %3755 = vsyncadd (!%p3017_p9), %s2382_s16, 4294967040  ;;  %s51_s23 = sadd.s32 1, %s3798_s23   ;;  %s4995_s29 = sld [smem:[#allocation38_spill]] }
 0xdf9   : > { %p48_p12 = scmp.ge.s32.totalorder %s51_s23, 6   ;;  %s4996_s30 = sld [smem:[#allocation39_spill]] }
 0xdfa   : > { %s4997_s15 = sld [smem:[#allocation48_spill]]  ;;  %s4998_s27 = sld [smem:[#allocation41_spill]] }
 0xdfb   : > { %s4999_s18 = sld [smem:[#allocation49_spill]]  ;;  %s5000_s2 = sld [smem:[#allocation45_spill]] }
 0xdfc   : > { %s5001_s0 = sld [smem:[#allocation46_spill]]  ;;  %s5002_s16 = smov %s3774_s17 }
 0xdfd   : > { %s5004_s19 = smov %s3790_s21  ;;  %s5005_s20 = smov %s3794_s22 }
 0xdfe   :  { %50 = sbr.rel (!%p48_p12) target bundleno = 35 (0x23), region = 286 }
 0xe00   : > { %s5003_s17 = smov %s4998_s27 }
 0xe01   : > { %s5006_s21 = smov %s5000_s2 }
 0xe02   : > { %s5007_s22 = smov %s5001_s0 }
 0xe05   :  { %2387 = vsyncpa [#allocation5], 1 }
 0xe06   :  { %2389 = vsyncpa [#allocation5 + $0x1], 1 }
 0xe07   :  { %2390 = vsyncpa [#allocation8], 1 }
 0xe08   :  { %2392 = vsyncpa [#allocation8 + $0x1], 1 }
 0xe09   :  { %2393 = vsyncpa [#allocation11], 1 }
 0xe0a   :  { %2395 = vsyncpa [#allocation11 + $0x1], 1 }
 0xe0b   :  { %2396 = vsyncpa [#allocation14], 1 }
 0xe0c   :  { %2398 = vsyncpa [#allocation14 + $0x1], 1 }
 0xe0d   :  { %2399 = vsyncpa [#allocation17], 1 }
 0xe0e   :  { %2401 = vsyncpa [#allocation17 + $0x1], 1 }
 0xe0f   :  { %2402 = vsyncpa [#allocation20], 1 }
 0xe10   :  { %2404 = vsyncpa [#allocation20 + $0x1], 1 }
 0xe11   :  { %2405 = vsyncpa [#allocation23], 1 }
 0xe12   :  { %2407 = vsyncpa [#allocation23 + $0x1], 1 }
 0xe13   :  { %2408 = vsyncpa [#allocation26], 1 }
 0xe14   :  { %2410 = vsyncpa [#allocation26 + $0x1], 1 }
 0xe15   :  { %2411 = vsyncpa [#allocation6], 1 }
 0xe16   :  { %2413 = vsyncpa [#allocation6 + $0x1], 1 }

</bundles_post_ra>
